<compile_context>
chip_gen: v5e
topology: v5e:2x2
jax: 0.10.0
libtpu: 0.0.40
codegen_flags: <defaults>
</compile_context>

<pallas_src>
import functools

import jax
import jax.numpy as jnp
import numpy as np
from jax.experimental import pallas as pl
from jax.experimental.pallas import tpu as pltpu

INPUT_SIZE = 14
HIDDEN = 128
NUM_LAYERS = 2
OUT_FEATURES = 8
FC_PAD = 128            # lane-dense FC output width (sliced to 8 in wrapper)


# ----------------------------- fused kernel ----------------------------------
def _lstm_recurrence(g_pre, whh, slab_ref, *, T, B, H):
    """Serial LSTM recurrence.

    g_pre: (T*B, 4H) precomputed x @ W_ih^T + (b_ih + b_hh).
    whh:   (H, 4H)  recurrent weights (already transposed).
    Writes the per-step hidden states into slab_ref (T*B, H).
    h / c are carried as values (vregs); the loop is unrolled at trace time.
    """
    h = jnp.zeros((B, H), jnp.float32)
    c = jnp.zeros((B, H), jnp.float32)
    for t in range(T):                                   # static unroll (T=8)
        gates = g_pre[t * B:(t + 1) * B, :] + jnp.dot(
            h, whh, preferred_element_type=jnp.float32)  # (B, 4H)
        i = jax.nn.sigmoid(gates[:, 0 * H:1 * H])
        f = jax.nn.sigmoid(gates[:, 1 * H:2 * H])
        g = jnp.tanh(gates[:, 2 * H:3 * H])
        o = jax.nn.sigmoid(gates[:, 3 * H:4 * H])
        c = f * c + i * g
        h = o * jnp.tanh(c)
        slab_ref[pl.ds(t * B, B), :] = h                 # aligned row store


def _fused_kernel(T, B, x_ref, wih0_ref, whh0_ref, b0_ref,
                  wih1_ref, whh1_ref, b1_ref, wfc_ref, bfc_ref,
                  out_ref, slab_ref):
    H = HIDDEN
    x = x_ref[...]                                       # (T*B, IN)

    # ---- layer 0: hoisted input projection + serial recurrence -------------
    g0 = jnp.dot(x, wih0_ref[...],
                 preferred_element_type=jnp.float32) + b0_ref[...]
    _lstm_recurrence(g0, whh0_ref[...], slab_ref, T=T, B=B, H=H)

    # ---- layer 1: input projection over the whole layer-0 slab -------------
    h0_all = slab_ref[...]                               # (T*B, H)
    g1 = jnp.dot(h0_all, wih1_ref[...],
                 preferred_element_type=jnp.float32) + b1_ref[...]
    # g1 is fully materialized before any layer-1 store, so reusing the slab
    # for the layer-1 hidden states is safe.
    _lstm_recurrence(g1, whh1_ref[...], slab_ref, T=T, B=B, H=H)

    # ---- FC epilogue: one lane-dense (T*B, 128) store -----------------------
    h1_all = slab_ref[...]                               # (T*B, H)
    out_ref[...] = jnp.dot(h1_all, wfc_ref[...],
                           preferred_element_type=jnp.float32) + bfc_ref[...]


def _fused_call(x_flat, packed, *, T, B):
    TB = T * B
    kernel = functools.partial(_fused_kernel, T, B)
    return pl.pallas_call(
        kernel,
        out_shape=jax.ShapeDtypeStruct((TB, FC_PAD), jnp.float32),
        scratch_shapes=[pltpu.VMEM((TB, HIDDEN), jnp.float32)],
    )(x_flat,
      packed["wih0"], packed["whh0"], packed["b0"],
      packed["wih1"], packed["whh1"], packed["b1"],
      packed["wfc"], packed["bfc"])


# ------------------------------ param packing --------------------------------
def pack_params(params):
    """One-time prep: transpose weights, fold biases, lane-pad the FC head."""
    packed = {}
    for l in range(NUM_LAYERS):
        p = params["lstm"][l]
        packed[f"wih{l}"] = jnp.transpose(p["w_ih"]).astype(jnp.float32)  # (in, 4H)
        packed[f"whh{l}"] = jnp.transpose(p["w_hh"]).astype(jnp.float32)  # (H, 4H)
        packed[f"b{l}"] = (p["b_ih"] + p["b_hh"]).reshape(1, 4 * HIDDEN)
    wfc = jnp.zeros((HIDDEN, FC_PAD), jnp.float32)
    wfc = wfc.at[:, :OUT_FEATURES].set(jnp.transpose(params["fc"]["w"]))
    bfc = jnp.zeros((1, FC_PAD), jnp.float32)
    bfc = bfc.at[:, :OUT_FEATURES].set(params["fc"]["b"])
    packed["wfc"] = wfc
    packed["bfc"] = bfc
    return packed


# ------------------------------- full forward --------------------------------
def pinn_lstm_forward(x, packed):
    """x: (B, T, INPUT_SIZE) batch_first (PyTorch convention) -> (B, T, 8)."""
    B, T, _ = x.shape
    B_pad = ((B + 7) // 8) * 8                            # sublane-align batch
    x_tm = jnp.transpose(x, (1, 0, 2)).astype(jnp.float32)        # (T, B, IN)
    x_tm = jnp.pad(x_tm, ((0, 0), (0, B_pad - B), (0, 0)))        # (T, Bp, IN)
    x_flat = x_tm.reshape(T * B_pad, INPUT_SIZE)

    out_pad = _fused_call(x_flat, packed, T=T, B=B_pad)   # (T*Bp, 128)
    out = out_pad.reshape(T, B_pad, FC_PAD)[:, :B, :OUT_FEATURES]
    return jnp.transpose(out, (1, 0, 2))                  # (B, T, 8)


# --------------------------- pure-JAX reference -------------------------------
def pinn_lstm_reference(x, params):
    B, T, _ = x.shape
    h_seq = jnp.transpose(x, (1, 0, 2)).astype(jnp.float32)
    for l in range(NUM_LAYERS):
        p = params["lstm"][l]

        def step(carry, x_t, p=p):
            h, c = carry
            gates = (x_t @ p["w_ih"].T + h @ p["w_hh"].T
                     + p["b_ih"] + p["b_hh"])
            i, f, g, o = jnp.split(gates, 4, axis=-1)
            i, f, o = jax.nn.sigmoid(i), jax.nn.sigmoid(f), jax.nn.sigmoid(o)
            g = jnp.tanh(g)
            c = f * c + i * g
            h = o * jnp.tanh(c)
            return (h, c), h

        init = (jnp.zeros((B, HIDDEN), jnp.float32),
                jnp.zeros((B, HIDDEN), jnp.float32))
        _, h_seq = jax.lax.scan(step, init, h_seq)
    out = h_seq @ params["fc"]["w"].T + params["fc"]["b"]
    return jnp.transpose(out, (1, 0, 2))


# ------------------------------ param init ------------------------------------
def init_params(key):
    params = {"lstm": [], "fc": {}}
    k_lstm = 1.0 / np.sqrt(HIDDEN)
    for l in range(NUM_LAYERS):
        in_sz = INPUT_SIZE if l == 0 else HIDDEN
        key, k1, k2, k3, k4 = jax.random.split(key, 5)
        params["lstm"].append({
            "w_ih": jax.random.uniform(k1, (4 * HIDDEN, in_sz),
                                       jnp.float32, -k_lstm, k_lstm),
            "w_hh": jax.random.uniform(k2, (4 * HIDDEN, HIDDEN),
                                       jnp.float32, -k_lstm, k_lstm),
            "b_ih": jax.random.uniform(k3, (4 * HIDDEN,),
                                       jnp.float32, -k_lstm, k_lstm),
            "b_hh": jax.random.uniform(k4, (4 * HIDDEN,),
                                       jnp.float32, -k_lstm, k_lstm),
        })
    k_fc = 1.0 / np.sqrt(HIDDEN)
    key, k1, k2 = jax.random.split(key, 3)
    params["fc"]["w"] = jax.random.uniform(k1, (OUT_FEATURES, HIDDEN),
                                           jnp.float32, -k_fc, k_fc)
    params["fc"]["b"] = jax.random.uniform(k2, (OUT_FEATURES,),
                                           jnp.float32, -k_fc, k_fc)
    return params


if __name__ == "__main__":
    key = jax.random.PRNGKey(0)
    key, kp, kx = jax.random.split(key, 3)
    params = init_params(kp)
    packed = pack_params(params)            # one-time weight prep

    B, T = 2, 8
    x = jax.random.normal(kx, (B, T, INPUT_SIZE), jnp.float32)

    fwd = jax.jit(pinn_lstm_forward)
    out = jax.block_until_ready(fwd(x, packed))
    assert out.shape == (B, T, OUT_FEATURES), out.shape

    ref = jax.block_until_ready(pinn_lstm_reference(x, params))
    np.testing.assert_allclose(np.asarray(out), np.asarray(ref),
                               rtol=1e-3, atol=1e-3)

    print("KERNEL_OK")
</pallas_src>

<mosaic_0001>
module attributes {stable_mosaic.version = 11 : i64} {
  func.func @_fused_kernel(%arg0: memref<64x14xf32, #tpu.memory_space<vmem>>, %arg1: memref<14x512xf32, #tpu.memory_space<vmem>>, %arg2: memref<128x512xf32, #tpu.memory_space<vmem>>, %arg3: memref<1x512xf32, #tpu.memory_space<vmem>>, %arg4: memref<128x512xf32, #tpu.memory_space<vmem>>, %arg5: memref<128x512xf32, #tpu.memory_space<vmem>>, %arg6: memref<1x512xf32, #tpu.memory_space<vmem>>, %arg7: memref<128x128xf32, #tpu.memory_space<vmem>>, %arg8: memref<1x128xf32, #tpu.memory_space<vmem>>, %arg9: memref<64x128xf32, #tpu.memory_space<vmem>>, %arg10: memref<64x128xf32, #tpu.memory_space<vmem>>) attributes {dimension_semantics = [], scalar_prefetch = 0 : i64, scratch_operands = 1 : i64, tpu.core_type = #tpu.core_type<tc>} {
    %c0 = arith.constant 0 : index
    %c0_0 = arith.constant 0 : index
    %0 = vector.load %arg0[%c0, %c0_0] : memref<64x14xf32, #tpu.memory_space<vmem>>, vector<64x14xf32>
    %c0_1 = arith.constant 0 : index
    %c0_2 = arith.constant 0 : index
    %1 = vector.load %arg1[%c0_1, %c0_2] : memref<14x512xf32, #tpu.memory_space<vmem>>, vector<14x512xf32>
    %cst = arith.constant dense<0.000000e+00> : vector<64x512xf32>
    %2 = tpu.matmul %0, %1, %cst {dimension_numbers = #tpu.dot_dimension_numbers<[1], [0], [0], [1], [0, 0, 1, 1], [], []>} : vector<64x14xf32>, vector<14x512xf32>, vector<64x512xf32> -> vector<64x512xf32>
    %c0_3 = arith.constant 0 : index
    %c0_4 = arith.constant 0 : index
    %3 = vector.load %arg3[%c0_3, %c0_4] : memref<1x512xf32, #tpu.memory_space<vmem>>, vector<1x512xf32>
    %4 = vector.broadcast %3 : vector<1x512xf32> to vector<64x512xf32>
    %5 = arith.addf %2, %4 : vector<64x512xf32>
    %c0_5 = arith.constant 0 : index
    %c0_6 = arith.constant 0 : index
    %6 = vector.load %arg2[%c0_5, %c0_6] : memref<128x512xf32, #tpu.memory_space<vmem>>, vector<128x512xf32>
    %cst_7 = arith.constant 0.000000e+00 : f32
    %7 = vector.broadcast %cst_7 : f32 to vector<8x128xf32>
    %cst_8 = arith.constant 0.000000e+00 : f32
    %8 = vector.broadcast %cst_8 : f32 to vector<8x128xf32>
    %9 = vector.extract_strided_slice %5 {offsets = [0, 0], sizes = [8, 512], strides = [1, 1]} : vector<64x512xf32> to vector<8x512xf32>
    %cst_9 = arith.constant dense<0.000000e+00> : vector<8x512xf32>
    %10 = tpu.matmul %7, %6, %cst_9 {dimension_numbers = #tpu.dot_dimension_numbers<[1], [0], [0], [1], [0, 0, 1, 1], [], []>} : vector<8x128xf32>, vector<128x512xf32>, vector<8x512xf32> -> vector<8x512xf32>
    %11 = arith.addf %9, %10 : vector<8x512xf32>
    %12 = vector.extract_strided_slice %11 {offsets = [0, 0], sizes = [8, 128], strides = [1, 1]} : vector<8x512xf32> to vector<8x128xf32>
    %13 = arith.negf %12 : vector<8x128xf32>
    %14 = math.exp %13 : vector<8x128xf32>
    %cst_10 = arith.constant 1.000000e+00 : f32
    %15 = vector.broadcast %cst_10 : f32 to vector<8x128xf32>
    %16 = arith.addf %15, %14 : vector<8x128xf32>
    %17 = arith.divf %15, %16 : vector<8x128xf32>
    %18 = vector.extract_strided_slice %11 {offsets = [0, 128], sizes = [8, 128], strides = [1, 1]} : vector<8x512xf32> to vector<8x128xf32>
    %19 = arith.negf %18 : vector<8x128xf32>
    %20 = math.exp %19 : vector<8x128xf32>
    %cst_11 = arith.constant 1.000000e+00 : f32
    %21 = vector.broadcast %cst_11 : f32 to vector<8x128xf32>
    %22 = arith.addf %21, %20 : vector<8x128xf32>
    %23 = arith.divf %21, %22 : vector<8x128xf32>
    %24 = vector.extract_strided_slice %11 {offsets = [0, 256], sizes = [8, 128], strides = [1, 1]} : vector<8x512xf32> to vector<8x128xf32>
    %25 = math.tanh %24 : vector<8x128xf32>
    %26 = vector.extract_strided_slice %11 {offsets = [0, 384], sizes = [8, 128], strides = [1, 1]} : vector<8x512xf32> to vector<8x128xf32>
    %27 = arith.negf %26 : vector<8x128xf32>
    %28 = math.exp %27 : vector<8x128xf32>
    %cst_12 = arith.constant 1.000000e+00 : f32
    %29 = vector.broadcast %cst_12 : f32 to vector<8x128xf32>
    %30 = arith.addf %29, %28 : vector<8x128xf32>
    %31 = arith.divf %29, %30 : vector<8x128xf32>
    %32 = arith.mulf %23, %8 : vector<8x128xf32>
    %33 = arith.mulf %17, %25 : vector<8x128xf32>
    %34 = arith.addf %32, %33 : vector<8x128xf32>
    %35 = math.tanh %34 : vector<8x128xf32>
    %36 = arith.mulf %31, %35 : vector<8x128xf32>
    %c0_13 = arith.constant 0 : index
    %c0_14 = arith.constant 0 : index
    %37 = vector.load %arg10[%c0_13, %c0_14] : memref<64x128xf32, #tpu.memory_space<vmem>>, vector<8x128xf32>
    tpu.vector_store %arg10[%c0_13, %c0_14], %36 {strides = array<i32>} : memref<64x128xf32, #tpu.memory_space<vmem>>, vector<8x128xf32>,
    %38 = vector.extract_strided_slice %5 {offsets = [8, 0], sizes = [8, 512], strides = [1, 1]} : vector<64x512xf32> to vector<8x512xf32>
    %cst_15 = arith.constant dense<0.000000e+00> : vector<8x512xf32>
    %39 = tpu.matmul %36, %6, %cst_15 {dimension_numbers = #tpu.dot_dimension_numbers<[1], [0], [0], [1], [0, 0, 1, 1], [], []>} : vector<8x128xf32>, vector<128x512xf32>, vector<8x512xf32> -> vector<8x512xf32>
    %40 = arith.addf %38, %39 : vector<8x512xf32>
    %41 = vector.extract_strided_slice %40 {offsets = [0, 0], sizes = [8, 128], strides = [1, 1]} : vector<8x512xf32> to vector<8x128xf32>
    %42 = arith.negf %41 : vector<8x128xf32>
    %43 = math.exp %42 : vector<8x128xf32>
    %cst_16 = arith.constant 1.000000e+00 : f32
    %44 = vector.broadcast %cst_16 : f32 to vector<8x128xf32>
    %45 = arith.addf %44, %43 : vector<8x128xf32>
    %46 = arith.divf %44, %45 : vector<8x128xf32>
    %47 = vector.extract_strided_slice %40 {offsets = [0, 128], sizes = [8, 128], strides = [1, 1]} : vector<8x512xf32> to vector<8x128xf32>
    %48 = arith.negf %47 : vector<8x128xf32>
    %49 = math.exp %48 : vector<8x128xf32>
    %cst_17 = arith.constant 1.000000e+00 : f32
    %50 = vector.broadcast %cst_17 : f32 to vector<8x128xf32>
    %51 = arith.addf %50, %49 : vector<8x128xf32>
    %52 = arith.divf %50, %51 : vector<8x128xf32>
    %53 = vector.extract_strided_slice %40 {offsets = [0, 256], sizes = [8, 128], strides = [1, 1]} : vector<8x512xf32> to vector<8x128xf32>
    %54 = math.tanh %53 : vector<8x128xf32>
    %55 = vector.extract_strided_slice %40 {offsets = [0, 384], sizes = [8, 128], strides = [1, 1]} : vector<8x512xf32> to vector<8x128xf32>
    %56 = arith.negf %55 : vector<8x128xf32>
    %57 = math.exp %56 : vector<8x128xf32>
    %cst_18 = arith.constant 1.000000e+00 : f32
    %58 = vector.broadcast %cst_18 : f32 to vector<8x128xf32>
    %59 = arith.addf %58, %57 : vector<8x128xf32>
    %60 = arith.divf %58, %59 : vector<8x128xf32>
    %61 = arith.mulf %52, %34 : vector<8x128xf32>
    %62 = arith.mulf %46, %54 : vector<8x128xf32>
    %63 = arith.addf %61, %62 : vector<8x128xf32>
    %64 = math.tanh %63 : vector<8x128xf32>
    %65 = arith.mulf %60, %64 : vector<8x128xf32>
    %c8 = arith.constant 8 : index
    %c0_19 = arith.constant 0 : index
    %66 = vector.load %arg10[%c8, %c0_19] : memref<64x128xf32, #tpu.memory_space<vmem>>, vector<8x128xf32>
    tpu.vector_store %arg10[%c8, %c0_19], %65 {strides = array<i32>} : memref<64x128xf32, #tpu.memory_space<vmem>>, vector<8x128xf32>,
    %67 = vector.extract_strided_slice %5 {offsets = [16, 0], sizes = [8, 512], strides = [1, 1]} : vector<64x512xf32> to vector<8x512xf32>
    %cst_20 = arith.constant dense<0.000000e+00> : vector<8x512xf32>
    %68 = tpu.matmul %65, %6, %cst_20 {dimension_numbers = #tpu.dot_dimension_numbers<[1], [0], [0], [1], [0, 0, 1, 1], [], []>} : vector<8x128xf32>, vector<128x512xf32>, vector<8x512xf32> -> vector<8x512xf32>
    %69 = arith.addf %67, %68 : vector<8x512xf32>
    %70 = vector.extract_strided_slice %69 {offsets = [0, 0], sizes = [8, 128], strides = [1, 1]} : vector<8x512xf32> to vector<8x128xf32>
    %71 = arith.negf %70 : vector<8x128xf32>
    %72 = math.exp %71 : vector<8x128xf32>
    %cst_21 = arith.constant 1.000000e+00 : f32
    %73 = vector.broadcast %cst_21 : f32 to vector<8x128xf32>
    %74 = arith.addf %73, %72 : vector<8x128xf32>
    %75 = arith.divf %73, %74 : vector<8x128xf32>
    %76 = vector.extract_strided_slice %69 {offsets = [0, 128], sizes = [8, 128], strides = [1, 1]} : vector<8x512xf32> to vector<8x128xf32>
    %77 = arith.negf %76 : vector<8x128xf32>
    %78 = math.exp %77 : vector<8x128xf32>
    %cst_22 = arith.constant 1.000000e+00 : f32
    %79 = vector.broadcast %cst_22 : f32 to vector<8x128xf32>
    %80 = arith.addf %79, %78 : vector<8x128xf32>
    %81 = arith.divf %79, %80 : vector<8x128xf32>
    %82 = vector.extract_strided_slice %69 {offsets = [0, 256], sizes = [8, 128], strides = [1, 1]} : vector<8x512xf32> to vector<8x128xf32>
    %83 = math.tanh %82 : vector<8x128xf32>
    %84 = vector.extract_strided_slice %69 {offsets = [0, 384], sizes = [8, 128], strides = [1, 1]} : vector<8x512xf32> to vector<8x128xf32>
    %85 = arith.negf %84 : vector<8x128xf32>
    %86 = math.exp %85 : vector<8x128xf32>
    %cst_23 = arith.constant 1.000000e+00 : f32
    %87 = vector.broadcast %cst_23 : f32 to vector<8x128xf32>
    %88 = arith.addf %87, %86 : vector<8x128xf32>
    %89 = arith.divf %87, %88 : vector<8x128xf32>
    %90 = arith.mulf %81, %63 : vector<8x128xf32>
    %91 = arith.mulf %75, %83 : vector<8x128xf32>
    %92 = arith.addf %90, %91 : vector<8x128xf32>
    %93 = math.tanh %92 : vector<8x128xf32>
    %94 = arith.mulf %89, %93 : vector<8x128xf32>
    %c16 = arith.constant 16 : index
    %c0_24 = arith.constant 0 : index
    %95 = vector.load %arg10[%c16, %c0_24] : memref<64x128xf32, #tpu.memory_space<vmem>>, vector<8x128xf32>
    tpu.vector_store %arg10[%c16, %c0_24], %94 {strides = array<i32>} : memref<64x128xf32, #tpu.memory_space<vmem>>, vector<8x128xf32>,
    %96 = vector.extract_strided_slice %5 {offsets = [24, 0], sizes = [8, 512], strides = [1, 1]} : vector<64x512xf32> to vector<8x512xf32>
    %cst_25 = arith.constant dense<0.000000e+00> : vector<8x512xf32>
    %97 = tpu.matmul %94, %6, %cst_25 {dimension_numbers = #tpu.dot_dimension_numbers<[1], [0], [0], [1], [0, 0, 1, 1], [], []>} : vector<8x128xf32>, vector<128x512xf32>, vector<8x512xf32> -> vector<8x512xf32>
    %98 = arith.addf %96, %97 : vector<8x512xf32>
    %99 = vector.extract_strided_slice %98 {offsets = [0, 0], sizes = [8, 128], strides = [1, 1]} : vector<8x512xf32> to vector<8x128xf32>
    %100 = arith.negf %99 : vector<8x128xf32>
    %101 = math.exp %100 : vector<8x128xf32>
    %cst_26 = arith.constant 1.000000e+00 : f32
    %102 = vector.broadcast %cst_26 : f32 to vector<8x128xf32>
    %103 = arith.addf %102, %101 : vector<8x128xf32>
    %104 = arith.divf %102, %103 : vector<8x128xf32>
    %105 = vector.extract_strided_slice %98 {offsets = [0, 128], sizes = [8, 128], strides = [1, 1]} : vector<8x512xf32> to vector<8x128xf32>
    %106 = arith.negf %105 : vector<8x128xf32>
    %107 = math.exp %106 : vector<8x128xf32>
    %cst_27 = arith.constant 1.000000e+00 : f32
    %108 = vector.broadcast %cst_27 : f32 to vector<8x128xf32>
    %109 = arith.addf %108, %107 : vector<8x128xf32>
    %110 = arith.divf %108, %109 : vector<8x128xf32>
    %111 = vector.extract_strided_slice %98 {offsets = [0, 256], sizes = [8, 128], strides = [1, 1]} : vector<8x512xf32> to vector<8x128xf32>
    %112 = math.tanh %111 : vector<8x128xf32>
    %113 = vector.extract_strided_slice %98 {offsets = [0, 384], sizes = [8, 128], strides = [1, 1]} : vector<8x512xf32> to vector<8x128xf32>
    %114 = arith.negf %113 : vector<8x128xf32>
    %115 = math.exp %114 : vector<8x128xf32>
    %cst_28 = arith.constant 1.000000e+00 : f32
    %116 = vector.broadcast %cst_28 : f32 to vector<8x128xf32>
    %117 = arith.addf %116, %115 : vector<8x128xf32>
    %118 = arith.divf %116, %117 : vector<8x128xf32>
    %119 = arith.mulf %110, %92 : vector<8x128xf32>
    %120 = arith.mulf %104, %112 : vector<8x128xf32>
    %121 = arith.addf %119, %120 : vector<8x128xf32>
    %122 = math.tanh %121 : vector<8x128xf32>
    %123 = arith.mulf %118, %122 : vector<8x128xf32>
    %c24 = arith.constant 24 : index
    %c0_29 = arith.constant 0 : index
    %124 = vector.load %arg10[%c24, %c0_29] : memref<64x128xf32, #tpu.memory_space<vmem>>, vector<8x128xf32>
    tpu.vector_store %arg10[%c24, %c0_29], %123 {strides = array<i32>} : memref<64x128xf32, #tpu.memory_space<vmem>>, vector<8x128xf32>,
    %125 = vector.extract_strided_slice %5 {offsets = [32, 0], sizes = [8, 512], strides = [1, 1]} : vector<64x512xf32> to vector<8x512xf32>
    %cst_30 = arith.constant dense<0.000000e+00> : vector<8x512xf32>
    %126 = tpu.matmul %123, %6, %cst_30 {dimension_numbers = #tpu.dot_dimension_numbers<[1], [0], [0], [1], [0, 0, 1, 1], [], []>} : vector<8x128xf32>, vector<128x512xf32>, vector<8x512xf32> -> vector<8x512xf32>
    %127 = arith.addf %125, %126 : vector<8x512xf32>
    %128 = vector.extract_strided_slice %127 {offsets = [0, 0], sizes = [8, 128], strides = [1, 1]} : vector<8x512xf32> to vector<8x128xf32>
    %129 = arith.negf %128 : vector<8x128xf32>
    %130 = math.exp %129 : vector<8x128xf32>
    %cst_31 = arith.constant 1.000000e+00 : f32
    %131 = vector.broadcast %cst_31 : f32 to vector<8x128xf32>
    %132 = arith.addf %131, %130 : vector<8x128xf32>
    %133 = arith.divf %131, %132 : vector<8x128xf32>
    %134 = vector.extract_strided_slice %127 {offsets = [0, 128], sizes = [8, 128], strides = [1, 1]} : vector<8x512xf32> to vector<8x128xf32>
    %135 = arith.negf %134 : vector<8x128xf32>
    %136 = math.exp %135 : vector<8x128xf32>
    %cst_32 = arith.constant 1.000000e+00 : f32
    %137 = vector.broadcast %cst_32 : f32 to vector<8x128xf32>
    %138 = arith.addf %137, %136 : vector<8x128xf32>
    %139 = arith.divf %137, %138 : vector<8x128xf32>
    %140 = vector.extract_strided_slice %127 {offsets = [0, 256], sizes = [8, 128], strides = [1, 1]} : vector<8x512xf32> to vector<8x128xf32>
    %141 = math.tanh %140 : vector<8x128xf32>
    %142 = vector.extract_strided_slice %127 {offsets = [0, 384], sizes = [8, 128], strides = [1, 1]} : vector<8x512xf32> to vector<8x128xf32>
    %143 = arith.negf %142 : vector<8x128xf32>
    %144 = math.exp %143 : vector<8x128xf32>
    %cst_33 = arith.constant 1.000000e+00 : f32
    %145 = vector.broadcast %cst_33 : f32 to vector<8x128xf32>
    %146 = arith.addf %145, %144 : vector<8x128xf32>
    %147 = arith.divf %145, %146 : vector<8x128xf32>
    %148 = arith.mulf %139, %121 : vector<8x128xf32>
    %149 = arith.mulf %133, %141 : vector<8x128xf32>
    %150 = arith.addf %148, %149 : vector<8x128xf32>
    %151 = math.tanh %150 : vector<8x128xf32>
    %152 = arith.mulf %147, %151 : vector<8x128xf32>
    %c32 = arith.constant 32 : index
    %c0_34 = arith.constant 0 : index
    %153 = vector.load %arg10[%c32, %c0_34] : memref<64x128xf32, #tpu.memory_space<vmem>>, vector<8x128xf32>
    tpu.vector_store %arg10[%c32, %c0_34], %152 {strides = array<i32>} : memref<64x128xf32, #tpu.memory_space<vmem>>, vector<8x128xf32>,
    %154 = vector.extract_strided_slice %5 {offsets = [40, 0], sizes = [8, 512], strides = [1, 1]} : vector<64x512xf32> to vector<8x512xf32>
    %cst_35 = arith.constant dense<0.000000e+00> : vector<8x512xf32>
    %155 = tpu.matmul %152, %6, %cst_35 {dimension_numbers = #tpu.dot_dimension_numbers<[1], [0], [0], [1], [0, 0, 1, 1], [], []>} : vector<8x128xf32>, vector<128x512xf32>, vector<8x512xf32> -> vector<8x512xf32>
    %156 = arith.addf %154, %155 : vector<8x512xf32>
    %157 = vector.extract_strided_slice %156 {offsets = [0, 0], sizes = [8, 128], strides = [1, 1]} : vector<8x512xf32> to vector<8x128xf32>
    %158 = arith.negf %157 : vector<8x128xf32>
    %159 = math.exp %158 : vector<8x128xf32>
    %cst_36 = arith.constant 1.000000e+00 : f32
    %160 = vector.broadcast %cst_36 : f32 to vector<8x128xf32>
    %161 = arith.addf %160, %159 : vector<8x128xf32>
    %162 = arith.divf %160, %161 : vector<8x128xf32>
    %163 = vector.extract_strided_slice %156 {offsets = [0, 128], sizes = [8, 128], strides = [1, 1]} : vector<8x512xf32> to vector<8x128xf32>
    %164 = arith.negf %163 : vector<8x128xf32>
    %165 = math.exp %164 : vector<8x128xf32>
    %cst_37 = arith.constant 1.000000e+00 : f32
    %166 = vector.broadcast %cst_37 : f32 to vector<8x128xf32>
    %167 = arith.addf %166, %165 : vector<8x128xf32>
    %168 = arith.divf %166, %167 : vector<8x128xf32>
    %169 = vector.extract_strided_slice %156 {offsets = [0, 256], sizes = [8, 128], strides = [1, 1]} : vector<8x512xf32> to vector<8x128xf32>
    %170 = math.tanh %169 : vector<8x128xf32>
    %171 = vector.extract_strided_slice %156 {offsets = [0, 384], sizes = [8, 128], strides = [1, 1]} : vector<8x512xf32> to vector<8x128xf32>
    %172 = arith.negf %171 : vector<8x128xf32>
    %173 = math.exp %172 : vector<8x128xf32>
    %cst_38 = arith.constant 1.000000e+00 : f32
    %174 = vector.broadcast %cst_38 : f32 to vector<8x128xf32>
    %175 = arith.addf %174, %173 : vector<8x128xf32>
    %176 = arith.divf %174, %175 : vector<8x128xf32>
    %177 = arith.mulf %168, %150 : vector<8x128xf32>
    %178 = arith.mulf %162, %170 : vector<8x128xf32>
    %179 = arith.addf %177, %178 : vector<8x128xf32>
    %180 = math.tanh %179 : vector<8x128xf32>
    %181 = arith.mulf %176, %180 : vector<8x128xf32>
    %c40 = arith.constant 40 : index
    %c0_39 = arith.constant 0 : index
    %182 = vector.load %arg10[%c40, %c0_39] : memref<64x128xf32, #tpu.memory_space<vmem>>, vector<8x128xf32>
    tpu.vector_store %arg10[%c40, %c0_39], %181 {strides = array<i32>} : memref<64x128xf32, #tpu.memory_space<vmem>>, vector<8x128xf32>,
    %183 = vector.extract_strided_slice %5 {offsets = [48, 0], sizes = [8, 512], strides = [1, 1]} : vector<64x512xf32> to vector<8x512xf32>
    %cst_40 = arith.constant dense<0.000000e+00> : vector<8x512xf32>
    %184 = tpu.matmul %181, %6, %cst_40 {dimension_numbers = #tpu.dot_dimension_numbers<[1], [0], [0], [1], [0, 0, 1, 1], [], []>} : vector<8x128xf32>, vector<128x512xf32>, vector<8x512xf32> -> vector<8x512xf32>
    %185 = arith.addf %183, %184 : vector<8x512xf32>
    %186 = vector.extract_strided_slice %185 {offsets = [0, 0], sizes = [8, 128], strides = [1, 1]} : vector<8x512xf32> to vector<8x128xf32>
    %187 = arith.negf %186 : vector<8x128xf32>
    %188 = math.exp %187 : vector<8x128xf32>
    %cst_41 = arith.constant 1.000000e+00 : f32
    %189 = vector.broadcast %cst_41 : f32 to vector<8x128xf32>
    %190 = arith.addf %189, %188 : vector<8x128xf32>
    %191 = arith.divf %189, %190 : vector<8x128xf32>
    %192 = vector.extract_strided_slice %185 {offsets = [0, 128], sizes = [8, 128], strides = [1, 1]} : vector<8x512xf32> to vector<8x128xf32>
    %193 = arith.negf %192 : vector<8x128xf32>
    %194 = math.exp %193 : vector<8x128xf32>
    %cst_42 = arith.constant 1.000000e+00 : f32
    %195 = vector.broadcast %cst_42 : f32 to vector<8x128xf32>
    %196 = arith.addf %195, %194 : vector<8x128xf32>
    %197 = arith.divf %195, %196 : vector<8x128xf32>
    %198 = vector.extract_strided_slice %185 {offsets = [0, 256], sizes = [8, 128], strides = [1, 1]} : vector<8x512xf32> to vector<8x128xf32>
    %199 = math.tanh %198 : vector<8x128xf32>
    %200 = vector.extract_strided_slice %185 {offsets = [0, 384], sizes = [8, 128], strides = [1, 1]} : vector<8x512xf32> to vector<8x128xf32>
    %201 = arith.negf %200 : vector<8x128xf32>
    %202 = math.exp %201 : vector<8x128xf32>
    %cst_43 = arith.constant 1.000000e+00 : f32
    %203 = vector.broadcast %cst_43 : f32 to vector<8x128xf32>
    %204 = arith.addf %203, %202 : vector<8x128xf32>
    %205 = arith.divf %203, %204 : vector<8x128xf32>
    %206 = arith.mulf %197, %179 : vector<8x128xf32>
    %207 = arith.mulf %191, %199 : vector<8x128xf32>
    %208 = arith.addf %206, %207 : vector<8x128xf32>
    %209 = math.tanh %208 : vector<8x128xf32>
    %210 = arith.mulf %205, %209 : vector<8x128xf32>
    %c48 = arith.constant 48 : index
    %c0_44 = arith.constant 0 : index
    %211 = vector.load %arg10[%c48, %c0_44] : memref<64x128xf32, #tpu.memory_space<vmem>>, vector<8x128xf32>
    tpu.vector_store %arg10[%c48, %c0_44], %210 {strides = array<i32>} : memref<64x128xf32, #tpu.memory_space<vmem>>, vector<8x128xf32>,
    %212 = vector.extract_strided_slice %5 {offsets = [56, 0], sizes = [8, 512], strides = [1, 1]} : vector<64x512xf32> to vector<8x512xf32>
    %cst_45 = arith.constant dense<0.000000e+00> : vector<8x512xf32>
    %213 = tpu.matmul %210, %6, %cst_45 {dimension_numbers = #tpu.dot_dimension_numbers<[1], [0], [0], [1], [0, 0, 1, 1], [], []>} : vector<8x128xf32>, vector<128x512xf32>, vector<8x512xf32> -> vector<8x512xf32>
    %214 = arith.addf %212, %213 : vector<8x512xf32>
    %215 = vector.extract_strided_slice %214 {offsets = [0, 0], sizes = [8, 128], strides = [1, 1]} : vector<8x512xf32> to vector<8x128xf32>
    %216 = arith.negf %215 : vector<8x128xf32>
    %217 = math.exp %216 : vector<8x128xf32>
    %cst_46 = arith.constant 1.000000e+00 : f32
    %218 = vector.broadcast %cst_46 : f32 to vector<8x128xf32>
    %219 = arith.addf %218, %217 : vector<8x128xf32>
    %220 = arith.divf %218, %219 : vector<8x128xf32>
    %221 = vector.extract_strided_slice %214 {offsets = [0, 128], sizes = [8, 128], strides = [1, 1]} : vector<8x512xf32> to vector<8x128xf32>
    %222 = arith.negf %221 : vector<8x128xf32>
    %223 = math.exp %222 : vector<8x128xf32>
    %cst_47 = arith.constant 1.000000e+00 : f32
    %224 = vector.broadcast %cst_47 : f32 to vector<8x128xf32>
    %225 = arith.addf %224, %223 : vector<8x128xf32>
    %226 = arith.divf %224, %225 : vector<8x128xf32>
    %227 = vector.extract_strided_slice %214 {offsets = [0, 256], sizes = [8, 128], strides = [1, 1]} : vector<8x512xf32> to vector<8x128xf32>
    %228 = math.tanh %227 : vector<8x128xf32>
    %229 = vector.extract_strided_slice %214 {offsets = [0, 384], sizes = [8, 128], strides = [1, 1]} : vector<8x512xf32> to vector<8x128xf32>
    %230 = arith.negf %229 : vector<8x128xf32>
    %231 = math.exp %230 : vector<8x128xf32>
    %cst_48 = arith.constant 1.000000e+00 : f32
    %232 = vector.broadcast %cst_48 : f32 to vector<8x128xf32>
    %233 = arith.addf %232, %231 : vector<8x128xf32>
    %234 = arith.divf %232, %233 : vector<8x128xf32>
    %235 = arith.mulf %226, %208 : vector<8x128xf32>
    %236 = arith.mulf %220, %228 : vector<8x128xf32>
    %237 = arith.addf %235, %236 : vector<8x128xf32>
    %238 = math.tanh %237 : vector<8x128xf32>
    %239 = arith.mulf %234, %238 : vector<8x128xf32>
    %c56 = arith.constant 56 : index
    %c0_49 = arith.constant 0 : index
    %240 = vector.load %arg10[%c56, %c0_49] : memref<64x128xf32, #tpu.memory_space<vmem>>, vector<8x128xf32>
    tpu.vector_store %arg10[%c56, %c0_49], %239 {strides = array<i32>} : memref<64x128xf32, #tpu.memory_space<vmem>>, vector<8x128xf32>,
    %c0_50 = arith.constant 0 : index
    %c0_51 = arith.constant 0 : index
    %241 = vector.load %arg10[%c0_50, %c0_51] : memref<64x128xf32, #tpu.memory_space<vmem>>, vector<64x128xf32>
    %c0_52 = arith.constant 0 : index
    %c0_53 = arith.constant 0 : index
    %242 = vector.load %arg4[%c0_52, %c0_53] : memref<128x512xf32, #tpu.memory_space<vmem>>, vector<128x512xf32>
    %cst_54 = arith.constant dense<0.000000e+00> : vector<64x512xf32>
    %243 = tpu.matmul %241, %242, %cst_54 {dimension_numbers = #tpu.dot_dimension_numbers<[1], [0], [0], [1], [0, 0, 1, 1], [], []>} : vector<64x128xf32>, vector<128x512xf32>, vector<64x512xf32> -> vector<64x512xf32>
    %c0_55 = arith.constant 0 : index
    %c0_56 = arith.constant 0 : index
    %244 = vector.load %arg6[%c0_55, %c0_56] : memref<1x512xf32, #tpu.memory_space<vmem>>, vector<1x512xf32>
    %245 = vector.broadcast %244 : vector<1x512xf32> to vector<64x512xf32>
    %246 = arith.addf %243, %245 : vector<64x512xf32>
    %c0_57 = arith.constant 0 : index
    %c0_58 = arith.constant 0 : index
    %247 = vector.load %arg5[%c0_57, %c0_58] : memref<128x512xf32, #tpu.memory_space<vmem>>, vector<128x512xf32>
    %cst_59 = arith.constant 0.000000e+00 : f32
    %248 = vector.broadcast %cst_59 : f32 to vector<8x128xf32>
    %cst_60 = arith.constant 0.000000e+00 : f32
    %249 = vector.broadcast %cst_60 : f32 to vector<8x128xf32>
    %250 = vector.extract_strided_slice %246 {offsets = [0, 0], sizes = [8, 512], strides = [1, 1]} : vector<64x512xf32> to vector<8x512xf32>
    %cst_61 = arith.constant dense<0.000000e+00> : vector<8x512xf32>
    %251 = tpu.matmul %248, %247, %cst_61 {dimension_numbers = #tpu.dot_dimension_numbers<[1], [0], [0], [1], [0, 0, 1, 1], [], []>} : vector<8x128xf32>, vector<128x512xf32>, vector<8x512xf32> -> vector<8x512xf32>
    %252 = arith.addf %250, %251 : vector<8x512xf32>
    %253 = vector.extract_strided_slice %252 {offsets = [0, 0], sizes = [8, 128], strides = [1, 1]} : vector<8x512xf32> to vector<8x128xf32>
    %254 = arith.negf %253 : vector<8x128xf32>
    %255 = math.exp %254 : vector<8x128xf32>
    %cst_62 = arith.constant 1.000000e+00 : f32
    %256 = vector.broadcast %cst_62 : f32 to vector<8x128xf32>
    %257 = arith.addf %256, %255 : vector<8x128xf32>
    %258 = arith.divf %256, %257 : vector<8x128xf32>
    %259 = vector.extract_strided_slice %252 {offsets = [0, 128], sizes = [8, 128], strides = [1, 1]} : vector<8x512xf32> to vector<8x128xf32>
    %260 = arith.negf %259 : vector<8x128xf32>
    %261 = math.exp %260 : vector<8x128xf32>
    %cst_63 = arith.constant 1.000000e+00 : f32
    %262 = vector.broadcast %cst_63 : f32 to vector<8x128xf32>
    %263 = arith.addf %262, %261 : vector<8x128xf32>
    %264 = arith.divf %262, %263 : vector<8x128xf32>
    %265 = vector.extract_strided_slice %252 {offsets = [0, 256], sizes = [8, 128], strides = [1, 1]} : vector<8x512xf32> to vector<8x128xf32>
    %266 = math.tanh %265 : vector<8x128xf32>
    %267 = vector.extract_strided_slice %252 {offsets = [0, 384], sizes = [8, 128], strides = [1, 1]} : vector<8x512xf32> to vector<8x128xf32>
    %268 = arith.negf %267 : vector<8x128xf32>
    %269 = math.exp %268 : vector<8x128xf32>
    %cst_64 = arith.constant 1.000000e+00 : f32
    %270 = vector.broadcast %cst_64 : f32 to vector<8x128xf32>
    %271 = arith.addf %270, %269 : vector<8x128xf32>
    %272 = arith.divf %270, %271 : vector<8x128xf32>
    %273 = arith.mulf %264, %249 : vector<8x128xf32>
    %274 = arith.mulf %258, %266 : vector<8x128xf32>
    %275 = arith.addf %273, %274 : vector<8x128xf32>
    %276 = math.tanh %275 : vector<8x128xf32>
    %277 = arith.mulf %272, %276 : vector<8x128xf32>
    %c0_65 = arith.constant 0 : index
    %c0_66 = arith.constant 0 : index
    %278 = vector.load %arg10[%c0_65, %c0_66] : memref<64x128xf32, #tpu.memory_space<vmem>>, vector<8x128xf32>
    tpu.vector_store %arg10[%c0_65, %c0_66], %277 {strides = array<i32>} : memref<64x128xf32, #tpu.memory_space<vmem>>, vector<8x128xf32>,
    %279 = vector.extract_strided_slice %246 {offsets = [8, 0], sizes = [8, 512], strides = [1, 1]} : vector<64x512xf32> to vector<8x512xf32>
    %cst_67 = arith.constant dense<0.000000e+00> : vector<8x512xf32>
    %280 = tpu.matmul %277, %247, %cst_67 {dimension_numbers = #tpu.dot_dimension_numbers<[1], [0], [0], [1], [0, 0, 1, 1], [], []>} : vector<8x128xf32>, vector<128x512xf32>, vector<8x512xf32> -> vector<8x512xf32>
    %281 = arith.addf %279, %280 : vector<8x512xf32>
    %282 = vector.extract_strided_slice %281 {offsets = [0, 0], sizes = [8, 128], strides = [1, 1]} : vector<8x512xf32> to vector<8x128xf32>
    %283 = arith.negf %282 : vector<8x128xf32>
    %284 = math.exp %283 : vector<8x128xf32>
    %cst_68 = arith.constant 1.000000e+00 : f32
    %285 = vector.broadcast %cst_68 : f32 to vector<8x128xf32>
    %286 = arith.addf %285, %284 : vector<8x128xf32>
    %287 = arith.divf %285, %286 : vector<8x128xf32>
    %288 = vector.extract_strided_slice %281 {offsets = [0, 128], sizes = [8, 128], strides = [1, 1]} : vector<8x512xf32> to vector<8x128xf32>
    %289 = arith.negf %288 : vector<8x128xf32>
    %290 = math.exp %289 : vector<8x128xf32>
    %cst_69 = arith.constant 1.000000e+00 : f32
    %291 = vector.broadcast %cst_69 : f32 to vector<8x128xf32>
    %292 = arith.addf %291, %290 : vector<8x128xf32>
    %293 = arith.divf %291, %292 : vector<8x128xf32>
    %294 = vector.extract_strided_slice %281 {offsets = [0, 256], sizes = [8, 128], strides = [1, 1]} : vector<8x512xf32> to vector<8x128xf32>
    %295 = math.tanh %294 : vector<8x128xf32>
    %296 = vector.extract_strided_slice %281 {offsets = [0, 384], sizes = [8, 128], strides = [1, 1]} : vector<8x512xf32> to vector<8x128xf32>
    %297 = arith.negf %296 : vector<8x128xf32>
    %298 = math.exp %297 : vector<8x128xf32>
    %cst_70 = arith.constant 1.000000e+00 : f32
    %299 = vector.broadcast %cst_70 : f32 to vector<8x128xf32>
    %300 = arith.addf %299, %298 : vector<8x128xf32>
    %301 = arith.divf %299, %300 : vector<8x128xf32>
    %302 = arith.mulf %293, %275 : vector<8x128xf32>
    %303 = arith.mulf %287, %295 : vector<8x128xf32>
    %304 = arith.addf %302, %303 : vector<8x128xf32>
    %305 = math.tanh %304 : vector<8x128xf32>
    %306 = arith.mulf %301, %305 : vector<8x128xf32>
    %c8_71 = arith.constant 8 : index
    %c0_72 = arith.constant 0 : index
    %307 = vector.load %arg10[%c8_71, %c0_72] : memref<64x128xf32, #tpu.memory_space<vmem>>, vector<8x128xf32>
    tpu.vector_store %arg10[%c8_71, %c0_72], %306 {strides = array<i32>} : memref<64x128xf32, #tpu.memory_space<vmem>>, vector<8x128xf32>,
    %308 = vector.extract_strided_slice %246 {offsets = [16, 0], sizes = [8, 512], strides = [1, 1]} : vector<64x512xf32> to vector<8x512xf32>
    %cst_73 = arith.constant dense<0.000000e+00> : vector<8x512xf32>
    %309 = tpu.matmul %306, %247, %cst_73 {dimension_numbers = #tpu.dot_dimension_numbers<[1], [0], [0], [1], [0, 0, 1, 1], [], []>} : vector<8x128xf32>, vector<128x512xf32>, vector<8x512xf32> -> vector<8x512xf32>
    %310 = arith.addf %308, %309 : vector<8x512xf32>
    %311 = vector.extract_strided_slice %310 {offsets = [0, 0], sizes = [8, 128], strides = [1, 1]} : vector<8x512xf32> to vector<8x128xf32>
    %312 = arith.negf %311 : vector<8x128xf32>
    %313 = math.exp %312 : vector<8x128xf32>
    %cst_74 = arith.constant 1.000000e+00 : f32
    %314 = vector.broadcast %cst_74 : f32 to vector<8x128xf32>
    %315 = arith.addf %314, %313 : vector<8x128xf32>
    %316 = arith.divf %314, %315 : vector<8x128xf32>
    %317 = vector.extract_strided_slice %310 {offsets = [0, 128], sizes = [8, 128], strides = [1, 1]} : vector<8x512xf32> to vector<8x128xf32>
    %318 = arith.negf %317 : vector<8x128xf32>
    %319 = math.exp %318 : vector<8x128xf32>
    %cst_75 = arith.constant 1.000000e+00 : f32
    %320 = vector.broadcast %cst_75 : f32 to vector<8x128xf32>
    %321 = arith.addf %320, %319 : vector<8x128xf32>
    %322 = arith.divf %320, %321 : vector<8x128xf32>
    %323 = vector.extract_strided_slice %310 {offsets = [0, 256], sizes = [8, 128], strides = [1, 1]} : vector<8x512xf32> to vector<8x128xf32>
    %324 = math.tanh %323 : vector<8x128xf32>
    %325 = vector.extract_strided_slice %310 {offsets = [0, 384], sizes = [8, 128], strides = [1, 1]} : vector<8x512xf32> to vector<8x128xf32>
    %326 = arith.negf %325 : vector<8x128xf32>
    %327 = math.exp %326 : vector<8x128xf32>
    %cst_76 = arith.constant 1.000000e+00 : f32
    %328 = vector.broadcast %cst_76 : f32 to vector<8x128xf32>
    %329 = arith.addf %328, %327 : vector<8x128xf32>
    %330 = arith.divf %328, %329 : vector<8x128xf32>
    %331 = arith.mulf %322, %304 : vector<8x128xf32>
    %332 = arith.mulf %316, %324 : vector<8x128xf32>
    %333 = arith.addf %331, %332 : vector<8x128xf32>
    %334 = math.tanh %333 : vector<8x128xf32>
    %335 = arith.mulf %330, %334 : vector<8x128xf32>
    %c16_77 = arith.constant 16 : index
    %c0_78 = arith.constant 0 : index
    %336 = vector.load %arg10[%c16_77, %c0_78] : memref<64x128xf32, #tpu.memory_space<vmem>>, vector<8x128xf32>
    tpu.vector_store %arg10[%c16_77, %c0_78], %335 {strides = array<i32>} : memref<64x128xf32, #tpu.memory_space<vmem>>, vector<8x128xf32>,
    %337 = vector.extract_strided_slice %246 {offsets = [24, 0], sizes = [8, 512], strides = [1, 1]} : vector<64x512xf32> to vector<8x512xf32>
    %cst_79 = arith.constant dense<0.000000e+00> : vector<8x512xf32>
    %338 = tpu.matmul %335, %247, %cst_79 {dimension_numbers = #tpu.dot_dimension_numbers<[1], [0], [0], [1], [0, 0, 1, 1], [], []>} : vector<8x128xf32>, vector<128x512xf32>, vector<8x512xf32> -> vector<8x512xf32>
    %339 = arith.addf %337, %338 : vector<8x512xf32>
    %340 = vector.extract_strided_slice %339 {offsets = [0, 0], sizes = [8, 128], strides = [1, 1]} : vector<8x512xf32> to vector<8x128xf32>
    %341 = arith.negf %340 : vector<8x128xf32>
    %342 = math.exp %341 : vector<8x128xf32>
    %cst_80 = arith.constant 1.000000e+00 : f32
    %343 = vector.broadcast %cst_80 : f32 to vector<8x128xf32>
    %344 = arith.addf %343, %342 : vector<8x128xf32>
    %345 = arith.divf %343, %344 : vector<8x128xf32>
    %346 = vector.extract_strided_slice %339 {offsets = [0, 128], sizes = [8, 128], strides = [1, 1]} : vector<8x512xf32> to vector<8x128xf32>
    %347 = arith.negf %346 : vector<8x128xf32>
    %348 = math.exp %347 : vector<8x128xf32>
    %cst_81 = arith.constant 1.000000e+00 : f32
    %349 = vector.broadcast %cst_81 : f32 to vector<8x128xf32>
    %350 = arith.addf %349, %348 : vector<8x128xf32>
    %351 = arith.divf %349, %350 : vector<8x128xf32>
    %352 = vector.extract_strided_slice %339 {offsets = [0, 256], sizes = [8, 128], strides = [1, 1]} : vector<8x512xf32> to vector<8x128xf32>
    %353 = math.tanh %352 : vector<8x128xf32>
    %354 = vector.extract_strided_slice %339 {offsets = [0, 384], sizes = [8, 128], strides = [1, 1]} : vector<8x512xf32> to vector<8x128xf32>
    %355 = arith.negf %354 : vector<8x128xf32>
    %356 = math.exp %355 : vector<8x128xf32>
    %cst_82 = arith.constant 1.000000e+00 : f32
    %357 = vector.broadcast %cst_82 : f32 to vector<8x128xf32>
    %358 = arith.addf %357, %356 : vector<8x128xf32>
    %359 = arith.divf %357, %358 : vector<8x128xf32>
    %360 = arith.mulf %351, %333 : vector<8x128xf32>
    %361 = arith.mulf %345, %353 : vector<8x128xf32>
    %362 = arith.addf %360, %361 : vector<8x128xf32>
    %363 = math.tanh %362 : vector<8x128xf32>
    %364 = arith.mulf %359, %363 : vector<8x128xf32>
    %c24_83 = arith.constant 24 : index
    %c0_84 = arith.constant 0 : index
    %365 = vector.load %arg10[%c24_83, %c0_84] : memref<64x128xf32, #tpu.memory_space<vmem>>, vector<8x128xf32>
    tpu.vector_store %arg10[%c24_83, %c0_84], %364 {strides = array<i32>} : memref<64x128xf32, #tpu.memory_space<vmem>>, vector<8x128xf32>,
    %366 = vector.extract_strided_slice %246 {offsets = [32, 0], sizes = [8, 512], strides = [1, 1]} : vector<64x512xf32> to vector<8x512xf32>
    %cst_85 = arith.constant dense<0.000000e+00> : vector<8x512xf32>
    %367 = tpu.matmul %364, %247, %cst_85 {dimension_numbers = #tpu.dot_dimension_numbers<[1], [0], [0], [1], [0, 0, 1, 1], [], []>} : vector<8x128xf32>, vector<128x512xf32>, vector<8x512xf32> -> vector<8x512xf32>
    %368 = arith.addf %366, %367 : vector<8x512xf32>
    %369 = vector.extract_strided_slice %368 {offsets = [0, 0], sizes = [8, 128], strides = [1, 1]} : vector<8x512xf32> to vector<8x128xf32>
    %370 = arith.negf %369 : vector<8x128xf32>
    %371 = math.exp %370 : vector<8x128xf32>
    %cst_86 = arith.constant 1.000000e+00 : f32
    %372 = vector.broadcast %cst_86 : f32 to vector<8x128xf32>
    %373 = arith.addf %372, %371 : vector<8x128xf32>
    %374 = arith.divf %372, %373 : vector<8x128xf32>
    %375 = vector.extract_strided_slice %368 {offsets = [0, 128], sizes = [8, 128], strides = [1, 1]} : vector<8x512xf32> to vector<8x128xf32>
    %376 = arith.negf %375 : vector<8x128xf32>
    %377 = math.exp %376 : vector<8x128xf32>
    %cst_87 = arith.constant 1.000000e+00 : f32
    %378 = vector.broadcast %cst_87 : f32 to vector<8x128xf32>
    %379 = arith.addf %378, %377 : vector<8x128xf32>
    %380 = arith.divf %378, %379 : vector<8x128xf32>
    %381 = vector.extract_strided_slice %368 {offsets = [0, 256], sizes = [8, 128], strides = [1, 1]} : vector<8x512xf32> to vector<8x128xf32>
    %382 = math.tanh %381 : vector<8x128xf32>
    %383 = vector.extract_strided_slice %368 {offsets = [0, 384], sizes = [8, 128], strides = [1, 1]} : vector<8x512xf32> to vector<8x128xf32>
    %384 = arith.negf %383 : vector<8x128xf32>
    %385 = math.exp %384 : vector<8x128xf32>
    %cst_88 = arith.constant 1.000000e+00 : f32
    %386 = vector.broadcast %cst_88 : f32 to vector<8x128xf32>
    %387 = arith.addf %386, %385 : vector<8x128xf32>
    %388 = arith.divf %386, %387 : vector<8x128xf32>
    %389 = arith.mulf %380, %362 : vector<8x128xf32>
    %390 = arith.mulf %374, %382 : vector<8x128xf32>
    %391 = arith.addf %389, %390 : vector<8x128xf32>
    %392 = math.tanh %391 : vector<8x128xf32>
    %393 = arith.mulf %388, %392 : vector<8x128xf32>
    %c32_89 = arith.constant 32 : index
    %c0_90 = arith.constant 0 : index
    %394 = vector.load %arg10[%c32_89, %c0_90] : memref<64x128xf32, #tpu.memory_space<vmem>>, vector<8x128xf32>
    tpu.vector_store %arg10[%c32_89, %c0_90], %393 {strides = array<i32>} : memref<64x128xf32, #tpu.memory_space<vmem>>, vector<8x128xf32>,
    %395 = vector.extract_strided_slice %246 {offsets = [40, 0], sizes = [8, 512], strides = [1, 1]} : vector<64x512xf32> to vector<8x512xf32>
    %cst_91 = arith.constant dense<0.000000e+00> : vector<8x512xf32>
    %396 = tpu.matmul %393, %247, %cst_91 {dimension_numbers = #tpu.dot_dimension_numbers<[1], [0], [0], [1], [0, 0, 1, 1], [], []>} : vector<8x128xf32>, vector<128x512xf32>, vector<8x512xf32> -> vector<8x512xf32>
    %397 = arith.addf %395, %396 : vector<8x512xf32>
    %398 = vector.extract_strided_slice %397 {offsets = [0, 0], sizes = [8, 128], strides = [1, 1]} : vector<8x512xf32> to vector<8x128xf32>
    %399 = arith.negf %398 : vector<8x128xf32>
    %400 = math.exp %399 : vector<8x128xf32>
    %cst_92 = arith.constant 1.000000e+00 : f32
    %401 = vector.broadcast %cst_92 : f32 to vector<8x128xf32>
    %402 = arith.addf %401, %400 : vector<8x128xf32>
    %403 = arith.divf %401, %402 : vector<8x128xf32>
    %404 = vector.extract_strided_slice %397 {offsets = [0, 128], sizes = [8, 128], strides = [1, 1]} : vector<8x512xf32> to vector<8x128xf32>
    %405 = arith.negf %404 : vector<8x128xf32>
    %406 = math.exp %405 : vector<8x128xf32>
    %cst_93 = arith.constant 1.000000e+00 : f32
    %407 = vector.broadcast %cst_93 : f32 to vector<8x128xf32>
    %408 = arith.addf %407, %406 : vector<8x128xf32>
    %409 = arith.divf %407, %408 : vector<8x128xf32>
    %410 = vector.extract_strided_slice %397 {offsets = [0, 256], sizes = [8, 128], strides = [1, 1]} : vector<8x512xf32> to vector<8x128xf32>
    %411 = math.tanh %410 : vector<8x128xf32>
    %412 = vector.extract_strided_slice %397 {offsets = [0, 384], sizes = [8, 128], strides = [1, 1]} : vector<8x512xf32> to vector<8x128xf32>
    %413 = arith.negf %412 : vector<8x128xf32>
    %414 = math.exp %413 : vector<8x128xf32>
    %cst_94 = arith.constant 1.000000e+00 : f32
    %415 = vector.broadcast %cst_94 : f32 to vector<8x128xf32>
    %416 = arith.addf %415, %414 : vector<8x128xf32>
    %417 = arith.divf %415, %416 : vector<8x128xf32>
    %418 = arith.mulf %409, %391 : vector<8x128xf32>
    %419 = arith.mulf %403, %411 : vector<8x128xf32>
    %420 = arith.addf %418, %419 : vector<8x128xf32>
    %421 = math.tanh %420 : vector<8x128xf32>
    %422 = arith.mulf %417, %421 : vector<8x128xf32>
    %c40_95 = arith.constant 40 : index
    %c0_96 = arith.constant 0 : index
    %423 = vector.load %arg10[%c40_95, %c0_96] : memref<64x128xf32, #tpu.memory_space<vmem>>, vector<8x128xf32>
    tpu.vector_store %arg10[%c40_95, %c0_96], %422 {strides = array<i32>} : memref<64x128xf32, #tpu.memory_space<vmem>>, vector<8x128xf32>,
    %424 = vector.extract_strided_slice %246 {offsets = [48, 0], sizes = [8, 512], strides = [1, 1]} : vector<64x512xf32> to vector<8x512xf32>
    %cst_97 = arith.constant dense<0.000000e+00> : vector<8x512xf32>
    %425 = tpu.matmul %422, %247, %cst_97 {dimension_numbers = #tpu.dot_dimension_numbers<[1], [0], [0], [1], [0, 0, 1, 1], [], []>} : vector<8x128xf32>, vector<128x512xf32>, vector<8x512xf32> -> vector<8x512xf32>
    %426 = arith.addf %424, %425 : vector<8x512xf32>
    %427 = vector.extract_strided_slice %426 {offsets = [0, 0], sizes = [8, 128], strides = [1, 1]} : vector<8x512xf32> to vector<8x128xf32>
    %428 = arith.negf %427 : vector<8x128xf32>
    %429 = math.exp %428 : vector<8x128xf32>
    %cst_98 = arith.constant 1.000000e+00 : f32
    %430 = vector.broadcast %cst_98 : f32 to vector<8x128xf32>
    %431 = arith.addf %430, %429 : vector<8x128xf32>
    %432 = arith.divf %430, %431 : vector<8x128xf32>
    %433 = vector.extract_strided_slice %426 {offsets = [0, 128], sizes = [8, 128], strides = [1, 1]} : vector<8x512xf32> to vector<8x128xf32>
    %434 = arith.negf %433 : vector<8x128xf32>
    %435 = math.exp %434 : vector<8x128xf32>
    %cst_99 = arith.constant 1.000000e+00 : f32
    %436 = vector.broadcast %cst_99 : f32 to vector<8x128xf32>
    %437 = arith.addf %436, %435 : vector<8x128xf32>
    %438 = arith.divf %436, %437 : vector<8x128xf32>
    %439 = vector.extract_strided_slice %426 {offsets = [0, 256], sizes = [8, 128], strides = [1, 1]} : vector<8x512xf32> to vector<8x128xf32>
    %440 = math.tanh %439 : vector<8x128xf32>
    %441 = vector.extract_strided_slice %426 {offsets = [0, 384], sizes = [8, 128], strides = [1, 1]} : vector<8x512xf32> to vector<8x128xf32>
    %442 = arith.negf %441 : vector<8x128xf32>
    %443 = math.exp %442 : vector<8x128xf32>
    %cst_100 = arith.constant 1.000000e+00 : f32
    %444 = vector.broadcast %cst_100 : f32 to vector<8x128xf32>
    %445 = arith.addf %444, %443 : vector<8x128xf32>
    %446 = arith.divf %444, %445 : vector<8x128xf32>
    %447 = arith.mulf %438, %420 : vector<8x128xf32>
    %448 = arith.mulf %432, %440 : vector<8x128xf32>
    %449 = arith.addf %447, %448 : vector<8x128xf32>
    %450 = math.tanh %449 : vector<8x128xf32>
    %451 = arith.mulf %446, %450 : vector<8x128xf32>
    %c48_101 = arith.constant 48 : index
    %c0_102 = arith.constant 0 : index
    %452 = vector.load %arg10[%c48_101, %c0_102] : memref<64x128xf32, #tpu.memory_space<vmem>>, vector<8x128xf32>
    tpu.vector_store %arg10[%c48_101, %c0_102], %451 {strides = array<i32>} : memref<64x128xf32, #tpu.memory_space<vmem>>, vector<8x128xf32>,
    %453 = vector.extract_strided_slice %246 {offsets = [56, 0], sizes = [8, 512], strides = [1, 1]} : vector<64x512xf32> to vector<8x512xf32>
    %cst_103 = arith.constant dense<0.000000e+00> : vector<8x512xf32>
    %454 = tpu.matmul %451, %247, %cst_103 {dimension_numbers = #tpu.dot_dimension_numbers<[1], [0], [0], [1], [0, 0, 1, 1], [], []>} : vector<8x128xf32>, vector<128x512xf32>, vector<8x512xf32> -> vector<8x512xf32>
    %455 = arith.addf %453, %454 : vector<8x512xf32>
    %456 = vector.extract_strided_slice %455 {offsets = [0, 0], sizes = [8, 128], strides = [1, 1]} : vector<8x512xf32> to vector<8x128xf32>
    %457 = arith.negf %456 : vector<8x128xf32>
    %458 = math.exp %457 : vector<8x128xf32>
    %cst_104 = arith.constant 1.000000e+00 : f32
    %459 = vector.broadcast %cst_104 : f32 to vector<8x128xf32>
    %460 = arith.addf %459, %458 : vector<8x128xf32>
    %461 = arith.divf %459, %460 : vector<8x128xf32>
    %462 = vector.extract_strided_slice %455 {offsets = [0, 128], sizes = [8, 128], strides = [1, 1]} : vector<8x512xf32> to vector<8x128xf32>
    %463 = arith.negf %462 : vector<8x128xf32>
    %464 = math.exp %463 : vector<8x128xf32>
    %cst_105 = arith.constant 1.000000e+00 : f32
    %465 = vector.broadcast %cst_105 : f32 to vector<8x128xf32>
    %466 = arith.addf %465, %464 : vector<8x128xf32>
    %467 = arith.divf %465, %466 : vector<8x128xf32>
    %468 = vector.extract_strided_slice %455 {offsets = [0, 256], sizes = [8, 128], strides = [1, 1]} : vector<8x512xf32> to vector<8x128xf32>
    %469 = math.tanh %468 : vector<8x128xf32>
    %470 = vector.extract_strided_slice %455 {offsets = [0, 384], sizes = [8, 128], strides = [1, 1]} : vector<8x512xf32> to vector<8x128xf32>
    %471 = arith.negf %470 : vector<8x128xf32>
    %472 = math.exp %471 : vector<8x128xf32>
    %cst_106 = arith.constant 1.000000e+00 : f32
    %473 = vector.broadcast %cst_106 : f32 to vector<8x128xf32>
    %474 = arith.addf %473, %472 : vector<8x128xf32>
    %475 = arith.divf %473, %474 : vector<8x128xf32>
    %476 = arith.mulf %467, %449 : vector<8x128xf32>
    %477 = arith.mulf %461, %469 : vector<8x128xf32>
    %478 = arith.addf %476, %477 : vector<8x128xf32>
    %479 = math.tanh %478 : vector<8x128xf32>
    %480 = arith.mulf %475, %479 : vector<8x128xf32>
    %c56_107 = arith.constant 56 : index
    %c0_108 = arith.constant 0 : index
    %481 = vector.load %arg10[%c56_107, %c0_108] : memref<64x128xf32, #tpu.memory_space<vmem>>, vector<8x128xf32>
    tpu.vector_store %arg10[%c56_107, %c0_108], %480 {strides = array<i32>} : memref<64x128xf32, #tpu.memory_space<vmem>>, vector<8x128xf32>,
    %c0_109 = arith.constant 0 : index
    %c0_110 = arith.constant 0 : index
    %482 = vector.load %arg10[%c0_109, %c0_110] : memref<64x128xf32, #tpu.memory_space<vmem>>, vector<64x128xf32>
    %c0_111 = arith.constant 0 : index
    %c0_112 = arith.constant 0 : index
    %483 = vector.load %arg7[%c0_111, %c0_112] : memref<128x128xf32, #tpu.memory_space<vmem>>, vector<128x128xf32>
    %cst_113 = arith.constant dense<0.000000e+00> : vector<64x128xf32>
    %484 = tpu.matmul %482, %483, %cst_113 {dimension_numbers = #tpu.dot_dimension_numbers<[1], [0], [0], [1], [0, 0, 1, 1], [], []>} : vector<64x128xf32>, vector<128x128xf32>, vector<64x128xf32> -> vector<64x128xf32>
    %c0_114 = arith.constant 0 : index
    %c0_115 = arith.constant 0 : index
    %485 = vector.load %arg8[%c0_114, %c0_115] : memref<1x128xf32, #tpu.memory_space<vmem>>, vector<1x128xf32>
    %486 = vector.broadcast %485 : vector<1x128xf32> to vector<64x128xf32>
    %487 = arith.addf %484, %486 : vector<64x128xf32>
    %c0_116 = arith.constant 0 : index
    %c0_117 = arith.constant 0 : index
    %488 = vector.load %arg9[%c0_116, %c0_117] : memref<64x128xf32, #tpu.memory_space<vmem>>, vector<64x128xf32>
    tpu.vector_store %arg9[%c0_116, %c0_117], %487 {strides = array<i32>} : memref<64x128xf32, #tpu.memory_space<vmem>>, vector<64x128xf32>,
    return
  }
}

</mosaic_0001>

<bundles_post_ra>
// kernel: pinn_lstm_forward.1
= control target key start
LH: loop header
LB: loop body
LE: loop exit
PB: predicated region body
PF: predicated region fallthrough
CT: control target
= control target key end

     0   :  { %14 = vsyncpa [#allocation4], 0  ;;  %s5978_s0 = inlined_call_operand.vmem [shape: f32[64,14], index: 0, kind: input, shape index: {}]   ;;  %s5979_s1 = inlined_call_operand.vmem [shape: f32[14,512], index: 1, kind: input, shape index: {}]   ;;  %s5980_s2 = inlined_call_operand.hbm [shape: f32[128,512], index: 2, kind: input, shape index: {}]   ;;  %s5981_s3 = inlined_call_operand.vmem [shape: f32[1,512], index: 3, kind: input, shape index: {}]   ;;  %s5982_s4 = inlined_call_operand.hbm [shape: f32[128,512], index: 4, kind: input, shape index: {}]   ;;  %s5983_s5 = inlined_call_operand.hbm [shape: f32[128,512], index: 5, kind: input, shape index: {}]   ;;  %s5984_s6 = inlined_call_operand.vmem [shape: f32[1,512], index: 6, kind: input, shape index: {}]   ;;  %s5985_s7 = inlined_call_operand.hbm [shape: f32[128,128], index: 7, kind: input, shape index: {}]   ;;  %s5986_s8 = inlined_call_operand.vmem [shape: f32[1,128], index: 8, kind: input, shape index: {}]   ;;  %s5987_s9 = inlined_call_operand.vmem [shape: f32[64,128], index: 9, kind: output, shape index: {}]  }
   0x1   :  { %15 = vsyncpa [#allocation6], 0 }
   0x2   :  { %16 = vsyncpa [#allocation9], 0  ;;  %s40_s11 = sshll.u32 %s5982_s4, 4  ;;  %s3733_s12 = smov [#allocation5]   ;;  %s41_s11 = int_to_ptr.hbm [resolvable:$true] %s40_s11 }
   0x3   :  { %s42_s13 = sshll.u32 %s3733_s12, 4  ;;  %s25_s16 = sshll.u32 %s5980_s2, 4  ;;  %s43_s13 = int_to_ptr.vmem [resolvable:$true] %s42_s13  ;;  %s26_s16 = int_to_ptr.hbm [resolvable:$true] %s25_s16 }
   0x4   :  { %s3734_s17 = smov 512   ;;  %s3735_s18 = smov 32  }
   0x5   :  { %48 = dma.hbm_to_vmem [thread:$0]  %s41_s11, 8192, %s43_s13, [#allocation6], %s3734_s17, %s3734_s17, %s3735_s18  }
   0x6   :  { %s3736_s19 = smov [#allocation3]   ;;  %s53_s23 = sshll.u32 %s5983_s5, 4  ;;  %s54_s23 = int_to_ptr.hbm [resolvable:$true] %s53_s23 }
   0x7   :  { %s27_s20 = sshll.u32 %s3736_s19, 4  ;;  %s68_s25 = sshll.u32 %s5985_s7, 4  ;;  %s28_s20 = int_to_ptr.vmem [resolvable:$true] %s27_s20  ;;  %s69_s25 = int_to_ptr.hbm [resolvable:$true] %s68_s25 }
   0x8   :  { %33 = dma.hbm_to_vmem [thread:$0]  %s26_s16, 8192, %s28_s20, [#allocation4], %s3734_s17, %s3734_s17, %s3735_s18  }
   0x9   :  { %s3737_s26 = smov [#allocation7]   ;;  %s3738_s2 = smov [#allocation8]  }
   0xa   :  { %s55_s27 = sshll.u32 %s3737_s26, 4  ;;  %s70_s28 = sshll.u32 %s3738_s2, 4  ;;  %s56_s27 = int_to_ptr.vmem [resolvable:$true] %s55_s27  ;;  %s71_s28 = int_to_ptr.vmem [resolvable:$true] %s70_s28 }
   0xb   :  { %61 = dma.hbm_to_vmem [thread:$0]  %s54_s23, 8192, %s56_s27, [#allocation6], %s3734_s17, %s3734_s17, %s3735_s18  }
   0xc   :  { %s3739_s29 = smov 128   ;;  %s3740_s30 = smov 8  }
   0xd   :  { %76 = dma.hbm_to_vmem [thread:$0]  %s69_s25, 2048, %s71_s28, [#allocation9], %s3739_s29, %s3739_s29, %s3740_s30  }
   0xe   :  { %3727 = dma.done.wait [#allocation4], 8192  }
   0xf   :  { %3728 = vsyncadd [#allocation4], 4294959104 }
  0x10   :  { %3729 = dma.done.wait [#allocation6], 16384  }
  0x11   :  { %3730 = vsyncadd [#allocation6], 4294950912 }
  0x12   :  { %3731 = dma.done.wait [#allocation9], 2048  }
  0x13   :  { %3732 = vsyncadd [#allocation9], 4294965248  ;;  %vm146_vm0 = vcmask 1045504   ;;  %v107_v0 = vld [vmem:[%s5979_s1 + $0x20] sm:$0x3f]  ;;  %v105_v3 = vld [vmem:[%s5979_s1 + $0x10] sm:$0xff] }
  0x14   :  { %v109_v1 = vld [vmem:[%s5979_s1 + $0x30] sm:$0x3f]  ;;  %v103_v2 = vld [vmem:[%s5979_s1] sm:$0xff]  ;;  %3233 = vmatpush.msk.msra.mxu1 %vm146_vm0, %v107_v0  ;;  %3234 = vmatpush.msk.msra.mxu3 %vm146_vm0, %v107_v0  ;;  %vm121_vm1 = vcmask 113664   ;;  %v3827_v5 = vld [vmem:[%s5978_s0 + $0x28] sm:$0xff] }
  0x15   :  { %v3821_v4 = vld [vmem:[%s5978_s0 + $0x20] sm:$0xff]  ;;  %3167 = vmatpush.msk.msra.mxu2 %vm146_vm0, %v109_v1  ;;  %3149 = vmatpush.msk.msra.mxu0 %vm146_vm0, %v107_v0  ;;  %v110_v7 = vld [vmem:[%s5979_s1 + $0x38] sm:$0x3f]  ;;  %v108_v8 = vld [vmem:[%s5979_s1 + $0x28] sm:$0x3f] }
  0x16   :  { %v3832_v6 = vld [vmem:[%s5978_s0] sm:$0xff]  ;;  %3235 = vmatpush.msra.mxu1 %v103_v2  ;;  %3236 = vmatpush.msra.mxu3 %v103_v2  ;;  %v104_v10 = vld [vmem:[%s5979_s1 + $0x8] sm:$0xff]  ;;  %v106_v11 = vld [vmem:[%s5979_s1 + $0x18] sm:$0xff] }
  0x17   :  { %256 = vmatpush.msra.mxu2 %v105_v3  ;;  %3154 = vmatmul.msk.f32.vlgmr.msra.gmra.mxu1 %vm121_vm1, %v3821_v4  ;;  %v3843_v9 = vld [vmem:[#allocation3 + $0x1e0] sm:$0xff]  ;;  %v3859_v13 = vld [vmem:[#allocation3 + $0x1e8] sm:$0xff]  ;;  %v3866_v16 = vld [vmem:[#allocation3 + $0x1f8] sm:$0xff] }
  0x18   :  { %3155 = vmatmul.msk.f32.vlgmr.msra.gmra.mxu3 %vm121_vm1, %v3827_v5  ;;  %3168 = vmatmul.msk.f32.vlgmr.msra.gmra.mxu2 %vm121_vm1, %v3832_v6  ;;  %v3857_v12 = vld [vmem:[#allocation3 + $0x1c0] sm:$0xff]  ;;  %v3864_v15 = vld [vmem:[#allocation3 + $0x1c8] sm:$0xff]  ;;  %v3873_v17 = vld [vmem:[%s5978_s0 + $0x30] sm:$0xff] }
  0x19   :  { %3176 = vmatpush.msk.msrb.mxu3 %vm146_vm0, %v110_v7  ;;  %3158 = vmatpush.msk.msrb.mxu1 %vm146_vm0, %v108_v8  ;;  %v3862_v14 = vld [vmem:[#allocation3 + $0x1a0] sm:$0xff]  ;;  %v3878_v18 = vld [vmem:[%s5978_s0 + $0x8] sm:$0xff]  ;;  %v3881_v19 = vld [vmem:[#allocation3 + $0x1d8] sm:$0xff] }
  0x1a   :  { %387 = vmatpush.msrb.mxu2 %v3843_v9  ;;  %174 = vmatpush.msra.mxu0 %v103_v2  ;;  %v3886_v20 = vld [vmem:[#allocation3 + $0x180] sm:$0xff]  ;;  %v3889_v21 = vld [vmem:[#allocation3 + $0x1a8] sm:$0xff]  ;;  %v3894_v22 = vld [vmem:[#allocation3 + $0x1b8] sm:$0xff] }
  0x1b   :  { %215 = vmatpush.msrb.mxu1 %v104_v10  ;;  %297 = vmatpush.msrb.mxu3 %v106_v11  ;;  %v3900_v23 = vld [vmem:[#allocation3 + $0x160] sm:$0xff]  ;;  %v3902_v24 = vld [vmem:[#allocation3 + $0x188] sm:$0xff]  ;;  %v3906_v25 = vld [vmem:[#allocation3 + $0x198] sm:$0xff] }
  0x1c   :  { %388 = vmatpush.msrb.mxu2 %v3857_v12  ;;  %3150 = vmatmul.msk.f32.vlgmr.msra.gmra.mxu0 %vm121_vm1, %v3832_v6  ;;  %v3908_v26 = vld [vmem:[#allocation3 + $0x140] sm:$0xff]  ;;  %v3911_v27 = vld [vmem:[#allocation3 + $0x168] sm:$0xff]  ;;  %v3916_v28 = vld [vmem:[#allocation3 + $0x178] sm:$0xff] }
  0x1d   :  { %407 = vmatpush.msra.mxu1 %v3859_v13  ;;  %447 = vmatpush.msra.mxu3 %v3866_v16  ;;  %v3918_v29 = vld [vmem:[#allocation3 + $0x120] sm:$0xff]  ;;  %v3925_v30 = vld [vmem:[%s5978_s0 + $0x38] sm:$0xff]  ;;  %v3930_v31 = vld [vmem:[%s5978_s0 + $0x10] sm:$0xff] }
  0x1e   :  { %389 = vmatpush.msrb.mxu2 %v3862_v14  ;;  %535 = vmatpush.msrb.mxu0 %v3843_v9  ;;  %v3934_v32 = vld [vmem:[#allocation3 + $0x100] sm:$0xff]  ;;  %v3936_v33 = vld [vmem:[#allocation3 + $0x148] sm:$0xff]  ;;  %v3943_v34 = vld [vmem:[#allocation3 + $0x158] sm:$0xff] }
  0x1f   :  { %408 = vmatpush.msra.mxu1 %v3864_v15  ;;  %448 = vmatpush.msra.mxu3 %v3881_v19  ;;  %v3949_v35 = vld [vmem:[#allocation3 + $0xe0] sm:$0xff]  ;;  %v3951_v36 = vld [vmem:[#allocation3 + $0x128] sm:$0xff]  ;;  %v3955_v37 = vld [vmem:[#allocation3 + $0x138] sm:$0xff] }
  0x20   :  { %3159 = vmatmul.msk.f32.vlgmr.msrb.gmra.mxu1 %vm121_vm1, %v3832_v6  ;;  %3156 = vmatmul.msk.f32.gmra.mxu3 %vm121_vm1, %v3873_v17  ;;  %v3957_v38 = vld [vmem:[#allocation3 + $0xc0] sm:$0xff]  ;;  %v3960_v39 = vld [vmem:[#allocation3 + $0x108] sm:$0xff]  ;;  %v3965_v40 = vld [vmem:[#allocation3 + $0x118] sm:$0xff] }
  0x21   :  { %3169 = vmatmul.msk.f32.gmra.mxu2 %vm121_vm1, %v3878_v18  ;;  %409 = vmatpush.msra.mxu1 %v3889_v21  ;;  %v3967_v41 = vld [vmem:[#allocation3 + $0xa0] sm:$0xff]  ;;  %v3975_v42 = vld [vmem:[%s5978_s0 + $0x18] sm:$0xff]  ;;  %v3981_v44 = vld [vmem:[#allocation3 + $0xe8] sm:$0xff] }
  0x22   :  { %390 = vmatpush.msrb.mxu2 %v3886_v20  ;;  %449 = vmatpush.msra.mxu3 %v3894_v22  ;;  %6241 = vst [vmem:[#allocation13_spill] sm:$0xff] %v3967_v41  ;;  %v3979_v43 = vld [vmem:[#allocation3 + $0x80] sm:$0xff]  ;;  %v3994_v46 = vld [vmem:[#allocation3 + $0xc8] sm:$0xff]  ;;  %v3996_v47 = vld [vmem:[#allocation3 + $0xf8] sm:$0xff] }
  0x23   :  { %410 = vmatpush.msra.mxu1 %v3902_v24  ;;  %536 = vmatpush.msrb.mxu0 %v3857_v12  ;;  %6242 = vst [vmem:[#allocation14_spill] sm:$0xff] %v3979_v43  ;;  %v3992_v45 = vld [vmem:[#allocation3 + $0x60] sm:$0xff]  ;;  %v4000_v48 = vld [vmem:[#allocation3 + $0xd8] sm:$0xff]  ;;  %v4005_v50 = vld [vmem:[#allocation3 + $0xa8] sm:$0xff] }
  0x24   :  { %391 = vmatpush.msrb.mxu2 %v3900_v23  ;;  %450 = vmatpush.msra.mxu3 %v3906_v25  ;;  %6243 = vst [vmem:[#allocation15_spill] sm:$0xff] %v3992_v45  ;;  %v4002_v49 = vld [vmem:[#allocation3 + $0x40] sm:$0xff]  ;;  %v4018_v53 = vld [vmem:[#allocation3 + $0x88] sm:$0xff]  ;;  %v4024_v54 = vld [vmem:[#allocation3 + $0x1f0] sm:$0xff] }
  0x25   :  { %411 = vmatpush.msra.mxu1 %v3911_v27  ;;  %537 = vmatpush.msrb.mxu0 %v3862_v14  ;;  %6244 = vst [vmem:[#allocation16_spill] sm:$0xff] %v4002_v49  ;;  %v4010_v51 = vld [vmem:[#allocation3 + $0x20] sm:$0xff]  ;;  %v4030_v55 = vld [vmem:[#allocation3 + $0xb8] sm:$0xff]  ;;  %v4032_v56 = vld [vmem:[#allocation3 + $0x68] sm:$0xff] }
  0x26   :  { %392 = vmatpush.msrb.mxu2 %v3908_v26  ;;  %451 = vmatpush.msra.mxu3 %v3916_v28  ;;  %6245 = vst [vmem:[#allocation17_spill] sm:$0xff] %v4005_v50  ;;  %v4016_v52 = vld [vmem:[#allocation3] sm:$0xff]  ;;  %v4035_v57 = vld [vmem:[#allocation3 + $0x1d0] sm:$0xff]  ;;  %v4038_v58 = vld [vmem:[#allocation3 + $0x98] sm:$0xff] }
  0x27   :  { %412 = vmatpush.msra.mxu1 %v3936_v33  ;;  %538 = vmatpush.msrb.mxu0 %v3886_v20  ;;  %6246 = vst [vmem:[#allocation18_spill] sm:$0xff] %v4010_v51  ;;  %v4042_v59 = vld [vmem:[#allocation3 + $0x48] sm:$0xff]  ;;  %v4044_v60 = vld [vmem:[#allocation3 + $0x1b0] sm:$0xff]  ;;  %v4069_v1 = vld [vmem:[#allocation3 + $0x78] sm:$0xff] }
  0x28   :  { %3160 = vmatmul.msk.f32.gmra.mxu1 %vm121_vm1, %v3878_v18  ;;  %393 = vmatpush.msrb.mxu2 %v3918_v29  ;;  %6247 = vst [vmem:[#allocation19_spill] sm:$0xff] %v4016_v52  ;;  %v4054_v61 = vld [vmem:[#allocation3 + $0x190] sm:$0xff]  ;;  %v4056_v62 = vld [vmem:[#allocation3 + $0x28] sm:$0xff]  ;;  %v4073_v2 = vld [vmem:[#allocation3 + $0x58] sm:$0xff] }
  0x29   :  { %3157 = vmatmul.msk.f32.gmra.mxu3 %vm121_vm1, %v3925_v30  ;;  %3170 = vmatmul.msk.f32.gmra.mxu2 %vm121_vm1, %v3930_v31  ;;  %6248 = vst [vmem:[#allocation20_spill] sm:$0xff] %v4018_v53  ;;  %v4065_v63 = vld [vmem:[#allocation3 + $0x170] sm:$0xff]  ;;  %v4067_v0 = vld [vmem:[#allocation3 + $0x8] sm:$0xff]  ;;  %v4101_v10 = vld [vmem:[#allocation3 + $0x38] sm:$0xff] }
  0x2a   :  { %394 = vmatpush.msrb.mxu2 %v3934_v32  ;;  %452 = vmatpush.msra.mxu3 %v3943_v34  ;;  %6249 = vst [vmem:[#allocation21_spill] sm:$0xff] %v4030_v55  ;;  %v4075_v3 = vld [vmem:[#allocation3 + $0x150] sm:$0xff]  ;;  %v4103_v11 = vld [vmem:[#allocation3 + $0x18] sm:$0xff] }
  0x2b   :  { %413 = vmatpush.msra.mxu1 %v3951_v36  ;;  %3151 = vmatmul.msk.f32.gmra.mxu0 %vm121_vm1, %v3878_v18  ;;  %6250 = vst [vmem:[#allocation22_spill] sm:$0xff] %v4032_v56  ;;  %v4087_v7 = vld [vmem:[#allocation3 + $0x110] sm:$0xff] }
  0x2c   :  { %395 = vmatpush.msrb.mxu2 %v3949_v35  ;;  %453 = vmatpush.msra.mxu3 %v3955_v37  ;;  %6251 = vst [vmem:[#allocation23_spill] sm:$0xff] %v4038_v58  ;;  %v4099_v8 = vld [vmem:[#allocation3 + $0xf0] sm:$0xff] }
  0x2d   :  { %414 = vmatpush.msra.mxu1 %v3960_v39  ;;  %539 = vmatpush.msrb.mxu0 %v3900_v23  ;;  %6252 = vst [vmem:[#allocation24_spill] sm:$0xff] %v4042_v59 }
  0x2e   :  { %396 = vmatpush.msrb.mxu2 %v3957_v38  ;;  %454 = vmatpush.msra.mxu3 %v3965_v40  ;;  %6253 = vst [vmem:[#allocation25_spill] sm:$0xff] %v4056_v62 }
  0x2f   :  { %415 = vmatpush.msra.mxu1 %v3981_v44  ;;  %540 = vmatpush.msrb.mxu0 %v3908_v26  ;;  %6254 = vst [vmem:[#allocation26_spill] sm:$0xff] %v4067_v0 }
  0x30   :  { %3161 = vmatmul.msk.f32.gmra.mxu1 %vm121_vm1, %v3930_v31  ;;  %397 = vmatpush.msrb.mxu2 %v3967_v41  ;;  %6255 = vst [vmem:[#allocation27_spill] sm:$0xff] %v4069_v1 }
  0x31   :  { %3171 = vmatmul.msk.f32.gmra.mxu2 %vm121_vm1, %v3975_v42  ;;  %3177 = vmatmul.msk.f32.vlgmr.msrb.gmra.mxu3 %vm121_vm1, %v3832_v6  ;;  %6256 = vst [vmem:[#allocation28_spill] sm:$0xff] %v4073_v2  ;;  %v4081_v6 = vld [vmem:[#allocation3 + $0x130] sm:$0xff] }
  0x32   :  { %398 = vmatpush.msrb.mxu2 %v3979_v43  ;;  %455 = vmatpush.msra.mxu3 %v3996_v47  ;;  %6257 = vst [vmem:[#allocation29_spill] sm:$0xff] %v4101_v10 }
  0x33   :  { %416 = vmatpush.msra.mxu1 %v3994_v46  ;;  %541 = vmatpush.msrb.mxu0 %v3918_v29  ;;  %6258 = vst [vmem:[#allocation30_spill] sm:$0xff] %v4103_v11 }
  0x34   :  { %399 = vmatpush.msrb.mxu2 %v3992_v45  ;;  %456 = vmatpush.msra.mxu3 %v4000_v48 }
  0x35   :  { %417 = vmatpush.msra.mxu1 %v4005_v50  ;;  %542 = vmatpush.msrb.mxu0 %v3934_v32 }
  0x36   :  { %400 = vmatpush.msrb.mxu2 %v4002_v49  ;;  %457 = vmatpush.msra.mxu3 %v4030_v55 }
  0x37   :  { %418 = vmatpush.msra.mxu1 %v4018_v53  ;;  %3152 = vmatmul.msk.f32.gmra.mxu0 %vm121_vm1, %v3930_v31 }
  0x38   :  { %3162 = vmatmul.msk.f32.gmra.mxu1 %vm121_vm1, %v3975_v42  ;;  %401 = vmatpush.msrb.mxu2 %v4010_v51 }
  0x39   :  { %3172 = vmatmul.msk.f32.gmra.mxu2 %vm121_vm1, %v3821_v4  ;;  %3178 = vmatmul.msk.f32.gmra.mxu3 %vm121_vm1, %v3878_v18  ;;  %v4107_v18 = vld [vmem:[#allocation3 + $0xd0] sm:$0xff] }
  0x3a   :  { %402 = vmatpush.msrb.mxu2 %v4016_v52  ;;  %419 = vmatpush.msra.mxu1 %v4032_v56 }
  0x3b   :  { %458 = vmatpush.msra.mxu3 %v4038_v58  ;;  %543 = vmatpush.msrb.mxu0 %v3949_v35 }
  0x3c   :  { %427 = vmatpush.msra.mxu2 %v4024_v54  ;;  %420 = vmatpush.msra.mxu1 %v4042_v59 }
  0x3d   :  { %544 = vmatpush.msrb.mxu0 %v3957_v38  ;;  %459 = vmatpush.msra.mxu3 %v4069_v1 }
  0x3e   :  { %428 = vmatpush.msra.mxu2 %v4035_v57  ;;  %421 = vmatpush.msra.mxu1 %v4056_v62 }
  0x3f   :  { %545 = vmatpush.msrb.mxu0 %v3967_v41  ;;  %460 = vmatpush.msra.mxu3 %v4073_v2 }
  0x40   :  { %429 = vmatpush.msra.mxu2 %v4044_v60  ;;  %3163 = vmatmul.msk.f32.gmra.mxu1 %vm121_vm1, %v3821_v4 }
  0x41   :  { %3173 = vmatmul.msk.f32.gmra.mxu2 %vm121_vm1, %v3827_v5  ;;  %3179 = vmatmul.msk.f32.gmra.mxu3 %vm121_vm1, %v3930_v31  ;;  %v4113_v31 = vld [vmem:[#allocation3 + $0xb0] sm:$0xff] }
  0x42   :  { %430 = vmatpush.msra.mxu2 %v4054_v61  ;;  %422 = vmatpush.msra.mxu1 %v4067_v0  ;;  %6259 = vst [vmem:[#allocation31_spill] sm:$0xff] %v4113_v31 }
  0x43   :  { %546 = vmatpush.msrb.mxu0 %v3979_v43  ;;  %461 = vmatpush.msra.mxu3 %v4101_v10  ;;  %v4140_v43 = vld [vmem:[#allocation3 + $0x30] sm:$0xff] }
  0x44   :  { %431 = vmatpush.msra.mxu2 %v4065_v63  ;;  %555 = vmatpush.msrb.mxu1 %v3859_v13  ;;  %6263 = vst [vmem:[#allocation35_spill] sm:$0xff] %v4140_v43 }
  0x45   :  { %3153 = vmatmul.msk.f32.gmra.mxu0 %vm121_vm1, %v3975_v42  ;;  %462 = vmatpush.msra.mxu3 %v4103_v11 }
  0x46   :  { %432 = vmatpush.msra.mxu2 %v4075_v3  ;;  %556 = vmatpush.msrb.mxu1 %v3864_v15 }
  0x47   :  { %547 = vmatpush.msrb.mxu0 %v3992_v45  ;;  %595 = vmatpush.msrb.mxu3 %v3866_v16  ;;  %v4130_v45 = vld [vmem:[#allocation3 + $0x70] sm:$0xff] }
  0x48   :  { %3164 = vmatmul.msk.f32.gmra.mxu1 %vm121_vm1, %v3827_v5  ;;  %433 = vmatpush.msra.mxu2 %v4081_v6  ;;  %6261 = vst [vmem:[#allocation33_spill] sm:$0xff] %v4130_v45 }
  0x49   :  { %3174 = vmatmul.msk.f32.gmra.mxu2 %vm121_vm1, %v3873_v17  ;;  %3180 = vmatmul.msk.f32.gmra.mxu3 %vm121_vm1, %v3975_v42  ;;  %v4119_v42 = vld [vmem:[#allocation3 + $0x90] sm:$0xff] }
  0x4a   :  { %434 = vmatpush.msra.mxu2 %v4087_v7  ;;  %557 = vmatpush.msrb.mxu1 %v3889_v21  ;;  %6260 = vst [vmem:[#allocation32_spill] sm:$0xff] %v4119_v42 }
  0x4b   :  { %548 = vmatpush.msrb.mxu0 %v4002_v49  ;;  %596 = vmatpush.msrb.mxu3 %v3881_v19  ;;  %v4134_v49 = vld [vmem:[#allocation3 + $0x50] sm:$0xff] }
  0x4c   :  { %435 = vmatpush.msra.mxu2 %v4099_v8  ;;  %558 = vmatpush.msrb.mxu1 %v3902_v24  ;;  %6262 = vst [vmem:[#allocation34_spill] sm:$0xff] %v4134_v49 }
  0x4d   :  { %597 = vmatpush.msrb.mxu3 %v3894_v22  ;;  %549 = vmatpush.msrb.mxu0 %v4010_v51  ;;  %v5996_v51 = vmov 0.0  }
  0x4e   :  { %436 = vmatpush.msra.mxu2 %v4107_v18  ;;  %559 = vmatpush.msrb.mxu1 %v3911_v27 }
  0x4f   :  { %598 = vmatpush.msrb.mxu3 %v3906_v25  ;;  %550 = vmatpush.msrb.mxu0 %v4016_v52 }
  0x50   :  { %3165 = vmatmul.msk.f32.gmra.mxu1 %vm121_vm1, %v3873_v17  ;;  %437 = vmatpush.msra.mxu2 %v4113_v31 }
  0x51   :  { %3175 = vmatmul.msk.f32.gmra.mxu2 %vm121_vm1, %v3925_v30  ;;  %3181 = vmatmul.msk.f32.gmra.mxu3 %vm121_vm1, %v3821_v4  ;;  %v4146_v4 = vld [vmem:[#allocation3 + $0x10] sm:$0xff] }
  0x52   :  { %438 = vmatpush.msra.mxu2 %v4119_v42  ;;  %560 = vmatpush.msrb.mxu1 %v3936_v33  ;;  %6264 = vst [vmem:[#allocation36_spill] sm:$0xff] %v4146_v4 }
  0x53   :  { %599 = vmatpush.msrb.mxu3 %v3916_v28  ;;  %683 = vmatpush.msra.mxu0 %v3843_v9 }
  0x54   :  { %439 = vmatpush.msra.mxu2 %v4130_v45  ;;  %561 = vmatpush.msrb.mxu1 %v3951_v36 }
  0x55   :  { %600 = vmatpush.msrb.mxu3 %v3943_v34  ;;  %684 = vmatpush.msra.mxu0 %v3857_v12 }
  0x56   :  { %440 = vmatpush.msra.mxu2 %v4134_v49  ;;  %562 = vmatpush.msrb.mxu1 %v3960_v39 }
  0x57   :  { %601 = vmatpush.msrb.mxu3 %v3955_v37  ;;  %685 = vmatpush.msra.mxu0 %v3862_v14 }
  0x58   :  { %3166 = vmatmul.msk.f32.gmra.mxu1 %vm121_vm1, %v3925_v30  ;;  %441 = vmatpush.msra.mxu2 %v4140_v43 }
  0x59   :  { %3182 = vmatmul.msk.f32.gmra.mxu3 %vm121_vm1, %v3827_v5  ;;  %403 = vmatmul.f32.vlgmr.msrb.gmra.mxu2 %v5996_v51  ;;  %v6265_v5 = vld [vmem:[#allocation14_spill] sm:$0xff] }
  0x5a   :  { %442 = vmatpush.msra.mxu2 %v4146_v4  ;;  %563 = vmatpush.msrb.mxu1 %v3981_v44 }
  0x5b   :  { %602 = vmatpush.msrb.mxu3 %v3965_v40  ;;  %686 = vmatpush.msra.mxu0 %v3886_v20 }
  0x5c   :  { %575 = vmatpush.msrb.mxu2 %v4024_v54  ;;  %564 = vmatpush.msrb.mxu1 %v3994_v46 }
  0x5d   :  { %603 = vmatpush.msrb.mxu3 %v3996_v47  ;;  %687 = vmatpush.msra.mxu0 %v3900_v23 }
  0x5e   :  { %576 = vmatpush.msrb.mxu2 %v4035_v57  ;;  %565 = vmatpush.msrb.mxu1 %v4005_v50 }
  0x5f   :  { %604 = vmatpush.msrb.mxu3 %v4000_v48  ;;  %688 = vmatpush.msra.mxu0 %v3908_v26 }
  0x60   :  { %577 = vmatpush.msrb.mxu2 %v4044_v60  ;;  %423 = vmatmul.f32.vlgmr.msra.gmra.mxu1 %v5996_v51 }
  0x61   :  { %3183 = vmatmul.msk.f32.gmra.mxu3 %vm121_vm1, %v3873_v17  ;;  %443 = vmatmul.f32.vlgmr.msra.gmra.mxu2 %v5996_v51  ;;  %v6266_v17 = vld [vmem:[#allocation15_spill] sm:$0xff] }
  0x62   :  { %578 = vmatpush.msrb.mxu2 %v4054_v61  ;;  %566 = vmatpush.msrb.mxu1 %v4018_v53 }
  0x63   :  { %605 = vmatpush.msrb.mxu3 %v4030_v55  ;;  %689 = vmatpush.msra.mxu0 %v3918_v29 }
  0x64   :  { %579 = vmatpush.msrb.mxu2 %v4065_v63  ;;  %567 = vmatpush.msrb.mxu1 %v4032_v56 }
  0x65   :  { %606 = vmatpush.msrb.mxu3 %v4038_v58  ;;  %690 = vmatpush.msra.mxu0 %v3934_v32 }
  0x66   :  { %580 = vmatpush.msrb.mxu2 %v4075_v3  ;;  %568 = vmatpush.msrb.mxu1 %v4042_v59 }
  0x67   :  { %607 = vmatpush.msrb.mxu3 %v4069_v1  ;;  %691 = vmatpush.msra.mxu0 %v3949_v35 }
  0x68   :  { %581 = vmatpush.msrb.mxu2 %v4081_v6  ;;  %569 = vmatpush.msrb.mxu1 %v4056_v62 }
  0x69   :  { %3184 = vmatmul.msk.f32.gmra.mxu3 %vm121_vm1, %v3925_v30  ;;  %692 = vmatpush.msra.mxu0 %v3957_v38  ;;  %v6267_v30 = vld [vmem:[#allocation16_spill] sm:$0xff] }
  0x6a   :  { %582 = vmatpush.msrb.mxu2 %v4087_v7  ;;  %608 = vmatpush.msrb.mxu3 %v4073_v2 }
  0x6b   :  { %570 = vmatpush.msrb.mxu1 %v4067_v0  ;;  %693 = vmatpush.msra.mxu0 %v3967_v41 }
  0x6c   :  { %583 = vmatpush.msrb.mxu2 %v4099_v8  ;;  %609 = vmatpush.msrb.mxu3 %v4101_v10 }
  0x6d   :  { %703 = vmatpush.msra.mxu1 %v3859_v13  ;;  %694 = vmatpush.msra.mxu0 %v6265_v5 }
  0x6e   :  { %584 = vmatpush.msrb.mxu2 %v4107_v18  ;;  %610 = vmatpush.msrb.mxu3 %v4103_v11 }
  0x6f   :  { %704 = vmatpush.msra.mxu1 %v3864_v15  ;;  %695 = vmatpush.msra.mxu0 %v6266_v17 }
  0x70   :  { %585 = vmatpush.msrb.mxu2 %v4113_v31 }
  0x71   :  { %463 = vmatmul.f32.vlgmr.msra.gmra.mxu3 %v5996_v51  ;;  %705 = vmatpush.msra.mxu1 %v3889_v21  ;;  %v6268_v51 = vld [vmem:[#allocation18_spill] sm:$0xff] }
  0x72   :  { %586 = vmatpush.msrb.mxu2 %v4119_v42  ;;  %743 = vmatpush.msra.mxu3 %v3866_v16 }
  0x73   :  { %706 = vmatpush.msra.mxu1 %v3902_v24  ;;  %696 = vmatpush.msra.mxu0 %v6267_v30 }
  0x74   :  { %587 = vmatpush.msrb.mxu2 %v4130_v45  ;;  %744 = vmatpush.msra.mxu3 %v3881_v19 }
  0x75   :  { %707 = vmatpush.msra.mxu1 %v3911_v27  ;;  %697 = vmatpush.msra.mxu0 %v6268_v51 }
  0x76   :  { %588 = vmatpush.msrb.mxu2 %v4134_v49  ;;  %745 = vmatpush.msra.mxu3 %v3894_v22 }
  0x77   :  { %708 = vmatpush.msra.mxu1 %v3936_v33  ;;  %698 = vmatpush.msra.mxu0 %v4016_v52 }
  0x78   :  { %589 = vmatpush.msrb.mxu2 %v4140_v43  ;;  %746 = vmatpush.msra.mxu3 %v3906_v25 }
  0x79   :  { %709 = vmatpush.msra.mxu1 %v3951_v36 }
  0x7a   :  { %590 = vmatpush.msrb.mxu2 %v4146_v4  ;;  %747 = vmatpush.msra.mxu3 %v3916_v28 }
  0x7b   :  { %710 = vmatpush.msra.mxu1 %v3960_v39 }
  0x7c   :  { %723 = vmatpush.msra.mxu2 %v4024_v54  ;;  %748 = vmatpush.msra.mxu3 %v3943_v34 }
  0x7d   :  { %711 = vmatpush.msra.mxu1 %v3981_v44 }
  0x7e   :  { %724 = vmatpush.msra.mxu2 %v4035_v57  ;;  %749 = vmatpush.msra.mxu3 %v3955_v37 }
  0x7f   :  { %712 = vmatpush.msra.mxu1 %v3994_v46 }
  0x80   :  { %725 = vmatpush.msra.mxu2 %v4044_v60  ;;  %750 = vmatpush.msra.mxu3 %v3965_v40 }
  0x81   :  { %713 = vmatpush.msra.mxu1 %v4005_v50 }
  0x82   :  { %726 = vmatpush.msra.mxu2 %v4054_v61  ;;  %751 = vmatpush.msra.mxu3 %v3996_v47 }
  0x83   :  { %714 = vmatpush.msra.mxu1 %v4018_v53 }
  0x84   :  { %727 = vmatpush.msra.mxu2 %v4065_v63  ;;  %752 = vmatpush.msra.mxu3 %v4000_v48 }
  0x85   :  { %715 = vmatpush.msra.mxu1 %v4032_v56 }
  0x86   :  { %728 = vmatpush.msra.mxu2 %v4075_v3  ;;  %753 = vmatpush.msra.mxu3 %v4030_v55 }
  0x87   :  { %716 = vmatpush.msra.mxu1 %v4042_v59 }
  0x88   :  { %729 = vmatpush.msra.mxu2 %v4081_v6  ;;  %754 = vmatpush.msra.mxu3 %v4038_v58 }
  0x89   :  { %717 = vmatpush.msra.mxu1 %v4056_v62 }
  0x8a   :  { %730 = vmatpush.msra.mxu2 %v4087_v7  ;;  %755 = vmatpush.msra.mxu3 %v4069_v1 }
  0x8b   :  { %718 = vmatpush.msra.mxu1 %v4067_v0 }
  0x8c   :  { %731 = vmatpush.msra.mxu2 %v4099_v8  ;;  %756 = vmatpush.msra.mxu3 %v4073_v2 }
  0x8e   :  { %732 = vmatpush.msra.mxu2 %v4107_v18  ;;  %757 = vmatpush.msra.mxu3 %v4101_v10 }
  0x90   :  { %733 = vmatpush.msra.mxu2 %v4113_v31  ;;  %758 = vmatpush.msra.mxu3 %v4103_v11 }
  0x92   :  { %734 = vmatpush.msra.mxu2 %v4119_v42 }
  0x94   :  { %735 = vmatpush.msra.mxu2 %v4130_v45  ;;  %v4259_v52 = vpop.f32.mrf.mxu1 }
  0x95   :  { %6269 = vst [vmem:[#allocation37_spill] sm:$0xff] %v4259_v52 }
  0x96   :  { %736 = vmatpush.msra.mxu2 %v4134_v49 }
  0x98   :  { %737 = vmatpush.msra.mxu2 %v4140_v43 }
  0x9a   :  { %738 = vmatpush.msra.mxu2 %v4146_v4 }
  0x9b   :  { %v4264_v0 = vpop.f32.mrf.mxu3  ;;  %v258_v62 = vpop.f32.mrf.mxu2 }
  0x9c   :  { %6270 = vst [vmem:[#allocation38_spill] sm:$0xff] %v4264_v0 }
  0x9d   :  { %v217_v10 = vpop.f32.mrf.mxu1 }
  0xa3   :  { %v4266_v51 = vpop.f32.mrf.mxu3 }
  0xa4   :  { %6271 = vst [vmem:[#allocation39_spill] sm:$0xff] %v4266_v51  ;;  %v4268_v2 = vpop.f32.mrf.mxu2 }
  0xa5   :  { %6272 = vst [vmem:[#allocation40_spill] sm:$0xff] %v4268_v2  ;;  %v4270_v11 = vpop.f32.mrf.mxu1 }
  0xa6   :  { %6273 = vst [vmem:[#allocation41_spill] sm:$0xff] %v4270_v11 }
  0xac   :  { %v4272_v59 = vpop.f32.mrf.mxu3  ;;  %v4274_v30 = vpop.f32.mrf.mxu2 }
  0xad   :  { %6274 = vst [vmem:[#allocation42_spill] sm:$0xff] %v4272_v59  ;;  %v4276_v52 = vpop.f32.mrf.mxu1 }
  0xae   :  { %6275 = vst [vmem:[#allocation43_spill] sm:$0xff] %v4274_v30 }
  0xaf   :  { %6276 = vst [vmem:[#allocation44_spill] sm:$0xff] %v4276_v52 }
  0xb4   :  { %v4278_v49 = vpop.f32.mrf.mxu2  ;;  %v299_v43 = vpop.f32.mrf.mxu3 }
  0xb5   :  { %6277 = vst [vmem:[#allocation45_spill] sm:$0xff] %v4278_v49  ;;  %v4280_v4 = vpop.f32.mrf.mxu1 }
  0xb6   :  { %6278 = vst [vmem:[#allocation46_spill] sm:$0xff] %v4280_v4 }
  0xbc   :  { %v4282_v0 = vpop.f32.mrf.mxu2  ;;  %v4284_v1 = vpop.f32.mrf.mxu3 }
  0xbd   :  { %6279 = vst [vmem:[#allocation47_spill] sm:$0xff] %v4282_v0  ;;  %v4286_v51 = vpop.f32.mrf.mxu1  ;;  %v111_v0 = vld [vmem:[%s5981_s3] sm:$0xf] }
  0xbe   :  { %6280 = vst [vmem:[#allocation48_spill] sm:$0xff] %v4284_v1 }
  0xbf   :  { %6281 = vst [vmem:[#allocation49_spill] sm:$0xff] %v4286_v51 }
  0xc4   :  { %v4288_v2 = vpop.f32.mrf.mxu2  ;;  %v4290_v11 = vpop.f32.mrf.mxu3 }
  0xc5   :  { %6282 = vst [vmem:[#allocation50_spill] sm:$0xff] %v4288_v2  ;;  %v4292_v59 = vpop.f32.mrf.mxu1  ;;  %v176_v2 = vpop.f32.mrf.mxu0 }
  0xc6   :  { %6283 = vst [vmem:[#allocation51_spill] sm:$0xff] %v4290_v11  ;;  %v4309_v11 = vperm.slane %v111_v0, 0 }
  0xc7   :  { %6284 = vst [vmem:[#allocation52_spill] sm:$0xff] %v4292_v59  ;;  %v4311_v59 = vperm.slane %v111_v0, 1 }
  0xc8   :  { %6291 = vst [vmem:[#allocation59_spill] sm:$0xff] %v4309_v11 }
  0xc9   :  { %6292 = vst [vmem:[#allocation60_spill] sm:$0xff] %v4311_v59 }
  0xcc   :  { %v4294_v30 = vpop.f32.mrf.mxu2  ;;  %v4296_v52 = vpop.f32.mrf.mxu3 }
  0xcd   :  { %6285 = vst [vmem:[#allocation53_spill] sm:$0xff] %v4294_v30  ;;  %v4298_v49 = vpop.f32.mrf.mxu1  ;;  %v177_v30 = vadd.f32 %v176_v2, %v4309_v11 }
  0xce   :  { %6286 = vst [vmem:[#allocation54_spill] sm:$0xff] %v4296_v52  ;;  %v218_v52 = vadd.f32 %v217_v10, %v4311_v59  ;;  %v4321_v10 = vperm.slane %v111_v0, 3 }
  0xcf   :  { %6287 = vst [vmem:[#allocation55_spill] sm:$0xff] %v4298_v49 }
  0xd0   :  { %6296 = vst [vmem:[#allocation64_spill] sm:$0xff] %v4321_v10 }
  0xd4   :  { %v4303_v4 = vpop.f32.mrf.mxu2  ;;  %v4305_v1 = vpop.f32.mrf.mxu3 }
  0xd5   :  { %6288 = vst [vmem:[#allocation56_spill] sm:$0xff] %v4303_v4  ;;  %v4307_v51 = vpop.f32.mrf.mxu1 }
  0xd6   :  { %6289 = vst [vmem:[#allocation57_spill] sm:$0xff] %v4305_v1 }
  0xd7   :  { %6290 = vst [vmem:[#allocation58_spill] sm:$0xff] %v4307_v51 }
  0xdc   :  { %v4315_v49 = vpop.f32.mrf.mxu3  ;;  %v404_v45 = vpop.f32.mrf.mxu2 }
  0xdd   :  { %6293 = vst [vmem:[#allocation61_spill] sm:$0xff] %v4315_v49  ;;  %v467_v56 = vadd.f32 %v404_v45, %v177_v30  ;;  %v424_v17 = vpop.f32.mrf.mxu1 }
  0xde   :  { %v468_v58 = vadd.f32 %v424_v17, %v218_v52  ;;  %v4324_v17 = vperm.slane %v111_v0, 2 }
  0xdf   :  { %v3185_v4 = vmul.f32 -1.442695, %v467_v56  ;;  %v300_v56 = vadd.f32 %v299_v43, %v4321_v10 }
  0xe0   :  { %v3186_v42 = vmul.f32 -1.442695, %v468_v58  ;;  %6297 = vst [vmem:[#allocation65_spill] sm:$0xff] %v4324_v17 }
  0xe1   :  { %3247 = vpow2.f32 %v3185_v4 }
  0xe2   :  { %3249 = vpow2.f32 %v3186_v42 }
  0xe4   :  { %v4317_v51 = vpop.f32.mrf.mxu3  ;;  %v444_v11 = vpop.f32.mrf.mxu2 }
  0xe5   :  { %6294 = vst [vmem:[#allocation62_spill] sm:$0xff] %v4317_v51 }
  0xe7   :  { %v3248_v1 = vpop.eup %3247 }
  0xe8   :  { %v3250_v53 = vpop.eup %3249  ;;  %v474_v5 = vadd.f32 1.0, %v3248_v1 }
  0xe9   :  { %v493_v55 = vadd.f32 1.0, %v3250_v53 }
  0xea   :  { %3251 = vrcp.f32 %v474_v5  ;;  %vm480_vm2 = vweird.f32 %v474_v5  ;;  %v486_v43 = vand.u32 2147483648, %v474_v5 }
  0xeb   :  { %3253 = vrcp.f32 %v493_v55  ;;  %v505_v50 = vand.u32 2147483648, %v493_v55  ;;  %vm499_vm5 = vweird.f32 %v493_v55 }
  0xec   :  { %v4319_v2 = vpop.f32.mrf.mxu3 }
  0xed   :  { %6295 = vst [vmem:[#allocation63_spill] sm:$0xff] %v4319_v2  ;;  %v259_v2 = vadd.f32 %v258_v62, %v4324_v17  ;;  %v506_v62 = vor.u32 1.1754944e-38, %v505_v50 }
  0xef   :  { %v469_v41 = vadd.f32 %v444_v11, %v259_v2 }
  0xf0   :  { %v3252_v49 = vpop.eup %3251 }
  0xf1   :  { %v3254_v45 = vpop.eup %3253  ;;  %v476_v30 = vmul.f32 %v3252_v49, %v474_v5  ;;  %vm481_vm3 = vweird.f32 %v3252_v49 }
  0xf2   :  { %v495_v52 = vmul.f32 %v3254_v45, %v493_v55  ;;  %vm500_vm4 = vweird.f32 %v3254_v45  ;;  %vm4327_vm6 = vmor %vm480_vm2, %vm481_vm3 }
  0xf3   :  { %v477_v58 = vsub.f32 1.0, %v476_v30  ;;  %vm501_vm7 = vmor %vm499_vm5, %vm500_vm4 }
  0xf4   :  { %v496_v42 = vsub.f32 1.0, %v495_v52  ;;  %v464_v4 = vpop.f32.mrf.mxu3  ;;  %v484_v52 = vand.u32 2147483647, %v474_v5 }
  0xf5   :  { %v470_v51 = vadd.f32 %v464_v4, %v300_v56  ;;  %v478_v59 = vmul.f32 %v3252_v49, %v477_v58 }
  0xf6   :  { %v497_v1 = vmul.f32 %v3254_v45, %v496_v42  ;;  %v487_v42 = vor.u32 1.1754944e-38, %v486_v43  ;;  %vm485_vm8 = vcmp.eq.f32.partialorder %v484_v52, 8.507059e+37 }
  0xf7   :  { %v3187_v53 = vmul.f32 -1.442695, %v470_v51  ;;  %v479_v30 = vadd.f32 %v3252_v49, %v478_v59  ;;  %v503_v51 = vand.u32 2147483647, %v493_v55 }
  0xf8   :  { %v498_v31 = vadd.f32 %v3254_v45, %v497_v1 }
  0xf9   :  { %3255 = vpow2.f32 %v3187_v53  ;;  %v483_v4 = vsel %vm4327_vm6, %v3252_v49, %v479_v30  ;;  %vm504_vm9 = vcmp.eq.f32.partialorder %v503_v51, 8.507059e+37 }
  0xfa   :  { %v502_v56 = vsel %vm501_vm7, %v3254_v45, %v498_v31  ;;  %3257 = vtanh.f32 %v469_v41  ;;  %v488_v59 = vsel %vm485_vm8, %v487_v42, %v483_v4 }
  0xfb   :  { %v507_v2 = vsel %vm504_vm9, %v506_v62, %v502_v56 }
  0xfc   :  { %v529_v1 = vmul.f32 0.0, %v507_v2 }
  0xff   :  { %v3256_v58 = vpop.eup %3255 }
 0x100   :  { %v513_v11 = vadd.f32 1.0, %v3256_v58  ;;  %v3258_v53 = vpop.eup %3257 }
 0x101   :  { %v530_v17 = vmul.f32 %v3258_v53, %v488_v59 }
 0x102   :  { %3259 = vrcp.f32 %v513_v11  ;;  %v525_v41 = vand.u32 2147483648, %v513_v11  ;;  %v523_v49 = vand.u32 2147483647, %v513_v11  ;;  %vm519_vm11 = vweird.f32 %v513_v11 }
 0x103   :  { %v4333_v55 = vadd.f32 %v530_v17, %v529_v1  ;;  %v6328_v17 = vld [vmem:[#allocation59_spill] sm:$0xff]  ;;  %v6329_v1 = vld [vmem:[#allocation48_spill] sm:$0xff] }
 0x104   :  { %v526_v30 = vor.u32 1.1754944e-38, %v525_v41  ;;  %vm524_vm13 = vcmp.eq.f32.partialorder %v523_v49, 8.507059e+37  ;;  %v303_v53 = vadd.f32 %v6329_v1, %v4321_v10 }
 0x105   :  { %3261 = vtanh.f32 %v4333_v55 }
 0x108   :  { %v3260_v5 = vpop.eup %3259 }
 0x109   :  { %v515_v31 = vmul.f32 %v3260_v5, %v513_v11  ;;  %vm520_vm10 = vweird.f32 %v3260_v5 }
 0x10a   :  { %vm521_vm12 = vmor %vm519_vm11, %vm520_vm10 }
 0x10b   :  { %v516_v45 = vsub.f32 1.0, %v515_v31  ;;  %v3262_v52 = vpop.eup %3261 }
 0x10d   :  { %v517_v50 = vmul.f32 %v3260_v5, %v516_v45 }
 0x10f   :  { %v518_v43 = vadd.f32 %v3260_v5, %v517_v50 }
 0x111   :  { %v522_v0 = vsel %vm521_vm12, %v3260_v5, %v518_v43 }
 0x112   :  { %v527_v51 = vsel %vm524_vm13, %v526_v30, %v522_v0 }
 0x113   :  { %v4336_v56 = vmul.f32 %v3262_v52, %v527_v51  ;;  %v6330_v52 = vld [vmem:[#allocation65_spill] sm:$0xff]  ;;  %v6331_v51 = vld [vmem:[#allocation40_spill] sm:$0xff] }
 0x115   :  { %6300 = vst [vmem:[#allocation66_spill] sm:$0xff] %v4336_v56  ;;  %551 = vmatmul.f32.vlgmr.msrb.gmra.mxu0 %v4336_v56  ;;  %571 = vmatmul.f32.vlgmr.msrb.gmra.mxu1 %v4336_v56 }
 0x116   :  { %591 = vmatmul.f32.vlgmr.msrb.gmra.mxu2 %v4336_v56  ;;  %611 = vmatmul.f32.vlgmr.msrb.gmra.mxu3 %v4336_v56 }
 0x117   :  { %831 = vmatpush.msrb.mxu0 %v3843_v9  ;;  %851 = vmatpush.msrb.mxu1 %v3859_v13  ;;  %v6301_v9 = vld [vmem:[#allocation13_spill] sm:$0xff]  ;;  %v6303_v13 = vld [vmem:[#allocation31_spill] sm:$0xff] }
 0x118   :  { %871 = vmatpush.msrb.mxu2 %v4024_v54  ;;  %891 = vmatpush.msrb.mxu3 %v3866_v16  ;;  %v6306_v16 = vld [vmem:[#allocation20_spill] sm:$0xff] }
 0x119   :  { %832 = vmatpush.msrb.mxu0 %v3857_v12  ;;  %852 = vmatpush.msrb.mxu1 %v3864_v15  ;;  %v6302_v12 = vld [vmem:[#allocation17_spill] sm:$0xff]  ;;  %v6305_v15 = vld [vmem:[#allocation14_spill] sm:$0xff] }
 0x11a   :  { %872 = vmatpush.msrb.mxu2 %v4035_v57  ;;  %892 = vmatpush.msrb.mxu3 %v3881_v19  ;;  %v6307_v19 = vld [vmem:[#allocation32_spill] sm:$0xff] }
 0x11b   :  { %833 = vmatpush.msrb.mxu0 %v3862_v14  ;;  %853 = vmatpush.msrb.mxu1 %v3889_v21  ;;  %v6304_v14 = vld [vmem:[#allocation21_spill] sm:$0xff]  ;;  %v6309_v21 = vld [vmem:[#allocation15_spill] sm:$0xff] }
 0x11c   :  { %873 = vmatpush.msrb.mxu2 %v4044_v60  ;;  %893 = vmatpush.msrb.mxu3 %v3894_v22  ;;  %v6310_v22 = vld [vmem:[#allocation22_spill] sm:$0xff] }
 0x11d   :  { %834 = vmatpush.msrb.mxu0 %v3886_v20  ;;  %854 = vmatpush.msrb.mxu1 %v3902_v24  ;;  %v6308_v20 = vld [vmem:[#allocation23_spill] sm:$0xff] }
 0x11e   :  { %874 = vmatpush.msrb.mxu2 %v4054_v61  ;;  %894 = vmatpush.msrb.mxu3 %v3906_v25  ;;  %v6312_v24 = vld [vmem:[#allocation27_spill] sm:$0xff]  ;;  %v6313_v25 = vld [vmem:[#allocation16_spill] sm:$0xff] }
 0x11f   :  { %835 = vmatpush.msrb.mxu0 %v3900_v23  ;;  %855 = vmatpush.msrb.mxu1 %v3911_v27  ;;  %v6311_v23 = vld [vmem:[#allocation33_spill] sm:$0xff]  ;;  %v6315_v27 = vld [vmem:[#allocation34_spill] sm:$0xff] }
 0x120   :  { %875 = vmatpush.msrb.mxu2 %v4065_v63  ;;  %895 = vmatpush.msrb.mxu3 %v3916_v28  ;;  %v6316_v28 = vld [vmem:[#allocation28_spill] sm:$0xff] }
 0x121   :  { %836 = vmatpush.msrb.mxu0 %v3908_v26  ;;  %856 = vmatpush.msrb.mxu1 %v3936_v33  ;;  %v6314_v26 = vld [vmem:[#allocation24_spill] sm:$0xff]  ;;  %v6319_v33 = vld [vmem:[#allocation35_spill] sm:$0xff] }
 0x122   :  { %876 = vmatpush.msrb.mxu2 %v4075_v3  ;;  %896 = vmatpush.msrb.mxu3 %v3943_v34  ;;  %v6320_v34 = vld [vmem:[#allocation29_spill] sm:$0xff] }
 0x123   :  { %837 = vmatpush.msrb.mxu0 %v3918_v29  ;;  %857 = vmatpush.msrb.mxu1 %v3951_v36  ;;  %v6317_v29 = vld [vmem:[#allocation18_spill] sm:$0xff] }
 0x124   :  { %877 = vmatpush.msrb.mxu2 %v4081_v6  ;;  %897 = vmatpush.msrb.mxu3 %v3955_v37  ;;  %v6322_v36 = vld [vmem:[#allocation26_spill] sm:$0xff]  ;;  %v6323_v37 = vld [vmem:[#allocation36_spill] sm:$0xff] }
 0x125   :  { %838 = vmatpush.msrb.mxu0 %v3934_v32  ;;  %858 = vmatpush.msrb.mxu1 %v3960_v39  ;;  %v6318_v32 = vld [vmem:[#allocation25_spill] sm:$0xff]  ;;  %v179_v39 = vpop.f32.mrf.mxu0 }
 0x126   :  { %878 = vmatpush.msrb.mxu2 %v4087_v7  ;;  %898 = vmatpush.msrb.mxu3 %v3965_v40  ;;  %v180_v58 = vadd.f32 %v179_v39, %v6328_v17 }
 0x127   :  { %839 = vmatpush.msrb.mxu0 %v3949_v35  ;;  %859 = vmatpush.msrb.mxu1 %v3981_v44  ;;  %v6321_v35 = vld [vmem:[#allocation19_spill] sm:$0xff] }
 0x128   :  { %879 = vmatpush.msrb.mxu2 %v4099_v8  ;;  %899 = vmatpush.msrb.mxu3 %v3996_v47  ;;  %v6327_v47 = vld [vmem:[#allocation41_spill] sm:$0xff] }
 0x129   :  { %840 = vmatpush.msrb.mxu0 %v3957_v38  ;;  %860 = vmatpush.msrb.mxu1 %v3994_v46  ;;  %v6324_v38 = vld [vmem:[#allocation30_spill] sm:$0xff]  ;;  %v6326_v46 = vld [vmem:[#allocation60_spill] sm:$0xff] }
 0x12a   :  { %880 = vmatpush.msrb.mxu2 %v4107_v18  ;;  %900 = vmatpush.msrb.mxu3 %v4000_v48  ;;  %v221_v48 = vadd.f32 %v6327_v47, %v6326_v46 }
 0x12b   :  { %841 = vmatpush.msrb.mxu0 %v6301_v9  ;;  %861 = vmatpush.msrb.mxu1 %v6302_v12  ;;  %v262_v9 = vadd.f32 %v6331_v51, %v6330_v52 }
 0x12c   :  { %881 = vmatpush.msrb.mxu2 %v6303_v13  ;;  %901 = vmatpush.msrb.mxu3 %v6304_v14 }
 0x12d   :  { %842 = vmatpush.msrb.mxu0 %v6305_v15  ;;  %862 = vmatpush.msrb.mxu1 %v6306_v16  ;;  %v4406_v40 = vpop.f32.mrf.mxu0 }
 0x12e   :  { %882 = vmatpush.msrb.mxu2 %v6307_v19  ;;  %902 = vmatpush.msrb.mxu3 %v6308_v20 }
 0x12f   :  { %843 = vmatpush.msrb.mxu0 %v6309_v21  ;;  %863 = vmatpush.msrb.mxu1 %v6310_v22 }
 0x130   :  { %883 = vmatpush.msrb.mxu2 %v6311_v23  ;;  %903 = vmatpush.msrb.mxu3 %v6312_v24 }
 0x131   :  { %844 = vmatpush.msrb.mxu0 %v6313_v25  ;;  %864 = vmatpush.msrb.mxu1 %v6314_v26 }
 0x132   :  { %884 = vmatpush.msrb.mxu2 %v6315_v27  ;;  %904 = vmatpush.msrb.mxu3 %v6316_v28 }
 0x133   :  { %845 = vmatpush.msrb.mxu0 %v6317_v29  ;;  %865 = vmatpush.msrb.mxu1 %v6318_v32 }
 0x134   :  { %885 = vmatpush.msrb.mxu2 %v6319_v33  ;;  %905 = vmatpush.msrb.mxu3 %v6320_v34 }
 0x135   :  { %846 = vmatpush.msrb.mxu0 %v6321_v35  ;;  %866 = vmatpush.msrb.mxu1 %v6322_v36  ;;  %v4408_v44 = vpop.f32.mrf.mxu0 }
 0x136   :  { %886 = vmatpush.msrb.mxu2 %v6323_v37  ;;  %906 = vmatpush.msrb.mxu3 %v6324_v38  ;;  %6325 = vst [vmem:[#allocation13_spill] sm:$0xff] %v4408_v44 }
 0x192   :  { %v552_v62 = vpop.f32.mrf.mxu0  ;;  %v572_v42 = vpop.f32.mrf.mxu1 }
 0x193   :  { %v615_v4 = vadd.f32 %v552_v62, %v180_v58  ;;  %v616_v11 = vadd.f32 %v572_v42, %v221_v48 }
 0x195   :  { %v3188_v2 = vmul.f32 -1.442695, %v615_v4  ;;  %v3189_v59 = vmul.f32 -1.442695, %v616_v11 }
 0x197   :  { %3263 = vpow2.f32 %v3188_v2 }
 0x198   :  { %3265 = vpow2.f32 %v3189_v59 }
 0x199   :  { %v612_v5 = vpop.f32.mrf.mxu3  ;;  %v592_v30 = vpop.f32.mrf.mxu2 }
 0x19a   :  { %v618_v31 = vadd.f32 %v612_v5, %v303_v53  ;;  %v617_v21 = vadd.f32 %v592_v30, %v262_v9 }
 0x19c   :  { %v3190_v45 = vmul.f32 -1.442695, %v618_v31 }
 0x19d   :  { %v3264_v41 = vpop.eup %3263 }
 0x19e   :  { %v3266_v50 = vpop.eup %3265  ;;  %v622_v49 = vadd.f32 1.0, %v3264_v41  ;;  %3267 = vpow2.f32 %v3190_v45 }
 0x19f   :  { %v641_v43 = vadd.f32 1.0, %v3266_v50 }
 0x1a0   :  { %3269 = vrcp.f32 %v622_v49  ;;  %v634_v48 = vand.u32 2147483648, %v622_v49  ;;  %v632_v42 = vand.u32 2147483647, %v622_v49  ;;  %vm628_vm0 = vweird.f32 %v622_v49 }
 0x1a1   :  { %3271 = vrcp.f32 %v641_v43  ;;  %v653_v58 = vand.u32 2147483648, %v641_v43  ;;  %v651_v11 = vand.u32 2147483647, %v641_v43  ;;  %vm647_vm1 = vweird.f32 %v641_v43 }
 0x1a2   :  { %v635_v1 = vor.u32 1.1754944e-38, %v634_v48  ;;  %vm633_vm4 = vcmp.eq.f32.partialorder %v632_v42, 8.507059e+37  ;;  %v4437_v42 = vld [vmem:[#allocation3 + $0x1c0] sm:$0xff] }
 0x1a3   :  { %v654_v31 = vor.u32 1.1754944e-38, %v653_v58  ;;  %vm652_vm5 = vcmp.eq.f32.partialorder %v651_v11, 8.507059e+37  ;;  %v4444_v11 = vld [vmem:[#allocation3 + $0x1d8] sm:$0xff] }
 0x1a4   :  { %v3268_v0 = vpop.eup %3267 }
 0x1a5   :  { %v661_v12 = vadd.f32 1.0, %v3268_v0 }
 0x1a6   :  { %v3270_v15 = vpop.eup %3269 }
 0x1a7   :  { %v3272_v25 = vpop.eup %3271  ;;  %v624_v29 = vmul.f32 %v3270_v15, %v622_v49  ;;  %3273 = vrcp.f32 %v661_v12  ;;  %vm629_vm14 = vweird.f32 %v3270_v15  ;;  %vm667_vm7 = vweird.f32 %v661_v12 }
 0x1a8   :  { %v643_v35 = vmul.f32 %v3272_v25, %v641_v43  ;;  %3275 = vtanh.f32 %v617_v21  ;;  %vm648_vm15 = vweird.f32 %v3272_v25  ;;  %vm630_vm2 = vmor %vm628_vm0, %vm629_vm14 }
 0x1a9   :  { %v625_v39 = vsub.f32 1.0, %v624_v29  ;;  %vm649_vm3 = vmor %vm647_vm1, %vm648_vm15 }
 0x1aa   :  { %v644_v47 = vsub.f32 1.0, %v643_v35  ;;  %v673_v35 = vand.u32 2147483648, %v661_v12 }
 0x1ab   :  { %v626_v62 = vmul.f32 %v3270_v15, %v625_v39 }
 0x1ac   :  { %v645_v4 = vmul.f32 %v3272_v25, %v644_v47  ;;  %v674_v47 = vor.u32 1.1754944e-38, %v673_v35  ;;  %v4527_v35 = vld [vmem:[#allocation3 + $0xa0] sm:$0xff] }
 0x1ad   :  { %v3274_v2 = vpop.eup %3273  ;;  %v627_v59 = vadd.f32 %v3270_v15, %v626_v62  ;;  %v4434_v62 = vld [vmem:[#allocation3 + $0x1f8] sm:$0xff]  ;;  %6334 = vst [vmem:[#allocation21_spill] sm:$0xff] %v4527_v35 }
 0x1ae   :  { %v646_v53 = vadd.f32 %v3272_v25, %v645_v4  ;;  %v663_v5 = vmul.f32 %v3274_v2, %v661_v12  ;;  %v3276_v41 = vpop.eup %3275  ;;  %vm668_vm6 = vweird.f32 %v3274_v2  ;;  %v4440_v4 = vld [vmem:[#allocation3 + $0x1c8] sm:$0xff] }
 0x1af   :  { %v631_v45 = vsel %vm630_vm2, %v3270_v15, %v627_v59  ;;  %v671_v15 = vand.u32 2147483647, %v661_v12  ;;  %vm669_vm8 = vmor %vm667_vm7, %vm668_vm6  ;;  %v4430_v12 = vld [vmem:[#allocation3 + $0x1e8] sm:$0xff]  ;;  %v4454_v59 = vld [vmem:[#allocation3 + $0x1b8] sm:$0xff] }
 0x1b0   :  { %v636_v50 = vsel %vm633_vm4, %v635_v1, %v631_v45  ;;  %v650_v30 = vsel %vm649_vm3, %v3272_v25, %v646_v53  ;;  %v664_v0 = vsub.f32 1.0, %v663_v5  ;;  %v4457_v1 = vld [vmem:[#allocation3 + $0x180] sm:$0xff]  ;;  %v4464_v53 = vld [vmem:[#allocation3 + $0x198] sm:$0xff] }
 0x1b1   :  { %v655_v51 = vsel %vm652_vm5, %v654_v31, %v650_v30  ;;  %v678_v9 = vmul.f32 %v3276_v41, %v636_v50  ;;  %vm672_vm9 = vcmp.eq.f32.partialorder %v671_v15, 8.507059e+37  ;;  %v4467_v5 = vld [vmem:[#allocation3 + $0x160] sm:$0xff]  ;;  %v4474_v31 = vld [vmem:[#allocation3 + $0x178] sm:$0xff] }
 0x1b2   :  { %v677_v21 = vmul.f32 %v655_v51, %v4333_v55  ;;  %v665_v29 = vmul.f32 %v3274_v2, %v664_v0  ;;  %v4427_v55 = vld [vmem:[#allocation3 + $0x1e0] sm:$0xff]  ;;  %v4484_v41 = vld [vmem:[#allocation3 + $0x158] sm:$0xff] }
 0x1b3   :  { %v4477_v45 = vld [vmem:[#allocation3 + $0x140] sm:$0xff]  ;;  %v4494_v30 = vld [vmem:[#allocation3 + $0x138] sm:$0xff] }
 0x1b4   :  { %v4418_v49 = vadd.f32 %v678_v9, %v677_v21  ;;  %v666_v43 = vadd.f32 %v3274_v2, %v665_v29  ;;  %v4487_v50 = vld [vmem:[#allocation3 + $0x120] sm:$0xff]  ;;  %v4504_v51 = vld [vmem:[#allocation3 + $0x118] sm:$0xff] }
 0x1b5   :  { %v4497_v0 = vld [vmem:[#allocation3 + $0x100] sm:$0xff]  ;;  %v4514_v21 = vld [vmem:[#allocation3 + $0xf8] sm:$0xff] }
 0x1b6   :  { %3277 = vtanh.f32 %v4418_v49  ;;  %v670_v39 = vsel %vm669_vm8, %v3274_v2, %v666_v43  ;;  %v4447_v2 = vld [vmem:[#allocation3 + $0x1a0] sm:$0xff]  ;;  %v4524_v43 = vld [vmem:[#allocation3 + $0xd8] sm:$0xff] }
 0x1b7   :  { %v675_v48 = vsel %vm672_vm9, %v674_v47, %v670_v39  ;;  %v4507_v9 = vld [vmem:[#allocation3 + $0xe0] sm:$0xff]  ;;  %6333 = vst [vmem:[#allocation31_spill] sm:$0xff] %v4524_v43 }
 0x1b8   :  { %v4517_v29 = vld [vmem:[#allocation3 + $0xc0] sm:$0xff] }
 0x1b9   :  { %v4535_v15 = vld [vmem:[#allocation3 + $0x80] sm:$0xff] }
 0x1ba   :  { %6336 = vst [vmem:[#allocation20_spill] sm:$0xff] %v4535_v15 }
 0x1bc   :  { %v3278_v25 = vpop.eup %3277 }
 0x1bd   :  { %v4421_v58 = vmul.f32 %v3278_v25, %v675_v48 }
 0x1bf   :  { %6332 = vst [vmem:[#allocation17_spill] sm:$0xff] %v4421_v58  ;;  %699 = vmatmul.f32.vlgmr.msra.gmra.mxu0 %v4421_v58  ;;  %719 = vmatmul.f32.vlgmr.msra.gmra.mxu1 %v4421_v58 }
 0x1c0   :  { %739 = vmatmul.f32.vlgmr.msra.gmra.mxu2 %v4421_v58  ;;  %759 = vmatmul.f32.vlgmr.msra.gmra.mxu3 %v4421_v58 }
 0x1c1   :  { %979 = vmatpush.msra.mxu0 %v4427_v55  ;;  %999 = vmatpush.msra.mxu1 %v4430_v12 }
 0x1c2   :  { %1019 = vmatpush.msra.mxu2 %v4024_v54  ;;  %1039 = vmatpush.msra.mxu3 %v4434_v62  ;;  %v4450_v54 = vld [vmem:[#allocation3 + $0x1a8] sm:$0xff] }
 0x1c3   :  { %980 = vmatpush.msra.mxu0 %v4437_v42  ;;  %1000 = vmatpush.msra.mxu1 %v4440_v4 }
 0x1c4   :  { %1020 = vmatpush.msra.mxu2 %v4035_v57  ;;  %1040 = vmatpush.msra.mxu3 %v4444_v11  ;;  %v4460_v57 = vld [vmem:[#allocation3 + $0x188] sm:$0xff] }
 0x1c5   :  { %981 = vmatpush.msra.mxu0 %v4447_v2  ;;  %1001 = vmatpush.msra.mxu1 %v4450_v54 }
 0x1c6   :  { %1021 = vmatpush.msra.mxu2 %v4044_v60  ;;  %1041 = vmatpush.msra.mxu3 %v4454_v59  ;;  %v4470_v60 = vld [vmem:[#allocation3 + $0x168] sm:$0xff] }
 0x1c7   :  { %982 = vmatpush.msra.mxu0 %v4457_v1  ;;  %1002 = vmatpush.msra.mxu1 %v4460_v57 }
 0x1c8   :  { %1022 = vmatpush.msra.mxu2 %v4054_v61  ;;  %1042 = vmatpush.msra.mxu3 %v4464_v53  ;;  %v4480_v61 = vld [vmem:[#allocation3 + $0x148] sm:$0xff] }
 0x1c9   :  { %983 = vmatpush.msra.mxu0 %v4467_v5  ;;  %1003 = vmatpush.msra.mxu1 %v4470_v60 }
 0x1ca   :  { %1023 = vmatpush.msra.mxu2 %v4065_v63  ;;  %1043 = vmatpush.msra.mxu3 %v4474_v31  ;;  %v4490_v63 = vld [vmem:[#allocation3 + $0x128] sm:$0xff] }
 0x1cb   :  { %984 = vmatpush.msra.mxu0 %v4477_v45  ;;  %1004 = vmatpush.msra.mxu1 %v4480_v61 }
 0x1cc   :  { %1024 = vmatpush.msra.mxu2 %v4075_v3  ;;  %1044 = vmatpush.msra.mxu3 %v4484_v41  ;;  %v4500_v3 = vld [vmem:[#allocation3 + $0x108] sm:$0xff] }
 0x1cd   :  { %985 = vmatpush.msra.mxu0 %v4487_v50  ;;  %1005 = vmatpush.msra.mxu1 %v4490_v63 }
 0x1ce   :  { %1025 = vmatpush.msra.mxu2 %v4081_v6  ;;  %1045 = vmatpush.msra.mxu3 %v4494_v30  ;;  %v4510_v6 = vld [vmem:[#allocation3 + $0xe8] sm:$0xff] }
 0x1cf   :  { %986 = vmatpush.msra.mxu0 %v4497_v0  ;;  %1006 = vmatpush.msra.mxu1 %v4500_v3 }
 0x1d0   :  { %1026 = vmatpush.msra.mxu2 %v4087_v7  ;;  %1046 = vmatpush.msra.mxu3 %v4504_v51  ;;  %v4520_v7 = vld [vmem:[#allocation3 + $0xc8] sm:$0xff] }
 0x1d1   :  { %987 = vmatpush.msra.mxu0 %v4507_v9  ;;  %1007 = vmatpush.msra.mxu1 %v4510_v6 }
 0x1d2   :  { %1027 = vmatpush.msra.mxu2 %v4099_v8  ;;  %1047 = vmatpush.msra.mxu3 %v4514_v21  ;;  %v4530_v8 = vld [vmem:[#allocation3 + $0xa8] sm:$0xff] }
 0x1d3   :  { %988 = vmatpush.msra.mxu0 %v4517_v29  ;;  %1008 = vmatpush.msra.mxu1 %v4520_v7  ;;  %6335 = vst [vmem:[#allocation14_spill] sm:$0xff] %v4530_v8 }
 0x1d4   :  { %1028 = vmatpush.msra.mxu2 %v4107_v18  ;;  %1048 = vmatpush.msra.mxu3 %v4524_v43  ;;  %v4541_v18 = vld [vmem:[#allocation3 + $0x60] sm:$0xff] }
 0x1d5   :  { %989 = vmatpush.msra.mxu0 %v4527_v35  ;;  %1009 = vmatpush.msra.mxu1 %v4530_v8  ;;  %6337 = vst [vmem:[#allocation32_spill] sm:$0xff] %v4541_v18 }
 0x1d6   :  { %1029 = vmatpush.msra.mxu2 %v6303_v13  ;;  %1049 = vmatpush.msra.mxu3 %v6304_v14  ;;  %v4547_v13 = vld [vmem:[#allocation3 + $0x40] sm:$0xff] }
 0x1d7   :  { %990 = vmatpush.msra.mxu0 %v4535_v15  ;;  %1010 = vmatpush.msra.mxu1 %v6306_v16  ;;  %6338 = vst [vmem:[#allocation23_spill] sm:$0xff] %v4547_v13  ;;  %v4553_v14 = vld [vmem:[#allocation3 + $0x20] sm:$0xff] }
 0x1d8   :  { %1030 = vmatpush.msra.mxu2 %v6307_v19  ;;  %1050 = vmatpush.msra.mxu3 %v6308_v20  ;;  %6339 = vst [vmem:[#allocation15_spill] sm:$0xff] %v4553_v14  ;;  %v4559_v16 = vld [vmem:[#allocation3] sm:$0xff]  ;;  %v6341_v19 = vld [vmem:[#allocation44_spill] sm:$0xff] }
 0x1d9   :  { %991 = vmatpush.msra.mxu0 %v4541_v18  ;;  %1011 = vmatpush.msra.mxu1 %v6310_v22  ;;  %6340 = vst [vmem:[#allocation22_spill] sm:$0xff] %v4559_v16  ;;  %v224_v20 = vadd.f32 %v6341_v19, %v6326_v46  ;;  %v183_v22 = vadd.f32 %v4406_v40, %v6328_v17 }
 0x1da   :  { %1031 = vmatpush.msra.mxu2 %v6311_v23  ;;  %1051 = vmatpush.msra.mxu3 %v6312_v24 }
 0x1db   :  { %992 = vmatpush.msra.mxu0 %v4547_v13  ;;  %1012 = vmatpush.msra.mxu1 %v6314_v26 }
 0x1dc   :  { %1032 = vmatpush.msra.mxu2 %v6315_v27  ;;  %1052 = vmatpush.msra.mxu3 %v6316_v28 }
 0x1dd   :  { %993 = vmatpush.msra.mxu0 %v4553_v14  ;;  %1013 = vmatpush.msra.mxu1 %v6318_v32 }
 0x1de   :  { %1033 = vmatpush.msra.mxu2 %v6319_v33  ;;  %1053 = vmatpush.msra.mxu3 %v6320_v34  ;;  %v6342_v33 = vld [vmem:[#allocation51_spill] sm:$0xff] }
 0x1df   :  { %994 = vmatpush.msra.mxu0 %v4559_v16  ;;  %1014 = vmatpush.msra.mxu1 %v6322_v36  ;;  %v306_v34 = vadd.f32 %v6342_v33, %v4321_v10 }
 0x1e0   :  { %1034 = vmatpush.msra.mxu2 %v6323_v37  ;;  %1054 = vmatpush.msra.mxu3 %v6324_v38 }
 0x23c   :  { %v700_v23 = vpop.f32.mrf.mxu0  ;;  %v720_v24 = vpop.f32.mrf.mxu1 }
 0x23d   :  { %v763_v26 = vadd.f32 %v700_v23, %v183_v22  ;;  %v764_v27 = vadd.f32 %v720_v24, %v224_v20  ;;  %v6343_v20 = vld [vmem:[#allocation43_spill] sm:$0xff] }
 0x23e   :  { %v265_v22 = vadd.f32 %v6343_v20, %v6330_v52 }
 0x23f   :  { %v3191_v28 = vmul.f32 -1.442695, %v763_v26  ;;  %v3192_v32 = vmul.f32 -1.442695, %v764_v27 }
 0x241   :  { %3279 = vpow2.f32 %v3191_v28 }
 0x242   :  { %3281 = vpow2.f32 %v3192_v32 }
 0x243   :  { %v760_v36 = vpop.f32.mrf.mxu3  ;;  %v740_v40 = vpop.f32.mrf.mxu2 }
 0x244   :  { %v766_v37 = vadd.f32 %v760_v36, %v306_v34  ;;  %v765_v26 = vadd.f32 %v740_v40, %v265_v22 }
 0x246   :  { %v3193_v38 = vmul.f32 -1.442695, %v766_v37 }
 0x247   :  { %v3280_v39 = vpop.eup %3279 }
 0x248   :  { %v3282_v47 = vpop.eup %3281  ;;  %v770_v25 = vadd.f32 1.0, %v3280_v39  ;;  %3283 = vpow2.f32 %v3193_v38 }
 0x249   :  { %v789_v48 = vadd.f32 1.0, %v3282_v47 }
 0x24a   :  { %3285 = vrcp.f32 %v770_v25  ;;  %v782_v36 = vand.u32 2147483648, %v770_v25  ;;  %v780_v39 = vand.u32 2147483647, %v770_v25  ;;  %vm776_vm12 = vweird.f32 %v770_v25 }
 0x24b   :  { %3287 = vrcp.f32 %v789_v48  ;;  %v801_v37 = vand.u32 2147483648, %v789_v48  ;;  %v799_v58 = vand.u32 2147483647, %v789_v48  ;;  %vm795_vm13 = vweird.f32 %v789_v48 }
 0x24c   :  { %v783_v40 = vor.u32 1.1754944e-38, %v782_v36  ;;  %vm781_vm0 = vcmp.eq.f32.partialorder %v780_v39, 8.507059e+37 }
 0x24d   :  { %vm800_vm1 = vcmp.eq.f32.partialorder %v799_v58, 8.507059e+37 }
 0x24e   :  { %v3284_v19 = vpop.eup %3283 }
 0x24f   :  { %v809_v23 = vadd.f32 1.0, %v3284_v19 }
 0x250   :  { %v3286_v24 = vpop.eup %3285 }
 0x251   :  { %v3288_v27 = vpop.eup %3287  ;;  %v772_v28 = vmul.f32 %v3286_v24, %v770_v25  ;;  %3289 = vrcp.f32 %v809_v23  ;;  %vm777_vm10 = vweird.f32 %v3286_v24  ;;  %v821_v36 = vand.u32 2147483648, %v809_v23 }
 0x252   :  { %v791_v32 = vmul.f32 %v3288_v27, %v789_v48  ;;  %3291 = vtanh.f32 %v765_v26  ;;  %vm796_vm11 = vweird.f32 %v3288_v27  ;;  %vm778_vm14 = vmor %vm776_vm12, %vm777_vm10  ;;  %vm815_vm3 = vweird.f32 %v809_v23 }
 0x253   :  { %v773_v33 = vsub.f32 1.0, %v772_v28  ;;  %vm797_vm15 = vmor %vm795_vm13, %vm796_vm11  ;;  %v802_v28 = vor.u32 1.1754944e-38, %v801_v37  ;;  %v822_v39 = vor.u32 1.1754944e-38, %v821_v36  ;;  %v4672_v36 = vld [vmem:[#allocation3 + $0x48] sm:$0xff] }
 0x254   :  { %v792_v34 = vsub.f32 1.0, %v791_v32  ;;  %6354 = vst [vmem:[#allocation19_spill] sm:$0xff] %v4672_v36 }
 0x255   :  { %v774_v38 = vmul.f32 %v3286_v24, %v773_v33 }
 0x256   :  { %v793_v47 = vmul.f32 %v3288_v27, %v792_v34 }
 0x257   :  { %v3290_v56 = vpop.eup %3289  ;;  %v775_v20 = vadd.f32 %v3286_v24, %v774_v38 }
 0x258   :  { %v794_v19 = vadd.f32 %v3288_v27, %v793_v47  ;;  %v811_v22 = vmul.f32 %v3290_v56, %v809_v23  ;;  %v3292_v26 = vpop.eup %3291  ;;  %vm816_vm2 = vweird.f32 %v3290_v56 }
 0x259   :  { %v779_v32 = vsel %vm778_vm14, %v3286_v24, %v775_v20  ;;  %v819_v24 = vand.u32 2147483647, %v809_v23  ;;  %vm817_vm4 = vmor %vm815_vm3, %vm816_vm2  ;;  %v4621_v23 = vld [vmem:[#allocation3 + $0x130] sm:$0xff] }
 0x25a   :  { %v784_v52 = vsel %vm781_vm0, %v783_v40, %v779_v32  ;;  %v798_v33 = vsel %vm797_vm15, %v3288_v27, %v794_v19  ;;  %v812_v10 = vsub.f32 1.0, %v811_v22  ;;  %v4627_v20 = vld [vmem:[#allocation3 + $0x110] sm:$0xff]  ;;  %v4652_v32 = vld [vmem:[#allocation3 + $0x88] sm:$0xff] }
 0x25b   :  { %v803_v34 = vsel %vm800_vm1, %v802_v28, %v798_v33  ;;  %v826_v44 = vmul.f32 %v3292_v26, %v784_v52  ;;  %vm820_vm5 = vcmp.eq.f32.partialorder %v819_v24, 8.507059e+37  ;;  %v4609_v52 = vld [vmem:[#allocation3 + $0x170] sm:$0xff]  ;;  %v4648_v28 = vld [vmem:[#allocation3 + $0xb8] sm:$0xff]  ;;  %6348 = vst [vmem:[#allocation34_spill] sm:$0xff] %v4652_v32 }
 0x25c   :  { %v825_v17 = vmul.f32 %v803_v34, %v4418_v49  ;;  %v813_v38 = vmul.f32 %v3290_v56, %v812_v10  ;;  %v4585_v10 = vld [vmem:[#allocation3 + $0x1f0] sm:$0xff]  ;;  %6347 = vst [vmem:[#allocation24_spill] sm:$0xff] %v4648_v28  ;;  %v4658_v33 = vld [vmem:[#allocation3 + $0x98] sm:$0xff]  ;;  %v4662_v34 = vld [vmem:[#allocation3 + $0x68] sm:$0xff] }
 0x25d   :  { %v4615_v49 = vld [vmem:[#allocation3 + $0x150] sm:$0xff]  ;;  %6350 = vst [vmem:[#allocation18_spill] sm:$0xff] %v4658_v33 }
 0x25e   :  { %v4574_v25 = vadd.f32 %v826_v44, %v825_v17  ;;  %v814_v48 = vadd.f32 %v3290_v56, %v813_v38  ;;  %v4597_v44 = vld [vmem:[#allocation3 + $0x1b0] sm:$0xff]  ;;  %6351 = vst [vmem:[#allocation25_spill] sm:$0xff] %v4662_v34 }
 0x25f   :  { %v4603_v17 = vld [vmem:[#allocation3 + $0x190] sm:$0xff] }
 0x260   :  { %3293 = vtanh.f32 %v4574_v25  ;;  %v818_v37 = vsel %vm817_vm4, %v3290_v56, %v814_v48  ;;  %v4591_v56 = vld [vmem:[#allocation3 + $0x1d0] sm:$0xff]  ;;  %v4668_v48 = vld [vmem:[#allocation3 + $0x78] sm:$0xff] }
 0x261   :  { %v823_v27 = vsel %vm820_vm5, %v822_v39, %v818_v37  ;;  %v4633_v40 = vld [vmem:[#allocation3 + $0xf0] sm:$0xff]  ;;  %6353 = vst [vmem:[#allocation29_spill] sm:$0xff] %v4668_v48  ;;  %v4678_v37 = vld [vmem:[#allocation3 + $0x58] sm:$0xff]  ;;  %v4682_v39 = vld [vmem:[#allocation3 + $0x28] sm:$0xff] }
 0x262   :  { %v4639_v19 = vld [vmem:[#allocation3 + $0xd0] sm:$0xff]  ;;  %6356 = vst [vmem:[#allocation36_spill] sm:$0xff] %v4678_v37 }
 0x263   :  { %6345 = vst [vmem:[#allocation27_spill] sm:$0xff] %v4639_v19  ;;  %v4645_v22 = vld [vmem:[#allocation3 + $0xb0] sm:$0xff] }
 0x264   :  { %6346 = vst [vmem:[#allocation16_spill] sm:$0xff] %v4645_v22  ;;  %v4655_v26 = vld [vmem:[#allocation3 + $0x90] sm:$0xff] }
 0x265   :  { %6349 = vst [vmem:[#allocation28_spill] sm:$0xff] %v4655_v26  ;;  %v4665_v38 = vld [vmem:[#allocation3 + $0x70] sm:$0xff] }
 0x266   :  { %v3294_v58 = vpop.eup %3293  ;;  %6352 = vst [vmem:[#allocation35_spill] sm:$0xff] %v4665_v38  ;;  %v4675_v24 = vld [vmem:[#allocation3 + $0x50] sm:$0xff] }
 0x267   :  { %v4577_v47 = vmul.f32 %v3294_v58, %v823_v27  ;;  %6355 = vst [vmem:[#allocation26_spill] sm:$0xff] %v4675_v24  ;;  %v4685_v58 = vld [vmem:[#allocation3 + $0x30] sm:$0xff]  ;;  %v4688_v27 = vld [vmem:[#allocation3 + $0x38] sm:$0xff] }
 0x268   :  { %6357 = vst [vmem:[#allocation30_spill] sm:$0xff] %v4682_v39 }
 0x269   :  { %6344 = vst [vmem:[#allocation33_spill] sm:$0xff] %v4577_v47  ;;  %847 = vmatmul.f32.vlgmr.msrb.gmra.mxu0 %v4577_v47  ;;  %867 = vmatmul.f32.vlgmr.msrb.gmra.mxu1 %v4577_v47 }
 0x26a   :  { %887 = vmatmul.f32.vlgmr.msrb.gmra.mxu2 %v4577_v47  ;;  %907 = vmatmul.f32.vlgmr.msrb.gmra.mxu3 %v4577_v47  ;;  %6358 = vst [vmem:[#allocation41_spill] sm:$0xff] %v4685_v58  ;;  %v4692_v47 = vld [vmem:[#allocation3 + $0x8] sm:$0xff] }
 0x26b   :  { %1127 = vmatpush.msrb.mxu0 %v4427_v55  ;;  %1147 = vmatpush.msrb.mxu1 %v4430_v12  ;;  %6359 = vst [vmem:[#allocation48_spill] sm:$0xff] %v4688_v27 }
 0x26c   :  { %1167 = vmatpush.msrb.mxu2 %v4585_v10  ;;  %1187 = vmatpush.msrb.mxu3 %v4434_v62  ;;  %6360 = vst [vmem:[#allocation40_spill] sm:$0xff] %v4692_v47 }
 0x26d   :  { %1128 = vmatpush.msrb.mxu0 %v4437_v42  ;;  %1148 = vmatpush.msrb.mxu1 %v4440_v4 }
 0x26e   :  { %1168 = vmatpush.msrb.mxu2 %v4591_v56  ;;  %1188 = vmatpush.msrb.mxu3 %v4444_v11 }
 0x26f   :  { %1129 = vmatpush.msrb.mxu0 %v4447_v2  ;;  %1149 = vmatpush.msrb.mxu1 %v4450_v54 }
 0x270   :  { %1169 = vmatpush.msrb.mxu2 %v4597_v44  ;;  %1189 = vmatpush.msrb.mxu3 %v4454_v59 }
 0x271   :  { %1130 = vmatpush.msrb.mxu0 %v4457_v1  ;;  %1150 = vmatpush.msrb.mxu1 %v4460_v57 }
 0x272   :  { %1170 = vmatpush.msrb.mxu2 %v4603_v17  ;;  %1190 = vmatpush.msrb.mxu3 %v4464_v53 }
 0x273   :  { %1131 = vmatpush.msrb.mxu0 %v4467_v5  ;;  %1151 = vmatpush.msrb.mxu1 %v4470_v60 }
 0x274   :  { %1171 = vmatpush.msrb.mxu2 %v4609_v52  ;;  %1191 = vmatpush.msrb.mxu3 %v4474_v31 }
 0x275   :  { %1132 = vmatpush.msrb.mxu0 %v4477_v45  ;;  %1152 = vmatpush.msrb.mxu1 %v4480_v61 }
 0x276   :  { %1172 = vmatpush.msrb.mxu2 %v4615_v49  ;;  %1192 = vmatpush.msrb.mxu3 %v4484_v41 }
 0x277   :  { %1133 = vmatpush.msrb.mxu0 %v4487_v50  ;;  %1153 = vmatpush.msrb.mxu1 %v4490_v63 }
 0x278   :  { %1173 = vmatpush.msrb.mxu2 %v4621_v23  ;;  %1193 = vmatpush.msrb.mxu3 %v4494_v30 }
 0x279   :  { %1134 = vmatpush.msrb.mxu0 %v4497_v0  ;;  %1154 = vmatpush.msrb.mxu1 %v4500_v3 }
 0x27a   :  { %1174 = vmatpush.msrb.mxu2 %v4627_v20  ;;  %1194 = vmatpush.msrb.mxu3 %v4504_v51 }
 0x27b   :  { %1135 = vmatpush.msrb.mxu0 %v4507_v9  ;;  %1155 = vmatpush.msrb.mxu1 %v4510_v6 }
 0x27c   :  { %1175 = vmatpush.msrb.mxu2 %v4633_v40  ;;  %1195 = vmatpush.msrb.mxu3 %v4514_v21 }
 0x27d   :  { %1136 = vmatpush.msrb.mxu0 %v4517_v29  ;;  %1156 = vmatpush.msrb.mxu1 %v4520_v7 }
 0x27e   :  { %1176 = vmatpush.msrb.mxu2 %v4639_v19  ;;  %1196 = vmatpush.msrb.mxu3 %v4524_v43 }
 0x27f   :  { %1137 = vmatpush.msrb.mxu0 %v4527_v35  ;;  %1157 = vmatpush.msrb.mxu1 %v4530_v8 }
 0x280   :  { %1177 = vmatpush.msrb.mxu2 %v4645_v22  ;;  %1197 = vmatpush.msrb.mxu3 %v4648_v28 }
 0x281   :  { %1138 = vmatpush.msrb.mxu0 %v4535_v15  ;;  %1158 = vmatpush.msrb.mxu1 %v4652_v32 }
 0x282   :  { %1178 = vmatpush.msrb.mxu2 %v4655_v26  ;;  %1198 = vmatpush.msrb.mxu3 %v4658_v33  ;;  %v6367_v33 = vld [vmem:[#allocation54_spill] sm:$0xff] }
 0x283   :  { %1139 = vmatpush.msrb.mxu0 %v4541_v18  ;;  %1159 = vmatpush.msrb.mxu1 %v4662_v34  ;;  %v6366_v18 = vld [vmem:[#allocation64_spill] sm:$0xff] }
 0x284   :  { %1179 = vmatpush.msrb.mxu2 %v4665_v38  ;;  %1199 = vmatpush.msrb.mxu3 %v4668_v48 }
 0x285   :  { %1140 = vmatpush.msrb.mxu0 %v4547_v13  ;;  %1160 = vmatpush.msrb.mxu1 %v4672_v36  ;;  %v6365_v36 = vld [vmem:[#allocation13_spill] sm:$0xff] }
 0x286   :  { %1180 = vmatpush.msrb.mxu2 %v4675_v24  ;;  %1200 = vmatpush.msrb.mxu3 %v4678_v37  ;;  %v4695_v37 = vld [vmem:[#allocation3 + $0x10] sm:$0xff] }
 0x287   :  { %1141 = vmatpush.msrb.mxu0 %v4553_v14  ;;  %1161 = vmatpush.msrb.mxu1 %v4682_v39  ;;  %6361 = vst [vmem:[#allocation44_spill] sm:$0xff] %v4695_v37  ;;  %v4698_v14 = vld [vmem:[#allocation3 + $0x18] sm:$0xff]  ;;  %v6364_v24 = vld [vmem:[#allocation59_spill] sm:$0xff] }
 0x288   :  { %1181 = vmatpush.msrb.mxu2 %v4685_v58  ;;  %1201 = vmatpush.msrb.mxu3 %v4688_v27  ;;  %6362 = vst [vmem:[#allocation51_spill] sm:$0xff] %v4698_v14  ;;  %v6363_v58 = vld [vmem:[#allocation46_spill] sm:$0xff]  ;;  %v186_v27 = vadd.f32 %v6365_v36, %v6364_v24 }
 0x289   :  { %1142 = vmatpush.msrb.mxu0 %v4559_v16  ;;  %1162 = vmatpush.msrb.mxu1 %v4692_v47  ;;  %v227_v39 = vadd.f32 %v6363_v58, %v6326_v46 }
 0x28a   :  { %1182 = vmatpush.msrb.mxu2 %v4695_v37  ;;  %1202 = vmatpush.msrb.mxu3 %v4698_v14  ;;  %v309_v37 = vadd.f32 %v6367_v33, %v6366_v18 }
 0x2e6   :  { %v848_v13 = vpop.f32.mrf.mxu0  ;;  %v868_v16 = vpop.f32.mrf.mxu1 }
 0x2e7   :  { %v911_v48 = vadd.f32 %v848_v13, %v186_v27  ;;  %v912_v38 = vadd.f32 %v868_v16, %v227_v39  ;;  %v6368_v16 = vld [vmem:[#allocation65_spill] sm:$0xff] }
 0x2e9   :  { %v3194_v34 = vmul.f32 -1.442695, %v911_v48  ;;  %v3195_v47 = vmul.f32 -1.442695, %v912_v38  ;;  %v6369_v48 = vld [vmem:[#allocation45_spill] sm:$0xff] }
 0x2ea   :  { %v268_v38 = vadd.f32 %v6369_v48, %v6368_v16 }
 0x2eb   :  { %3295 = vpow2.f32 %v3194_v34 }
 0x2ec   :  { %3297 = vpow2.f32 %v3195_v47 }
 0x2ed   :  { %v908_v26 = vpop.f32.mrf.mxu3  ;;  %v888_v36 = vpop.f32.mrf.mxu2 }
 0x2ee   :  { %v914_v32 = vadd.f32 %v908_v26, %v309_v37  ;;  %v913_v27 = vadd.f32 %v888_v36, %v268_v38 }
 0x2f0   :  { %v3196_v14 = vmul.f32 -1.442695, %v914_v32 }
 0x2f1   :  { %v3296_v15 = vpop.eup %3295 }
 0x2f2   :  { %v3298_v28 = vpop.eup %3297  ;;  %v918_v58 = vadd.f32 1.0, %v3296_v15  ;;  %3299 = vpow2.f32 %v3196_v14 }
 0x2f3   :  { %v937_v46 = vadd.f32 1.0, %v3298_v28 }
 0x2f4   :  { %3301 = vrcp.f32 %v918_v58  ;;  %v930_v18 = vand.u32 2147483648, %v918_v58  ;;  %v928_v28 = vand.u32 2147483647, %v918_v58  ;;  %vm924_vm8 = vweird.f32 %v918_v58 }
 0x2f5   :  { %3303 = vrcp.f32 %v937_v46  ;;  %v949_v15 = vand.u32 2147483648, %v937_v46  ;;  %v947_v22 = vand.u32 2147483647, %v937_v46  ;;  %vm943_vm9 = vweird.f32 %v937_v46 }
 0x2f6   :  { %v931_v36 = vor.u32 1.1754944e-38, %v930_v18  ;;  %vm929_vm12 = vcmp.eq.f32.partialorder %v928_v28, 8.507059e+37 }
 0x2f7   :  { %vm948_vm13 = vcmp.eq.f32.partialorder %v947_v22, 8.507059e+37 }
 0x2f8   :  { %v3300_v13 = vpop.eup %3299 }
 0x2f9   :  { %v957_v34 = vadd.f32 1.0, %v3300_v13 }
 0x2fa   :  { %v3302_v39 = vpop.eup %3301 }
 0x2fb   :  { %v3304_v33 = vpop.eup %3303  ;;  %v920_v47 = vmul.f32 %v3302_v39, %v918_v58  ;;  %3305 = vrcp.f32 %v957_v34  ;;  %vm925_vm6 = vweird.f32 %v3302_v39  ;;  %v969_v18 = vand.u32 2147483648, %v957_v34 }
 0x2fc   :  { %v939_v26 = vmul.f32 %v3304_v33, %v937_v46  ;;  %3307 = vtanh.f32 %v913_v27  ;;  %vm944_vm7 = vweird.f32 %v3304_v33  ;;  %vm926_vm10 = vmor %vm924_vm8, %vm925_vm6  ;;  %vm963_vm15 = vweird.f32 %v957_v34 }
 0x2fd   :  { %v921_v32 = vsub.f32 1.0, %v920_v47  ;;  %vm945_vm11 = vmor %vm943_vm9, %vm944_vm7  ;;  %v950_v47 = vor.u32 1.1754944e-38, %v949_v15  ;;  %v970_v15 = vor.u32 1.1754944e-38, %v969_v18  ;;  %v6389_v18 = vld [vmem:[#allocation15_spill] sm:$0xff] }
 0x2fe   :  { %v940_v37 = vsub.f32 1.0, %v939_v26 }
 0x2ff   :  { %v922_v14 = vmul.f32 %v3302_v39, %v921_v32 }
 0x300   :  { %v941_v24 = vmul.f32 %v3304_v33, %v940_v37 }
 0x301   :  { %v3306_v8 = vpop.eup %3305  ;;  %v923_v48 = vadd.f32 %v3302_v39, %v922_v14 }
 0x302   :  { %v942_v13 = vadd.f32 %v3304_v33, %v941_v24  ;;  %v959_v38 = vmul.f32 %v3306_v8, %v957_v34  ;;  %v3308_v27 = vpop.eup %3307  ;;  %vm964_vm14 = vweird.f32 %v3306_v8  ;;  %v967_v24 = vand.u32 2147483647, %v957_v34  ;;  %v6377_v34 = vld [vmem:[#allocation20_spill] sm:$0xff] }
 0x303   :  { %v927_v26 = vsel %vm926_vm10, %v3302_v39, %v923_v48  ;;  %vm965_vm0 = vmor %vm963_vm15, %vm964_vm14  ;;  %v6378_v48 = vld [vmem:[#allocation34_spill] sm:$0xff] }
 0x304   :  { %v932_v16 = vsel %vm929_vm12, %v931_v36, %v927_v26  ;;  %v946_v32 = vsel %vm945_vm11, %v3304_v33, %v942_v13  ;;  %v960_v35 = vsub.f32 1.0, %v959_v38  ;;  %vm968_vm1 = vcmp.eq.f32.partialorder %v967_v24, 8.507059e+37  ;;  %v6379_v36 = vld [vmem:[#allocation28_spill] sm:$0xff]  ;;  %v6380_v13 = vld [vmem:[#allocation18_spill] sm:$0xff]  ;;  %v6383_v26 = vld [vmem:[#allocation35_spill] sm:$0xff] }
 0x305   :  { %v951_v37 = vsel %vm948_vm13, %v950_v47, %v946_v32  ;;  %v974_v43 = vmul.f32 %v3308_v27, %v932_v16  ;;  %v6376_v16 = vld [vmem:[#allocation24_spill] sm:$0xff]  ;;  %v6382_v47 = vld [vmem:[#allocation25_spill] sm:$0xff]  ;;  %v6385_v32 = vld [vmem:[#allocation23_spill] sm:$0xff] }
 0x306   :  { %v973_v19 = vmul.f32 %v951_v37, %v4574_v25  ;;  %v961_v14 = vmul.f32 %v3306_v8, %v960_v35  ;;  %v6372_v35 = vld [vmem:[#allocation31_spill] sm:$0xff]  ;;  %v6374_v25 = vld [vmem:[#allocation14_spill] sm:$0xff]  ;;  %v6381_v38 = vld [vmem:[#allocation32_spill] sm:$0xff] }
 0x307   :  { %v6384_v27 = vld [vmem:[#allocation29_spill] sm:$0xff]  ;;  %v6386_v37 = vld [vmem:[#allocation19_spill] sm:$0xff]  ;;  %v6390_v24 = vld [vmem:[#allocation30_spill] sm:$0xff] }
 0x308   :  { %v4710_v58 = vadd.f32 %v974_v43, %v973_v19  ;;  %v962_v46 = vadd.f32 %v3306_v8, %v961_v14  ;;  %v6371_v43 = vld [vmem:[#allocation27_spill] sm:$0xff]  ;;  %v6375_v19 = vld [vmem:[#allocation16_spill] sm:$0xff]  ;;  %v6387_v14 = vld [vmem:[#allocation26_spill] sm:$0xff] }
 0x30a   :  { %3309 = vtanh.f32 %v4710_v58  ;;  %v966_v39 = vsel %vm965_vm0, %v3306_v8, %v962_v46  ;;  %v6373_v8 = vld [vmem:[#allocation21_spill] sm:$0xff]  ;;  %v6388_v46 = vld [vmem:[#allocation36_spill] sm:$0xff] }
 0x30b   :  { %v971_v33 = vsel %vm968_vm1, %v970_v15, %v966_v39  ;;  %v6391_v39 = vld [vmem:[#allocation41_spill] sm:$0xff]  ;;  %v6392_v15 = vld [vmem:[#allocation48_spill] sm:$0xff] }
 0x310   :  { %v3310_v22 = vpop.eup %3309 }
 0x311   :  { %v4713_v28 = vmul.f32 %v3310_v22, %v971_v33  ;;  %v6393_v22 = vld [vmem:[#allocation22_spill] sm:$0xff]  ;;  %v6394_v33 = vld [vmem:[#allocation40_spill] sm:$0xff] }
 0x313   :  { %6370 = vst [vmem:[#allocation43_spill] sm:$0xff] %v4713_v28  ;;  %995 = vmatmul.f32.vlgmr.msra.gmra.mxu0 %v4713_v28  ;;  %1015 = vmatmul.f32.vlgmr.msra.gmra.mxu1 %v4713_v28 }
 0x314   :  { %1035 = vmatmul.f32.vlgmr.msra.gmra.mxu2 %v4713_v28  ;;  %1055 = vmatmul.f32.vlgmr.msra.gmra.mxu3 %v4713_v28  ;;  %v6395_v28 = vld [vmem:[#allocation44_spill] sm:$0xff] }
 0x315   :  { %1275 = vmatpush.msra.mxu0 %v4427_v55  ;;  %1295 = vmatpush.msra.mxu1 %v4430_v12 }
 0x316   :  { %1315 = vmatpush.msra.mxu2 %v4585_v10  ;;  %1335 = vmatpush.msra.mxu3 %v4434_v62 }
 0x317   :  { %1276 = vmatpush.msra.mxu0 %v4437_v42  ;;  %1296 = vmatpush.msra.mxu1 %v4440_v4 }
 0x318   :  { %1316 = vmatpush.msra.mxu2 %v4591_v56  ;;  %1336 = vmatpush.msra.mxu3 %v4444_v11 }
 0x319   :  { %1277 = vmatpush.msra.mxu0 %v4447_v2  ;;  %1297 = vmatpush.msra.mxu1 %v4450_v54 }
 0x31a   :  { %1317 = vmatpush.msra.mxu2 %v4597_v44  ;;  %1337 = vmatpush.msra.mxu3 %v4454_v59 }
 0x31b   :  { %1278 = vmatpush.msra.mxu0 %v4457_v1  ;;  %1298 = vmatpush.msra.mxu1 %v4460_v57 }
 0x31c   :  { %1318 = vmatpush.msra.mxu2 %v4603_v17  ;;  %1338 = vmatpush.msra.mxu3 %v4464_v53 }
 0x31d   :  { %1279 = vmatpush.msra.mxu0 %v4467_v5  ;;  %1299 = vmatpush.msra.mxu1 %v4470_v60 }
 0x31e   :  { %1319 = vmatpush.msra.mxu2 %v4609_v52  ;;  %1339 = vmatpush.msra.mxu3 %v4474_v31 }
 0x31f   :  { %1280 = vmatpush.msra.mxu0 %v4477_v45  ;;  %1300 = vmatpush.msra.mxu1 %v4480_v61 }
 0x320   :  { %1320 = vmatpush.msra.mxu2 %v4615_v49  ;;  %1340 = vmatpush.msra.mxu3 %v4484_v41 }
 0x321   :  { %1281 = vmatpush.msra.mxu0 %v4487_v50  ;;  %1301 = vmatpush.msra.mxu1 %v4490_v63 }
 0x322   :  { %1321 = vmatpush.msra.mxu2 %v4621_v23  ;;  %1341 = vmatpush.msra.mxu3 %v4494_v30 }
 0x323   :  { %1282 = vmatpush.msra.mxu0 %v4497_v0  ;;  %1302 = vmatpush.msra.mxu1 %v4500_v3 }
 0x324   :  { %1322 = vmatpush.msra.mxu2 %v4627_v20  ;;  %1342 = vmatpush.msra.mxu3 %v4504_v51 }
 0x325   :  { %1283 = vmatpush.msra.mxu0 %v4507_v9  ;;  %1303 = vmatpush.msra.mxu1 %v4510_v6 }
 0x326   :  { %1323 = vmatpush.msra.mxu2 %v4633_v40  ;;  %1343 = vmatpush.msra.mxu3 %v4514_v21 }
 0x327   :  { %1284 = vmatpush.msra.mxu0 %v4517_v29  ;;  %1304 = vmatpush.msra.mxu1 %v4520_v7 }
 0x328   :  { %1324 = vmatpush.msra.mxu2 %v6371_v43  ;;  %1344 = vmatpush.msra.mxu3 %v6372_v35 }
 0x329   :  { %1285 = vmatpush.msra.mxu0 %v6373_v8  ;;  %1305 = vmatpush.msra.mxu1 %v6374_v25 }
 0x32a   :  { %1325 = vmatpush.msra.mxu2 %v6375_v19  ;;  %1345 = vmatpush.msra.mxu3 %v6376_v16 }
 0x32b   :  { %1286 = vmatpush.msra.mxu0 %v6377_v34  ;;  %1306 = vmatpush.msra.mxu1 %v6378_v48 }
 0x32c   :  { %1326 = vmatpush.msra.mxu2 %v6379_v36  ;;  %1346 = vmatpush.msra.mxu3 %v6380_v13  ;;  %v6402_v36 = vld [vmem:[#allocation57_spill] sm:$0xff] }
 0x32d   :  { %1287 = vmatpush.msra.mxu0 %v6381_v38  ;;  %1307 = vmatpush.msra.mxu1 %v6382_v47 }
 0x32e   :  { %1327 = vmatpush.msra.mxu2 %v6383_v26  ;;  %1347 = vmatpush.msra.mxu3 %v6384_v27  ;;  %v6400_v26 = vld [vmem:[#allocation49_spill] sm:$0xff] }
 0x32f   :  { %1288 = vmatpush.msra.mxu0 %v6385_v32  ;;  %1308 = vmatpush.msra.mxu1 %v6386_v37  ;;  %v6396_v32 = vld [vmem:[#allocation51_spill] sm:$0xff] }
 0x330   :  { %1328 = vmatpush.msra.mxu2 %v6387_v14  ;;  %1348 = vmatpush.msra.mxu3 %v6388_v46  ;;  %v6397_v37 = vld [vmem:[#allocation59_spill] sm:$0xff]  ;;  %v6398_v14 = vld [vmem:[#allocation37_spill] sm:$0xff]  ;;  %v6399_v46 = vld [vmem:[#allocation60_spill] sm:$0xff] }
 0x331   :  { %1289 = vmatpush.msra.mxu0 %v6389_v18  ;;  %1309 = vmatpush.msra.mxu1 %v6390_v24  ;;  %v189_v27 = vadd.f32 %v6398_v14, %v6397_v37  ;;  %v230_v18 = vadd.f32 %v6400_v26, %v6399_v46 }
 0x332   :  { %1329 = vmatpush.msra.mxu2 %v6391_v39  ;;  %1349 = vmatpush.msra.mxu3 %v6392_v15 }
 0x333   :  { %1290 = vmatpush.msra.mxu0 %v6393_v22  ;;  %1310 = vmatpush.msra.mxu1 %v6394_v33  ;;  %v6401_v22 = vld [vmem:[#allocation64_spill] sm:$0xff] }
 0x334   :  { %1330 = vmatpush.msra.mxu2 %v6395_v28  ;;  %1350 = vmatpush.msra.mxu3 %v6396_v32  ;;  %v312_v33 = vadd.f32 %v6402_v36, %v6401_v22 }
 0x390   :  { %v996_v47 = vpop.f32.mrf.mxu0  ;;  %v1016_v24 = vpop.f32.mrf.mxu1 }
 0x391   :  { %v1059_v38 = vadd.f32 %v996_v47, %v189_v27  ;;  %v1060_v39 = vadd.f32 %v1016_v24, %v230_v18  ;;  %v6403_v27 = vld [vmem:[#allocation65_spill] sm:$0xff] }
 0x393   :  { %v3197_v13 = vmul.f32 -1.442695, %v1059_v38  ;;  %v3198_v15 = vmul.f32 -1.442695, %v1060_v39  ;;  %v6404_v38 = vld [vmem:[#allocation47_spill] sm:$0xff] }
 0x394   :  { %v271_v18 = vadd.f32 %v6404_v38, %v6403_v27 }
 0x395   :  { %3311 = vpow2.f32 %v3197_v13 }
 0x396   :  { %3313 = vpow2.f32 %v3198_v15 }
 0x397   :  { %v1056_v28 = vpop.f32.mrf.mxu3  ;;  %v1036_v26 = vpop.f32.mrf.mxu2 }
 0x398   :  { %v1062_v48 = vadd.f32 %v1056_v28, %v312_v33  ;;  %v1061_v39 = vadd.f32 %v1036_v26, %v271_v18 }
 0x39a   :  { %v3199_v32 = vmul.f32 -1.442695, %v1062_v48 }
 0x39b   :  { %v3312_v34 = vpop.eup %3311 }
 0x39c   :  { %v3314_v16 = vpop.eup %3313  ;;  %v1066_v14 = vadd.f32 1.0, %v3312_v34  ;;  %3315 = vpow2.f32 %v3199_v32 }
 0x39d   :  { %v1085_v37 = vadd.f32 1.0, %v3314_v16 }
 0x39e   :  { %3317 = vrcp.f32 %v1066_v14  ;;  %v1078_v22 = vand.u32 2147483648, %v1066_v14  ;;  %v1076_v32 = vand.u32 2147483647, %v1066_v14  ;;  %vm1072_vm4 = vweird.f32 %v1066_v14 }
 0x39f   :  { %3319 = vrcp.f32 %v1085_v37  ;;  %v1097_v34 = vand.u32 2147483648, %v1085_v37  ;;  %v1095_v19 = vand.u32 2147483647, %v1085_v37  ;;  %vm1091_vm5 = vweird.f32 %v1085_v37 }
 0x3a0   :  { %v1079_v26 = vor.u32 1.1754944e-38, %v1078_v22  ;;  %vm1077_vm8 = vcmp.eq.f32.partialorder %v1076_v32, 8.507059e+37 }
 0x3a1   :  { %vm1096_vm9 = vcmp.eq.f32.partialorder %v1095_v19, 8.507059e+37 }
 0x3a2   :  { %v3316_v47 = vpop.eup %3315 }
 0x3a3   :  { %v1105_v13 = vadd.f32 1.0, %v3316_v47 }
 0x3a4   :  { %v3318_v24 = vpop.eup %3317 }
 0x3a5   :  { %v3320_v36 = vpop.eup %3319  ;;  %v1068_v15 = vmul.f32 %v3318_v24, %v1066_v14  ;;  %3321 = vrcp.f32 %v1105_v13  ;;  %vm1073_vm2 = vweird.f32 %v3318_v24  ;;  %vm1111_vm11 = vweird.f32 %v1105_v13 }
 0x3a6   :  { %v1087_v28 = vmul.f32 %v3320_v36, %v1085_v37  ;;  %3323 = vtanh.f32 %v1061_v39  ;;  %vm1092_vm3 = vweird.f32 %v3320_v36  ;;  %vm1074_vm6 = vmor %vm1072_vm4, %vm1073_vm2  ;;  %v1115_v22 = vand.u32 2147483647, %v1105_v13 }
 0x3a7   :  { %v1069_v48 = vsub.f32 1.0, %v1068_v15  ;;  %vm1093_vm7 = vmor %vm1091_vm5, %vm1092_vm3  ;;  %v1098_v15 = vor.u32 1.1754944e-38, %v1097_v34 }
 0x3a8   :  { %v1088_v33 = vsub.f32 1.0, %v1087_v28  ;;  %vm1116_vm13 = vcmp.eq.f32.partialorder %v1115_v22, 8.507059e+37 }
 0x3a9   :  { %v1070_v16 = vmul.f32 %v3318_v24, %v1069_v48 }
 0x3aa   :  { %v1089_v46 = vmul.f32 %v3320_v36, %v1088_v33 }
 0x3ab   :  { %v3322_v25 = vpop.eup %3321  ;;  %v1071_v38 = vadd.f32 %v3318_v24, %v1070_v16 }
 0x3ac   :  { %v1090_v47 = vadd.f32 %v3320_v36, %v1089_v46  ;;  %v1107_v18 = vmul.f32 %v3322_v25, %v1105_v13  ;;  %v3324_v39 = vpop.eup %3323  ;;  %vm1112_vm10 = vweird.f32 %v3322_v25  ;;  %v1117_v46 = vand.u32 2147483648, %v1105_v13 }
 0x3ad   :  { %v1075_v28 = vsel %vm1074_vm6, %v3318_v24, %v1071_v38  ;;  %vm1113_vm12 = vmor %vm1111_vm11, %vm1112_vm10 }
 0x3ae   :  { %v1080_v27 = vsel %vm1077_vm8, %v1079_v26, %v1075_v28  ;;  %v1094_v48 = vsel %vm1093_vm7, %v3320_v36, %v1090_v47  ;;  %v1108_v8 = vsub.f32 1.0, %v1107_v18  ;;  %v1118_v34 = vor.u32 1.1754944e-38, %v1117_v46  ;;  %v6437_v28 = vld [vmem:[#allocation65_spill] sm:$0xff] }
 0x3af   :  { %v1099_v33 = vsel %vm1096_vm9, %v1098_v15, %v1094_v48  ;;  %v1122_v35 = vmul.f32 %v3324_v39, %v1080_v27  ;;  %v6438_v39 = vld [vmem:[#allocation50_spill] sm:$0xff] }
 0x3b0   :  { %v1121_v43 = vmul.f32 %v1099_v33, %v4710_v58  ;;  %v1109_v16 = vmul.f32 %v3322_v25, %v1108_v8  ;;  %v6435_v58 = vld [vmem:[#allocation64_spill] sm:$0xff]  ;;  %v274_v48 = vadd.f32 %v6438_v39, %v6437_v28  ;;  %v6439_v39 = vld [vmem:[#allocation39_spill] sm:$0xff] }
 0x3b2   :  { %v4792_v14 = vadd.f32 %v1122_v35, %v1121_v43  ;;  %v1110_v37 = vadd.f32 %v3322_v25, %v1109_v16  ;;  %v6436_v43 = vld [vmem:[#allocation61_spill] sm:$0xff] }
 0x3b3   :  { %v315_v35 = vadd.f32 %v6436_v43, %v6435_v58  ;;  %v1631_v43 = vld [vmem:[#allocation5 + $0x1a0] sm:$0xff] }
 0x3b4   :  { %3325 = vtanh.f32 %v4792_v14  ;;  %v1114_v24 = vsel %vm1113_vm12, %v3322_v25, %v1110_v37 }
 0x3b5   :  { %v1119_v36 = vsel %vm1116_vm13, %v1118_v34, %v1114_v24 }
 0x3ba   :  { %v3326_v19 = vpop.eup %3325 }
 0x3bb   :  { %v4795_v32 = vmul.f32 %v3326_v19, %v1119_v36 }
 0x3bd   :  { %1143 = vmatmul.f32.vlgmr.msrb.gmra.mxu0 %v4795_v32  ;;  %1163 = vmatmul.f32.vlgmr.msrb.gmra.mxu1 %v4795_v32 }
 0x3be   :  { %1183 = vmatmul.f32.vlgmr.msrb.gmra.mxu2 %v4795_v32  ;;  %1203 = vmatmul.f32.vlgmr.msrb.gmra.mxu3 %v4795_v32 }
 0x3bf   :  { %1423 = vmatpush.msrb.mxu0 %v4427_v55  ;;  %1443 = vmatpush.msrb.mxu1 %v4430_v12  ;;  %v6405_v55 = vld [vmem:[#allocation27_spill] sm:$0xff] }
 0x3c0   :  { %1463 = vmatpush.msrb.mxu2 %v4585_v10  ;;  %1483 = vmatpush.msrb.mxu3 %v4434_v62  ;;  %v6406_v12 = vld [vmem:[#allocation31_spill] sm:$0xff]  ;;  %v6407_v62 = vld [vmem:[#allocation21_spill] sm:$0xff]  ;;  %v6433_v10 = vld [vmem:[#allocation60_spill] sm:$0xff] }
 0x3c1   :  { %1424 = vmatpush.msrb.mxu0 %v4437_v42  ;;  %1444 = vmatpush.msrb.mxu1 %v4440_v4  ;;  %v6408_v42 = vld [vmem:[#allocation14_spill] sm:$0xff]  ;;  %v6409_v4 = vld [vmem:[#allocation16_spill] sm:$0xff] }
 0x3c2   :  { %1464 = vmatpush.msrb.mxu2 %v4591_v56  ;;  %1484 = vmatpush.msrb.mxu3 %v4444_v11  ;;  %v6410_v11 = vld [vmem:[#allocation24_spill] sm:$0xff] }
 0x3c3   :  { %1425 = vmatpush.msrb.mxu0 %v4447_v2  ;;  %1445 = vmatpush.msrb.mxu1 %v4450_v54  ;;  %v6411_v2 = vld [vmem:[#allocation20_spill] sm:$0xff]  ;;  %v6412_v54 = vld [vmem:[#allocation34_spill] sm:$0xff] }
 0x3c4   :  { %1465 = vmatpush.msrb.mxu2 %v4597_v44  ;;  %1485 = vmatpush.msrb.mxu3 %v4454_v59  ;;  %v6413_v59 = vld [vmem:[#allocation28_spill] sm:$0xff] }
 0x3c5   :  { %1426 = vmatpush.msrb.mxu0 %v4457_v1  ;;  %1446 = vmatpush.msrb.mxu1 %v4460_v57  ;;  %v6414_v1 = vld [vmem:[#allocation18_spill] sm:$0xff]  ;;  %v6415_v57 = vld [vmem:[#allocation32_spill] sm:$0xff] }
 0x3c6   :  { %1466 = vmatpush.msrb.mxu2 %v4603_v17  ;;  %1486 = vmatpush.msrb.mxu3 %v4464_v53  ;;  %v6416_v53 = vld [vmem:[#allocation25_spill] sm:$0xff]  ;;  %v6434_v56 = vld [vmem:[#allocation52_spill] sm:$0xff] }
 0x3c7   :  { %1427 = vmatpush.msrb.mxu0 %v4467_v5  ;;  %1447 = vmatpush.msrb.mxu1 %v4470_v60  ;;  %v6417_v5 = vld [vmem:[#allocation35_spill] sm:$0xff]  ;;  %v6418_v60 = vld [vmem:[#allocation29_spill] sm:$0xff]  ;;  %v233_v44 = vadd.f32 %v6434_v56, %v6433_v10 }
 0x3c8   :  { %1467 = vmatpush.msrb.mxu2 %v4609_v52  ;;  %1487 = vmatpush.msrb.mxu3 %v4474_v31  ;;  %v6419_v31 = vld [vmem:[#allocation23_spill] sm:$0xff] }
 0x3c9   :  { %1428 = vmatpush.msrb.mxu0 %v4477_v45  ;;  %1448 = vmatpush.msrb.mxu1 %v4480_v61  ;;  %v6420_v45 = vld [vmem:[#allocation19_spill] sm:$0xff]  ;;  %v6421_v61 = vld [vmem:[#allocation26_spill] sm:$0xff] }
 0x3ca   :  { %1468 = vmatpush.msrb.mxu2 %v4615_v49  ;;  %1488 = vmatpush.msrb.mxu3 %v4484_v41  ;;  %v6422_v41 = vld [vmem:[#allocation36_spill] sm:$0xff] }
 0x3cb   :  { %1429 = vmatpush.msrb.mxu0 %v4487_v50  ;;  %1449 = vmatpush.msrb.mxu1 %v4490_v63  ;;  %v6423_v50 = vld [vmem:[#allocation15_spill] sm:$0xff]  ;;  %v6424_v63 = vld [vmem:[#allocation30_spill] sm:$0xff] }
 0x3cc   :  { %1469 = vmatpush.msrb.mxu2 %v4621_v23  ;;  %1489 = vmatpush.msrb.mxu3 %v4494_v30  ;;  %v6425_v30 = vld [vmem:[#allocation41_spill] sm:$0xff] }
 0x3cd   :  { %1430 = vmatpush.msrb.mxu0 %v4497_v0  ;;  %1450 = vmatpush.msrb.mxu1 %v4500_v3  ;;  %v6426_v0 = vld [vmem:[#allocation48_spill] sm:$0xff]  ;;  %v6427_v3 = vld [vmem:[#allocation22_spill] sm:$0xff] }
 0x3ce   :  { %1470 = vmatpush.msrb.mxu2 %v4627_v20  ;;  %1490 = vmatpush.msrb.mxu3 %v4504_v51  ;;  %v6428_v51 = vld [vmem:[#allocation40_spill] sm:$0xff] }
 0x3cf   :  { %1431 = vmatpush.msrb.mxu0 %v4507_v9  ;;  %1451 = vmatpush.msrb.mxu1 %v4510_v6  ;;  %v6429_v9 = vld [vmem:[#allocation44_spill] sm:$0xff]  ;;  %v6430_v6 = vld [vmem:[#allocation51_spill] sm:$0xff] }
 0x3d0   :  { %1471 = vmatpush.msrb.mxu2 %v4633_v40  ;;  %1491 = vmatpush.msrb.mxu3 %v4514_v21  ;;  %v6431_v21 = vld [vmem:[#allocation59_spill] sm:$0xff] }
 0x3d1   :  { %1432 = vmatpush.msrb.mxu0 %v4517_v29  ;;  %1452 = vmatpush.msrb.mxu1 %v4520_v7  ;;  %v6432_v29 = vld [vmem:[#allocation38_spill] sm:$0xff] }
 0x3d2   :  { %1472 = vmatpush.msrb.mxu2 %v6405_v55  ;;  %1492 = vmatpush.msrb.mxu3 %v6406_v12  ;;  %v192_v7 = vadd.f32 %v6432_v29, %v6431_v21 }
 0x3d3   :  { %1433 = vmatpush.msrb.mxu0 %v6407_v62  ;;  %1453 = vmatpush.msrb.mxu1 %v6408_v42 }
 0x3d4   :  { %1473 = vmatpush.msrb.mxu2 %v6409_v4  ;;  %1493 = vmatpush.msrb.mxu3 %v6410_v11 }
 0x3d5   :  { %1434 = vmatpush.msrb.mxu0 %v6411_v2  ;;  %1454 = vmatpush.msrb.mxu1 %v6412_v54 }
 0x3d6   :  { %1474 = vmatpush.msrb.mxu2 %v6413_v59  ;;  %1494 = vmatpush.msrb.mxu3 %v6414_v1 }
 0x3d7   :  { %1435 = vmatpush.msrb.mxu0 %v6415_v57  ;;  %1455 = vmatpush.msrb.mxu1 %v6416_v53 }
 0x3d8   :  { %1475 = vmatpush.msrb.mxu2 %v6417_v5  ;;  %1495 = vmatpush.msrb.mxu3 %v6418_v60 }
 0x3d9   :  { %1436 = vmatpush.msrb.mxu0 %v6419_v31  ;;  %1456 = vmatpush.msrb.mxu1 %v6420_v45 }
 0x3da   :  { %1476 = vmatpush.msrb.mxu2 %v6421_v61  ;;  %1496 = vmatpush.msrb.mxu3 %v6422_v41 }
 0x3db   :  { %1437 = vmatpush.msrb.mxu0 %v6423_v50  ;;  %1457 = vmatpush.msrb.mxu1 %v6424_v63 }
 0x3dc   :  { %1477 = vmatpush.msrb.mxu2 %v6425_v30  ;;  %1497 = vmatpush.msrb.mxu3 %v6426_v0 }
 0x3dd   :  { %1438 = vmatpush.msrb.mxu0 %v6427_v3  ;;  %1458 = vmatpush.msrb.mxu1 %v6428_v51 }
 0x3de   :  { %1478 = vmatpush.msrb.mxu2 %v6429_v9  ;;  %1498 = vmatpush.msrb.mxu3 %v6430_v6 }
 0x43a   :  { %v1144_v17 = vpop.f32.mrf.mxu0  ;;  %v1164_v52 = vpop.f32.mrf.mxu1 }
 0x43b   :  { %v1207_v49 = vadd.f32 %v1144_v17, %v192_v7  ;;  %v1208_v23 = vadd.f32 %v1164_v52, %v233_v44  ;;  %v1640_v44 = vld [vmem:[#allocation5 + $0x1e8] sm:$0xff]  ;;  %v1641_v17 = vld [vmem:[#allocation5 + $0x1f0] sm:$0xff]  ;;  %v1642_v52 = vld [vmem:[#allocation5 + $0x1f8] sm:$0xff] }
 0x43d   :  { %v3200_v20 = vmul.f32 -1.442695, %v1207_v49  ;;  %v3201_v40 = vmul.f32 -1.442695, %v1208_v23  ;;  %v1635_v49 = vld [vmem:[#allocation5 + $0x1c0] sm:$0xff]  ;;  %v1636_v23 = vld [vmem:[#allocation5 + $0x1c8] sm:$0xff] }
 0x43f   :  { %3327 = vpow2.f32 %v3200_v20  ;;  %v1637_v20 = vld [vmem:[#allocation5 + $0x1d0] sm:$0xff] }
 0x440   :  { %3329 = vpow2.f32 %v3201_v40  ;;  %v1638_v40 = vld [vmem:[#allocation5 + $0x1d8] sm:$0xff] }
 0x441   :  { %v1204_v8 = vpop.f32.mrf.mxu3  ;;  %v1184_v18 = vpop.f32.mrf.mxu2 }
 0x442   :  { %v1210_v25 = vadd.f32 %v1204_v8, %v315_v35  ;;  %v1209_v37 = vadd.f32 %v1184_v18, %v274_v48  ;;  %v1632_v35 = vld [vmem:[#allocation5 + $0x1a8] sm:$0xff]  ;;  %v1633_v8 = vld [vmem:[#allocation5 + $0x1b0] sm:$0xff]  ;;  %v195_v48 = vadd.f32 %v6439_v39, %v6431_v21 }
 0x443   :  { %v1624_v18 = vld [vmem:[#allocation5 + $0x168] sm:$0xff] }
 0x444   :  { %v3202_v27 = vmul.f32 -1.442695, %v1210_v25  ;;  %v1634_v25 = vld [vmem:[#allocation5 + $0x1b8] sm:$0xff] }
 0x445   :  { %v3328_v13 = vpop.eup %3327 }
 0x446   :  { %v3330_v38 = vpop.eup %3329  ;;  %v1214_v26 = vadd.f32 1.0, %v3328_v13  ;;  %3331 = vpow2.f32 %v3202_v27  ;;  %v1627_v27 = vld [vmem:[#allocation5 + $0x180] sm:$0xff]  ;;  %v1628_v13 = vld [vmem:[#allocation5 + $0x188] sm:$0xff] }
 0x447   :  { %v1233_v47 = vadd.f32 1.0, %v3330_v38  ;;  %v1629_v38 = vld [vmem:[#allocation5 + $0x190] sm:$0xff] }
 0x448   :  { %3333 = vrcp.f32 %v1214_v26  ;;  %v1226_v36 = vand.u32 2147483648, %v1214_v26  ;;  %v1224_v62 = vand.u32 2147483647, %v1214_v26  ;;  %vm1220_vm0 = vweird.f32 %v1214_v26 }
 0x449   :  { %3335 = vrcp.f32 %v1233_v47  ;;  %v1245_v55 = vand.u32 2147483648, %v1233_v47  ;;  %v1243_v4 = vand.u32 2147483647, %v1233_v47  ;;  %vm1239_vm1 = vweird.f32 %v1233_v47 }
 0x44a   :  { %v1227_v54 = vor.u32 1.1754944e-38, %v1226_v36  ;;  %vm1225_vm4 = vcmp.eq.f32.partialorder %v1224_v62, 8.507059e+37  ;;  %v1615_v62 = vld [vmem:[#allocation5 + $0x120] sm:$0xff] }
 0x44b   :  { %v1246_v57 = vor.u32 1.1754944e-38, %v1245_v55  ;;  %vm1244_vm5 = vcmp.eq.f32.partialorder %v1243_v4, 8.507059e+37  ;;  %v1617_v4 = vld [vmem:[#allocation5 + $0x130] sm:$0xff] }
 0x44c   :  { %v3332_v15 = vpop.eup %3331 }
 0x44d   :  { %v1253_v33 = vadd.f32 1.0, %v3332_v15  ;;  %v1625_v15 = vld [vmem:[#allocation5 + $0x170] sm:$0xff] }
 0x44e   :  { %v3334_v16 = vpop.eup %3333 }
 0x44f   :  { %v3336_v46 = vpop.eup %3335  ;;  %v1216_v22 = vmul.f32 %v3334_v16, %v1214_v26  ;;  %3337 = vrcp.f32 %v1253_v33  ;;  %vm1221_vm14 = vweird.f32 %v3334_v16  ;;  %v1265_v3 = vand.u32 2147483648, %v1253_v33  ;;  %v1630_v26 = vld [vmem:[#allocation5 + $0x198] sm:$0xff] }
 0x450   :  { %v1235_v24 = vmul.f32 %v3336_v46, %v1233_v47  ;;  %3339 = vtanh.f32 %v1209_v37  ;;  %vm1240_vm15 = vweird.f32 %v3336_v46  ;;  %vm1222_vm2 = vmor %vm1220_vm0, %vm1221_vm14  ;;  %vm1259_vm7 = vweird.f32 %v1253_v33  ;;  %v1623_v47 = vld [vmem:[#allocation5 + $0x160] sm:$0xff]  ;;  %v1626_v37 = vld [vmem:[#allocation5 + $0x178] sm:$0xff] }
 0x451   :  { %v1217_v34 = vsub.f32 1.0, %v1216_v22  ;;  %vm1241_vm3 = vmor %vm1239_vm1, %vm1240_vm15  ;;  %v1263_v51 = vand.u32 2147483647, %v1253_v33  ;;  %v1266_v6 = vor.u32 1.1754944e-38, %v1265_v3  ;;  %v1604_v3 = vld [vmem:[#allocation5 + $0xc8] sm:$0xff] }
 0x452   :  { %v1236_v19 = vsub.f32 1.0, %v1235_v24  ;;  %v1619_v24 = vld [vmem:[#allocation5 + $0x140] sm:$0xff] }
 0x453   :  { %v1218_v12 = vmul.f32 %v3334_v16, %v1217_v34  ;;  %vm1264_vm9 = vcmp.eq.f32.partialorder %v1263_v51, 8.507059e+37  ;;  %v1620_v34 = vld [vmem:[#allocation5 + $0x148] sm:$0xff]  ;;  %v1605_v51 = vld [vmem:[#allocation5 + $0xd0] sm:$0xff] }
 0x454   :  { %v1237_v42 = vmul.f32 %v3336_v46, %v1236_v19  ;;  %v1621_v19 = vld [vmem:[#allocation5 + $0x150] sm:$0xff] }
 0x455   :  { %v3338_v11 = vpop.eup %3337  ;;  %v1219_v2 = vadd.f32 %v3334_v16, %v1218_v12  ;;  %v1622_v12 = vld [vmem:[#allocation5 + $0x158] sm:$0xff] }
 0x456   :  { %v1238_v59 = vadd.f32 %v3336_v46, %v1237_v42  ;;  %v1255_v1 = vmul.f32 %v3338_v11, %v1253_v33  ;;  %v3340_v5 = vpop.eup %3339  ;;  %vm1260_vm6 = vweird.f32 %v3338_v11  ;;  %v6440_v33 = vld [vmem:[#allocation55_spill] sm:$0xff]  ;;  %v1616_v42 = vld [vmem:[#allocation5 + $0x128] sm:$0xff] }
 0x457   :  { %v1223_v53 = vsel %vm1222_vm2, %v3334_v16, %v1219_v2  ;;  %vm1261_vm8 = vmor %vm1259_vm7, %vm1260_vm6  ;;  %v236_v16 = vadd.f32 %v6440_v33, %v6433_v10  ;;  %v1585_v33 = vld [vmem:[#allocation5 + $0x30] sm:$0xff] }
 0x458   :  { %v1228_v60 = vsel %vm1225_vm4, %v1227_v54, %v1223_v53  ;;  %v1242_v31 = vsel %vm1241_vm3, %v3336_v46, %v1238_v59  ;;  %v1256_v45 = vsub.f32 1.0, %v1255_v1  ;;  %v1618_v54 = vld [vmem:[#allocation5 + $0x138] sm:$0xff]  ;;  %v1611_v59 = vld [vmem:[#allocation5 + $0x100] sm:$0xff]  ;;  %v1612_v1 = vld [vmem:[#allocation5 + $0x108] sm:$0xff] }
 0x459   :  { %v1247_v61 = vsel %vm1244_vm5, %v1246_v57, %v1242_v31  ;;  %v1270_v41 = vmul.f32 %v3340_v5, %v1228_v60  ;;  %v1613_v57 = vld [vmem:[#allocation5 + $0x110] sm:$0xff]  ;;  %v1614_v53 = vld [vmem:[#allocation5 + $0x118] sm:$0xff]  ;;  %v6441_v5 = vld [vmem:[#allocation62_spill] sm:$0xff] }
 0x45a   :  { %v1269_v50 = vmul.f32 %v1247_v61, %v4792_v14  ;;  %v1257_v63 = vmul.f32 %v3338_v11, %v1256_v45  ;;  %v1639_v14 = vld [vmem:[#allocation5 + $0x1e0] sm:$0xff]  ;;  %v318_v60 = vadd.f32 %v6441_v5, %v6435_v58  ;;  %v1608_v45 = vld [vmem:[#allocation5 + $0xe8] sm:$0xff]  ;;  %v1609_v61 = vld [vmem:[#allocation5 + $0xf0] sm:$0xff] }
 0x45b   :  { %v1607_v31 = vld [vmem:[#allocation5 + $0xe0] sm:$0xff] }
 0x45c   :  { %v4874_v30 = vadd.f32 %v1270_v41, %v1269_v50  ;;  %v1258_v0 = vadd.f32 %v3338_v11, %v1257_v63  ;;  %v1610_v50 = vld [vmem:[#allocation5 + $0xf8] sm:$0xff] }
 0x45e   :  { %3341 = vtanh.f32 %v4874_v30  ;;  %v1262_v9 = vsel %vm1261_vm8, %v3338_v11, %v1258_v0  ;;  %v1603_v0 = vld [vmem:[#allocation5 + $0xc0] sm:$0xff] }
 0x45f   :  { %v1267_v7 = vsel %vm1264_vm9, %v1266_v6, %v1262_v9  ;;  %v1606_v9 = vld [vmem:[#allocation5 + $0xd8] sm:$0xff] }
 0x464   :  { %v3342_v29 = vpop.eup %3341 }
 0x465   :  { %v4877_v56 = vmul.f32 %v3342_v29, %v1267_v7  ;;  %v1599_v29 = vld [vmem:[#allocation5 + $0xa0] sm:$0xff]  ;;  %v1600_v7 = vld [vmem:[#allocation5 + $0xa8] sm:$0xff] }
 0x467   :  { %1291 = vmatmul.f32.vlgmr.msra.gmra.mxu0 %v4877_v56  ;;  %1311 = vmatmul.f32.vlgmr.msra.gmra.mxu1 %v4877_v56 }
 0x468   :  { %1331 = vmatmul.f32.vlgmr.msra.gmra.mxu2 %v4877_v56  ;;  %1351 = vmatmul.f32.vlgmr.msra.gmra.mxu3 %v4877_v56 }
 0x469   :  { %1653 = vmatpush.msra.mxu0 %v1639_v14  ;;  %1694 = vmatpush.msra.mxu1 %v1640_v44  ;;  %v1601_v14 = vld [vmem:[#allocation5 + $0xb0] sm:$0xff] }
 0x46a   :  { %1735 = vmatpush.msra.mxu2 %v1641_v17  ;;  %1776 = vmatpush.msra.mxu3 %v1642_v52  ;;  %v1602_v17 = vld [vmem:[#allocation5 + $0xb8] sm:$0xff]  ;;  %v1595_v52 = vld [vmem:[#allocation5 + $0x80] sm:$0xff] }
 0x46b   :  { %1654 = vmatpush.msra.mxu0 %v1635_v49  ;;  %1695 = vmatpush.msra.mxu1 %v1636_v23  ;;  %v1596_v49 = vld [vmem:[#allocation5 + $0x88] sm:$0xff] }
 0x46c   :  { %1736 = vmatpush.msra.mxu2 %v1637_v20  ;;  %1777 = vmatpush.msra.mxu3 %v1638_v40  ;;  %v1597_v40 = vld [vmem:[#allocation5 + $0x90] sm:$0xff] }
 0x46d   :  { %1655 = vmatpush.msra.mxu0 %v1631_v43  ;;  %1696 = vmatpush.msra.mxu1 %v1632_v35  ;;  %v1598_v43 = vld [vmem:[#allocation5 + $0x98] sm:$0xff] }
 0x46e   :  { %1737 = vmatpush.msra.mxu2 %v1633_v8  ;;  %1778 = vmatpush.msra.mxu3 %v1634_v25  ;;  %v1591_v8 = vld [vmem:[#allocation5 + $0x60] sm:$0xff]  ;;  %v1592_v25 = vld [vmem:[#allocation5 + $0x68] sm:$0xff] }
 0x46f   :  { %1656 = vmatpush.msra.mxu0 %v1627_v27  ;;  %1697 = vmatpush.msra.mxu1 %v1628_v13  ;;  %v1593_v27 = vld [vmem:[#allocation5 + $0x70] sm:$0xff]  ;;  %v1594_v13 = vld [vmem:[#allocation5 + $0x78] sm:$0xff] }
 0x470   :  { %1738 = vmatpush.msra.mxu2 %v1629_v38  ;;  %1779 = vmatpush.msra.mxu3 %v1630_v26  ;;  %v1587_v38 = vld [vmem:[#allocation5 + $0x40] sm:$0xff]  ;;  %v1588_v26 = vld [vmem:[#allocation5 + $0x48] sm:$0xff] }
 0x471   :  { %1657 = vmatpush.msra.mxu0 %v1623_v47  ;;  %1698 = vmatpush.msra.mxu1 %v1624_v18  ;;  %v1589_v47 = vld [vmem:[#allocation5 + $0x50] sm:$0xff]  ;;  %v1590_v18 = vld [vmem:[#allocation5 + $0x58] sm:$0xff] }
 0x472   :  { %1739 = vmatpush.msra.mxu2 %v1625_v15  ;;  %1780 = vmatpush.msra.mxu3 %v1626_v37  ;;  %v1583_v15 = vld [vmem:[#allocation5 + $0x20] sm:$0xff] }
 0x473   :  { %1658 = vmatpush.msra.mxu0 %v1619_v24  ;;  %1699 = vmatpush.msra.mxu1 %v1620_v34  ;;  %v1579_v24 = vld [vmem:[#allocation5] sm:$0xff]  ;;  %v1580_v34 = vld [vmem:[#allocation5 + $0x8] sm:$0xff] }
 0x474   :  { %1740 = vmatpush.msra.mxu2 %v1621_v19  ;;  %1781 = vmatpush.msra.mxu3 %v1622_v12 }
 0x475   :  { %1659 = vmatpush.msra.mxu0 %v1615_v62  ;;  %1700 = vmatpush.msra.mxu1 %v1616_v42 }
 0x476   :  { %1741 = vmatpush.msra.mxu2 %v1617_v4  ;;  %1782 = vmatpush.msra.mxu3 %v1618_v54 }
 0x477   :  { %1660 = vmatpush.msra.mxu0 %v1611_v59  ;;  %1701 = vmatpush.msra.mxu1 %v1612_v1 }
 0x478   :  { %1742 = vmatpush.msra.mxu2 %v1613_v57  ;;  %1783 = vmatpush.msra.mxu3 %v1614_v53 }
 0x479   :  { %1661 = vmatpush.msra.mxu0 %v1607_v31  ;;  %1702 = vmatpush.msra.mxu1 %v1608_v45 }
 0x47a   :  { %1743 = vmatpush.msra.mxu2 %v1609_v61  ;;  %1784 = vmatpush.msra.mxu3 %v1610_v50 }
 0x47b   :  { %1662 = vmatpush.msra.mxu0 %v1603_v0  ;;  %1703 = vmatpush.msra.mxu1 %v1604_v3 }
 0x47c   :  { %1744 = vmatpush.msra.mxu2 %v1605_v51  ;;  %1785 = vmatpush.msra.mxu3 %v1606_v9 }
 0x47d   :  { %1663 = vmatpush.msra.mxu0 %v1599_v29  ;;  %1704 = vmatpush.msra.mxu1 %v1600_v7 }
 0x47e   :  { %1745 = vmatpush.msra.mxu2 %v1601_v14  ;;  %1786 = vmatpush.msra.mxu3 %v1602_v17 }
 0x47f   :  { %1664 = vmatpush.msra.mxu0 %v1595_v52  ;;  %1705 = vmatpush.msra.mxu1 %v1596_v49 }
 0x480   :  { %1746 = vmatpush.msra.mxu2 %v1597_v40  ;;  %1787 = vmatpush.msra.mxu3 %v1598_v43 }
 0x481   :  { %1665 = vmatpush.msra.mxu0 %v1591_v8  ;;  %1706 = vmatpush.msra.mxu1 %v1592_v25  ;;  %v6444_v25 = vld [vmem:[#allocation17_spill] sm:$0xff] }
 0x482   :  { %1747 = vmatpush.msra.mxu2 %v1593_v27  ;;  %1788 = vmatpush.msra.mxu3 %v1594_v13  ;;  %v6445_v27 = vld [vmem:[#allocation33_spill] sm:$0xff] }
 0x483   :  { %1666 = vmatpush.msra.mxu0 %v1587_v38  ;;  %1707 = vmatpush.msra.mxu1 %v1588_v26  ;;  %v4921_v13 = vld [vmem:[#allocation7 + $0x1e0] sm:$0xff]  ;;  %v4923_v38 = vld [vmem:[#allocation7 + $0x1e8] sm:$0xff] }
 0x484   :  { %1748 = vmatpush.msra.mxu2 %v1589_v47  ;;  %1789 = vmatpush.msra.mxu3 %v1590_v18  ;;  %6446 = vst [vmem:[#allocation46_spill] sm:$0xff] %v4921_v13  ;;  %v4925_v26 = vld [vmem:[#allocation7 + $0x1c0] sm:$0xff]  ;;  %v4929_v47 = vld [vmem:[#allocation7 + $0x1c8] sm:$0xff]  ;;  %v4931_v18 = vld [vmem:[#allocation7 + $0x1f8] sm:$0xff] }
 0x485   :  { %1667 = vmatpush.msra.mxu0 %v1583_v15  ;;  %6447 = vst [vmem:[#allocation13_spill] sm:$0xff] %v4929_v47  ;;  %v4934_v15 = vld [vmem:[#allocation7 + $0x1a0] sm:$0xff] }
 0x486   :  { %1749 = vmatpush.msra.mxu2 %v1585_v33  ;;  %v6450_v33 = vld [vmem:[#allocation43_spill] sm:$0xff] }
 0x487   :  { %1668 = vmatpush.msra.mxu0 %v1579_v24  ;;  %v4969_v24 = vld [vmem:[#allocation7 + $0x188] sm:$0xff] }
 0x4e4   :  { %v1292_v46 = vpop.f32.mrf.mxu0  ;;  %v1312_v22 = vpop.f32.mrf.mxu1 }
 0x4e5   :  { %v1355_v36 = vadd.f32 %v1292_v46, %v195_v48  ;;  %v1356_v55 = vadd.f32 %v1312_v22, %v236_v16  ;;  %v1584_v48 = vld [vmem:[#allocation5 + $0x28] sm:$0xff]  ;;  %v1586_v16 = vld [vmem:[#allocation5 + $0x38] sm:$0xff]  ;;  %v6442_v46 = vld [vmem:[#allocation53_spill] sm:$0xff] }
 0x4e6   :  { %v277_v22 = vadd.f32 %v6442_v46, %v6437_v28  ;;  %1708 = vmatpush.msra.mxu1 %v1584_v48  ;;  %1790 = vmatpush.msra.mxu3 %v1586_v16  ;;  %v4938_v48 = vld [vmem:[#allocation7 + $0x1d8] sm:$0xff]  ;;  %v4957_v16 = vld [vmem:[#allocation7 + $0x1f0] sm:$0xff] }
 0x4e7   :  { %v3203_v11 = vmul.f32 -1.442695, %v1355_v36  ;;  %v3204_v2 = vmul.f32 -1.442695, %v1356_v55  ;;  %v1581_v36 = vld [vmem:[#allocation5 + $0x10] sm:$0xff]  ;;  %v1582_v55 = vld [vmem:[#allocation5 + $0x18] sm:$0xff] }
 0x4e8   :  { %1709 = vmatpush.msra.mxu1 %v1580_v34  ;;  %1750 = vmatpush.msra.mxu2 %v1581_v36  ;;  %6449 = vst [vmem:[#allocation45_spill] sm:$0xff] %v4938_v48  ;;  %v4965_v46 = vld [vmem:[#allocation7 + $0x1b0] sm:$0xff]  ;;  %v4977_v34 = vld [vmem:[#allocation7 + $0x168] sm:$0xff] }
 0x4e9   :  { %3343 = vpow2.f32 %v3203_v11  ;;  %1791 = vmatpush.msra.mxu3 %v1582_v55  ;;  %v4981_v36 = vld [vmem:[#allocation7 + $0x190] sm:$0xff]  ;;  %v4987_v55 = vld [vmem:[#allocation7 + $0x178] sm:$0xff] }
 0x4ea   :  { %3345 = vpow2.f32 %v3204_v2 }
 0x4eb   :  { %v1352_v41 = vpop.f32.mrf.mxu3  ;;  %v1332_v39 = vpop.f32.mrf.mxu2 }
 0x4ec   :  { %v1358_v63 = vadd.f32 %v1352_v41, %v318_v60  ;;  %v1357_v62 = vadd.f32 %v1332_v39, %v277_v22  ;;  %v4936_v39 = vld [vmem:[#allocation7 + $0x1a8] sm:$0xff]  ;;  %v4967_v22 = vld [vmem:[#allocation7 + $0x180] sm:$0xff] }
 0x4ed   :  { %6448 = vst [vmem:[#allocation54_spill] sm:$0xff] %v4936_v39 }
 0x4ee   :  { %v3205_v6 = vmul.f32 -1.442695, %v1358_v63  ;;  %6452 = vst [vmem:[#allocation49_spill] sm:$0xff] %v4967_v22 }
 0x4ef   :  { %v3344_v44 = vpop.eup %3343 }
 0x4f0   :  { %v3346_v23 = vpop.eup %3345  ;;  %v4889_v20 = vadd.f32 1.0, %v3344_v44  ;;  %3347 = vpow2.f32 %v3205_v6 }
 0x4f1   :  { %v4891_v35 = vadd.f32 1.0, %v3346_v23 }
 0x4f2   :  { %3349 = vrcp.f32 %v4889_v20  ;;  %v1374_v59 = vand.u32 2147483648, %v4889_v20  ;;  %v1372_v53 = vand.u32 2147483647, %v4889_v20  ;;  %vm1368_vm12 = vweird.f32 %v4889_v20 }
 0x4f3   :  { %3351 = vrcp.f32 %v4891_v35  ;;  %v1393_v1 = vand.u32 2147483648, %v4891_v35  ;;  %v1391_v60 = vand.u32 2147483647, %v4891_v35  ;;  %vm1387_vm13 = vweird.f32 %v4891_v35 }
 0x4f4   :  { %v1375_v61 = vor.u32 1.1754944e-38, %v1374_v59  ;;  %vm1373_vm0 = vcmp.eq.f32.partialorder %v1372_v53, 8.507059e+37  ;;  %v5001_v59 = vld [vmem:[#allocation7 + $0x158] sm:$0xff]  ;;  %v5005_v53 = vld [vmem:[#allocation7 + $0x150] sm:$0xff] }
 0x4f5   :  { %v1394_v63 = vor.u32 1.1754944e-38, %v1393_v1  ;;  %vm1392_vm1 = vcmp.eq.f32.partialorder %v1391_v60, 8.507059e+37 }
 0x4f6   :  { %v3348_v37 = vpop.eup %3347 }
 0x4f7   :  { %v1401_v19 = vadd.f32 1.0, %v3348_v37  ;;  %v4960_v37 = vld [vmem:[#allocation7 + $0x1d0] sm:$0xff] }
 0x4f8   :  { %v3350_v12 = vpop.eup %3349 }
 0x4f9   :  { %v3352_v42 = vpop.eup %3351  ;;  %v1364_v4 = vmul.f32 %v3350_v12, %v4889_v20  ;;  %3353 = vrcp.f32 %v1401_v19  ;;  %vm1369_vm10 = vweird.f32 %v3350_v12  ;;  %v1413_v49 = vand.u32 2147483648, %v1401_v19 }
 0x4fa   :  { %v1383_v11 = vmul.f32 %v3352_v42, %v4891_v35  ;;  %3355 = vtanh.f32 %v1357_v62  ;;  %vm1388_vm11 = vweird.f32 %v3352_v42  ;;  %vm1370_vm14 = vmor %vm1368_vm12, %vm1369_vm10  ;;  %vm1407_vm3 = vweird.f32 %v1401_v19  ;;  %v6453_v62 = vld [vmem:[#allocation42_spill] sm:$0xff] }
 0x4fb   :  { %v1365_v2 = vsub.f32 1.0, %v1364_v4  ;;  %vm1389_vm15 = vmor %vm1387_vm13, %vm1388_vm11  ;;  %v1411_v23 = vand.u32 2147483647, %v1401_v19  ;;  %v1414_v40 = vor.u32 1.1754944e-38, %v1413_v49  ;;  %v6454_v4 = vld [vmem:[#allocation58_spill] sm:$0xff]  ;;  %v5047_v49 = vld [vmem:[#allocation7 + $0xa0] sm:$0xff] }
 0x4fc   :  { %v1384_v54 = vsub.f32 1.0, %v1383_v11  ;;  %v239_v11 = vadd.f32 %v6454_v4, %v6433_v10  ;;  %v5012_v10 = vld [vmem:[#allocation7 + $0x138] sm:$0xff]  ;;  %6457 = vst [vmem:[#allocation47_spill] sm:$0xff] %v5047_v49 }
 0x4fd   :  { %v1366_v57 = vmul.f32 %v3350_v12, %v1365_v2  ;;  %vm1412_vm5 = vcmp.eq.f32.partialorder %v1411_v23, 8.507059e+37  ;;  %v4997_v2 = vld [vmem:[#allocation7 + $0x140] sm:$0xff]  ;;  %v5049_v23 = vld [vmem:[#allocation7 + $0xa8] sm:$0xff] }
 0x4fe   :  { %v1385_v5 = vmul.f32 %v3352_v42, %v1384_v54  ;;  %v4999_v54 = vld [vmem:[#allocation7 + $0x148] sm:$0xff]  ;;  %6458 = vst [vmem:[#allocation27_spill] sm:$0xff] %v5049_v23 }
 0x4ff   :  { %v3354_v31 = vpop.eup %3353  ;;  %v1367_v45 = vadd.f32 %v3350_v12, %v1366_v57 }
 0x500   :  { %v1386_v41 = vadd.f32 %v3352_v42, %v1385_v5  ;;  %v1403_v50 = vmul.f32 %v3354_v31, %v1401_v19  ;;  %v3356_v3 = vpop.eup %3355  ;;  %vm1408_vm2 = vweird.f32 %v3354_v31  ;;  %v4979_v19 = vld [vmem:[#allocation7 + $0x198] sm:$0xff] }
 0x501   :  { %v1371_v0 = vsel %vm1370_vm14, %v3350_v12, %v1367_v45  ;;  %vm1409_vm4 = vmor %vm1407_vm3, %vm1408_vm2  ;;  %v4989_v12 = vld [vmem:[#allocation7 + $0x170] sm:$0xff] }
 0x502   :  { %v1376_v51 = vsel %vm1373_vm0, %v1375_v61, %v1371_v0  ;;  %v1390_v9 = vsel %vm1389_vm15, %v3352_v42, %v1386_v41  ;;  %v1404_v6 = vsub.f32 1.0, %v1403_v50  ;;  %v198_v42 = vadd.f32 %v6453_v62, %v6431_v21  ;;  %v5007_v21 = vld [vmem:[#allocation7 + $0x120] sm:$0xff]  ;;  %v5017_v45 = vld [vmem:[#allocation7 + $0x130] sm:$0xff] }
 0x503   :  { %v1395_v29 = vsel %vm1392_vm1, %v1394_v63, %v1390_v9  ;;  %v1418_v7 = vmul.f32 %v3356_v3, %v1376_v51  ;;  %v5019_v50 = vld [vmem:[#allocation7 + $0x100] sm:$0xff]  ;;  %v5021_v63 = vld [vmem:[#allocation7 + $0x108] sm:$0xff]  ;;  %v5031_v51 = vld [vmem:[#allocation7 + $0x118] sm:$0xff] }
 0x504   :  { %v1417_v14 = vmul.f32 %v1395_v29, %v4874_v30  ;;  %v1405_v44 = vmul.f32 %v3354_v31, %v1404_v6  ;;  %v6443_v30 = vld [vmem:[#allocation66_spill] sm:$0xff]  ;;  %v5027_v0 = vld [vmem:[#allocation7 + $0xe0] sm:$0xff]  ;;  %v5038_v29 = vld [vmem:[#allocation7 + $0xf8] sm:$0xff] }
 0x505   :  { %v5029_v3 = vld [vmem:[#allocation7 + $0xe8] sm:$0xff]  ;;  %v5034_v9 = vld [vmem:[#allocation7 + $0xc0] sm:$0xff] }
 0x506   :  { %v4906_v17 = vadd.f32 %v1418_v7, %v1417_v14  ;;  %v1406_v52 = vadd.f32 %v3354_v31, %v1405_v44  ;;  %v5036_v6 = vld [vmem:[#allocation7 + $0xc8] sm:$0xff]  ;;  %v6455_v7 = vld [vmem:[#allocation63_spill] sm:$0xff]  ;;  %v5044_v44 = vld [vmem:[#allocation7 + $0xd8] sm:$0xff] }
 0x507   :  { %v321_v14 = vadd.f32 %v6455_v7, %v6435_v58  ;;  %6456 = vst [vmem:[#allocation57_spill] sm:$0xff] %v5044_v44  ;;  %v5055_v58 = vld [vmem:[#allocation7 + $0xb8] sm:$0xff]  ;;  %v5073_v62 = vld [vmem:[#allocation7 + $0x60] sm:$0xff] }
 0x508   :  { %3357 = vtanh.f32 %v4906_v17  ;;  %v1410_v20 = vsel %vm1409_vm4, %v3354_v31, %v1406_v52  ;;  %v5009_v31 = vld [vmem:[#allocation7 + $0x128] sm:$0xff]  ;;  %6459 = vst [vmem:[#allocation31_spill] sm:$0xff] %v5055_v58  ;;  %v5101_v7 = vld [vmem:[#allocation7 + $0x20] sm:$0xff] }
 0x509   :  { %v1415_v35 = vsel %vm1412_vm5, %v1414_v40, %v1410_v20  ;;  %v5051_v20 = vld [vmem:[#allocation7 + $0x110] sm:$0xff]  ;;  %6464 = vst [vmem:[#allocation20_spill] sm:$0xff] %v5073_v62 }
 0x50a   :  { %6471 = vst [vmem:[#allocation29_spill] sm:$0xff] %v5101_v7 }
 0x50e   :  { %v3358_v43 = vpop.eup %3357 }
 0x50f   :  { %v1421_v8 = vmul.f32 %v3358_v43, %v1415_v35  ;;  %v5057_v43 = vld [vmem:[#allocation7 + $0xf0] sm:$0xff]  ;;  %v5061_v35 = vld [vmem:[#allocation7 + $0x80] sm:$0xff] }
 0x510   :  { %6460 = vst [vmem:[#allocation21_spill] sm:$0xff] %v5061_v35 }
 0x511   :  { %1439 = vmatmul.f32.vlgmr.msrb.gmra.mxu0 %v1421_v8  ;;  %1459 = vmatmul.f32.vlgmr.msrb.gmra.mxu1 %v1421_v8 }
 0x512   :  { %1479 = vmatmul.f32.vlgmr.msrb.gmra.mxu2 %v1421_v8  ;;  %1499 = vmatmul.f32.vlgmr.msrb.gmra.mxu3 %v1421_v8 }
 0x513   :  { %1881 = vmatpush.msrb.mxu0 %v4921_v13  ;;  %1901 = vmatpush.msrb.mxu1 %v4923_v38 }
 0x514   :  { %1941 = vmatpush.msrb.mxu3 %v4931_v18  ;;  %1921 = vmatpush.msrb.mxu2 %v4957_v16 }
 0x515   :  { %1882 = vmatpush.msrb.mxu0 %v4925_v26  ;;  %1902 = vmatpush.msrb.mxu1 %v4929_v47 }
 0x516   :  { %1942 = vmatpush.msrb.mxu3 %v4938_v48  ;;  %1922 = vmatpush.msrb.mxu2 %v4960_v37 }
 0x517   :  { %1883 = vmatpush.msrb.mxu0 %v4934_v15  ;;  %1903 = vmatpush.msrb.mxu1 %v4936_v39 }
 0x518   :  { %1923 = vmatpush.msrb.mxu2 %v4965_v46 }
 0x519   :  { %1669 = vmatmul.f32.vlgmr.msra.gmra.mxu0 %v6443_v30  ;;  %1710 = vmatmul.f32.vlgmr.msra.gmra.mxu1 %v6443_v30 }
 0x51a   :  { %1751 = vmatmul.f32.vlgmr.msra.gmra.mxu2 %v6443_v30  ;;  %1792 = vmatmul.f32.vlgmr.msra.gmra.mxu3 %v6443_v30 }
 0x51b   :  { %1884 = vmatpush.msrb.mxu0 %v4967_v22  ;;  %1904 = vmatpush.msrb.mxu1 %v4969_v24 }
 0x51c   :  { %1924 = vmatpush.msrb.mxu2 %v4981_v36 }
 0x51d   :  { %1905 = vmatpush.msrb.mxu1 %v4977_v34 }
 0x51e   :  { %1925 = vmatpush.msrb.mxu2 %v4989_v12 }
 0x51f   :  { %1906 = vmatpush.msrb.mxu1 %v4999_v54 }
 0x520   :  { %1926 = vmatpush.msrb.mxu2 %v5005_v53 }
 0x521   :  { %1672 = vmatmul.f32.gmra.mxu0 %v6444_v25  ;;  %1713 = vmatmul.f32.gmra.mxu1 %v6444_v25 }
 0x522   :  { %1754 = vmatmul.f32.gmra.mxu2 %v6444_v25  ;;  %1795 = vmatmul.f32.gmra.mxu3 %v6444_v25  ;;  %v5067_v25 = vld [vmem:[#allocation7 + $0x98] sm:$0xff] }
 0x523   :  { %1907 = vmatpush.msrb.mxu1 %v5009_v31  ;;  %1927 = vmatpush.msrb.mxu2 %v5017_v45  ;;  %6462 = vst [vmem:[#allocation16_spill] sm:$0xff] %v5067_v25 }
 0x525   :  { %1908 = vmatpush.msrb.mxu1 %v5021_v63  ;;  %1928 = vmatpush.msrb.mxu2 %v5051_v20 }
 0x527   :  { %1909 = vmatpush.msrb.mxu1 %v5029_v3  ;;  %1929 = vmatpush.msrb.mxu2 %v5057_v43 }
 0x529   :  { %1675 = vmatmul.f32.gmra.mxu0 %v6445_v27  ;;  %1716 = vmatmul.f32.gmra.mxu1 %v6445_v27 }
 0x52a   :  { %1757 = vmatmul.f32.gmra.mxu2 %v6445_v27  ;;  %1798 = vmatmul.f32.gmra.mxu3 %v6445_v27  ;;  %v5069_v27 = vld [vmem:[#allocation7 + $0xd0] sm:$0xff] }
 0x52b   :  { %1910 = vmatpush.msrb.mxu1 %v5036_v6  ;;  %6463 = vst [vmem:[#allocation24_spill] sm:$0xff] %v5069_v27  ;;  %1930 = vmatpush.msrb.mxu2 %v5069_v27 }
 0x52d   :  { %1911 = vmatpush.msrb.mxu1 %v5049_v23 }
 0x531   :  { %1678 = vmatmul.f32.gmra.mxu0 %v6450_v33  ;;  %1719 = vmatmul.f32.gmra.mxu1 %v6450_v33 }
 0x532   :  { %1760 = vmatmul.f32.gmra.mxu2 %v6450_v33  ;;  %1801 = vmatmul.f32.gmra.mxu3 %v6450_v33 }
 0x539   :  { %1681 = vmatmul.f32.gmra.mxu0 %v4795_v32  ;;  %1722 = vmatmul.f32.gmra.mxu1 %v4795_v32 }
 0x53a   :  { %1763 = vmatmul.f32.gmra.mxu2 %v4795_v32  ;;  %1804 = vmatmul.f32.gmra.mxu3 %v4795_v32  ;;  %v4963_v32 = vld [vmem:[#allocation7 + $0x1b8] sm:$0xff] }
 0x53b   :  { %6451 = vst [vmem:[#allocation37_spill] sm:$0xff] %v4963_v32  ;;  %1943 = vmatpush.msrb.mxu3 %v4963_v32 }
 0x53d   :  { %1944 = vmatpush.msrb.mxu3 %v4979_v19 }
 0x53f   :  { %1945 = vmatpush.msrb.mxu3 %v4987_v55 }
 0x541   :  { %1684 = vmatmul.f32.gmra.mxu0 %v4877_v56  ;;  %1725 = vmatmul.f32.gmra.mxu1 %v4877_v56 }
 0x542   :  { %1766 = vmatmul.f32.gmra.mxu2 %v4877_v56  ;;  %1807 = vmatmul.f32.gmra.mxu3 %v4877_v56  ;;  %v4972_v56 = vld [vmem:[#allocation7 + $0x160] sm:$0xff] }
 0x543   :  { %1885 = vmatpush.msrb.mxu0 %v4972_v56  ;;  %1946 = vmatpush.msrb.mxu3 %v5001_v59 }
 0x545   :  { %1886 = vmatpush.msrb.mxu0 %v4997_v2  ;;  %1947 = vmatpush.msrb.mxu3 %v5012_v10 }
 0x547   :  { %1887 = vmatpush.msrb.mxu0 %v5007_v21  ;;  %1948 = vmatpush.msrb.mxu3 %v5031_v51 }
 0x549   :  { %1687 = vmatmul.f32.gmra.mxu0 %v1421_v8  ;;  %1728 = vmatmul.f32.gmra.mxu1 %v1421_v8 }
 0x54a   :  { %1769 = vmatmul.f32.gmra.mxu2 %v1421_v8  ;;  %1810 = vmatmul.f32.gmra.mxu3 %v1421_v8  ;;  %v5063_v8 = vld [vmem:[#allocation7 + $0x88] sm:$0xff] }
 0x54b   :  { %1888 = vmatpush.msrb.mxu0 %v5019_v50  ;;  %1949 = vmatpush.msrb.mxu3 %v5038_v29  ;;  %6461 = vst [vmem:[#allocation14_spill] sm:$0xff] %v5063_v8 }
 0x54c   :  { %1912 = vmatpush.msrb.mxu1 %v5063_v8 }
 0x54d   :  { %1889 = vmatpush.msrb.mxu0 %v5027_v0  ;;  %1950 = vmatpush.msrb.mxu3 %v5044_v44 }
 0x54f   :  { %1890 = vmatpush.msrb.mxu0 %v5034_v9  ;;  %1951 = vmatpush.msrb.mxu3 %v5055_v58 }
 0x551   :  { %1891 = vmatpush.msrb.mxu0 %v5047_v49  ;;  %1952 = vmatpush.msrb.mxu3 %v5067_v25  ;;  %v5125_v25 = vld [vmem:[#allocation7 + $0x18] sm:$0xff] }
 0x552   :  { %6480 = vst [vmem:[#allocation48_spill] sm:$0xff] %v5125_v25 }
 0x553   :  { %1892 = vmatpush.msrb.mxu0 %v5061_v35 }
 0x555   :  { %1893 = vmatpush.msrb.mxu0 %v5073_v62 }
 0x58e   :  { %v1440_v1 = vpop.f32.mrf.mxu0  ;;  %v1460_v57 = vpop.f32.mrf.mxu1 }
 0x58f   :  { %v1503_v5 = vadd.f32 %v1440_v1, %v198_v42  ;;  %v1504_v60 = vadd.f32 %v1460_v57, %v239_v11  ;;  %v5075_v42 = vld [vmem:[#allocation7 + $0x68] sm:$0xff]  ;;  %v5081_v1 = vld [vmem:[#allocation7 + $0xb0] sm:$0xff]  ;;  %v5083_v57 = vld [vmem:[#allocation7 + $0x78] sm:$0xff] }
 0x590   :  { %6465 = vst [vmem:[#allocation34_spill] sm:$0xff] %v5075_v42  ;;  %1913 = vmatpush.msrb.mxu1 %v5075_v42  ;;  %1931 = vmatpush.msrb.mxu2 %v5081_v1  ;;  %v6477_v42 = vld [vmem:[#allocation56_spill] sm:$0xff] }
 0x591   :  { %v3206_v61 = vmul.f32 -1.442695, %v1503_v5  ;;  %v3207_v41 = vmul.f32 -1.442695, %v1504_v60  ;;  %6466 = vst [vmem:[#allocation28_spill] sm:$0xff] %v5081_v1  ;;  %v5089_v60 = vld [vmem:[#allocation7 + $0x40] sm:$0xff]  ;;  %1953 = vmatpush.msrb.mxu3 %v5083_v57  ;;  %v280_v62 = vadd.f32 %v6477_v42, %v6437_v28 }
 0x592   :  { %6467 = vst [vmem:[#allocation18_spill] sm:$0xff] %v5083_v57  ;;  %1894 = vmatpush.msrb.mxu0 %v5089_v60  ;;  %v5133_v28 = vld [vmem:[#allocation7 + $0x30] sm:$0xff] }
 0x593   :  { %3359 = vpow2.f32 %v3206_v61  ;;  %6468 = vst [vmem:[#allocation32_spill] sm:$0xff] %v5089_v60  ;;  %v5091_v61 = vld [vmem:[#allocation7 + $0x48] sm:$0xff]  ;;  %v5123_v60 = vld [vmem:[#allocation7 + $0x38] sm:$0xff] }
 0x594   :  { %3361 = vpow2.f32 %v3207_v41  ;;  %6469 = vst [vmem:[#allocation25_spill] sm:$0xff] %v5091_v61  ;;  %v5096_v41 = vld [vmem:[#allocation7 + $0x90] sm:$0xff]  ;;  %1914 = vmatpush.msrb.mxu1 %v5091_v61  ;;  %1895 = vmatpush.msrb.mxu0 %v5101_v7 }
 0x595   :  { %v1500_v52 = vpop.f32.mrf.mxu3  ;;  %6470 = vst [vmem:[#allocation35_spill] sm:$0xff] %v5096_v41  ;;  %1932 = vmatpush.msrb.mxu2 %v5096_v41  ;;  %v5121_v61 = vld [vmem:[#allocation7 + $0x50] sm:$0xff] }
 0x596   :  { %v1506_v40 = vadd.f32 %v1500_v52, %v321_v14  ;;  %v5103_v14 = vld [vmem:[#allocation7 + $0x28] sm:$0xff]  ;;  %v5105_v52 = vld [vmem:[#allocation7 + $0x58] sm:$0xff]  ;;  %6478 = vst [vmem:[#allocation30_spill] sm:$0xff] %v5121_v61 }
 0x597   :  { %6472 = vst [vmem:[#allocation23_spill] sm:$0xff] %v5103_v14  ;;  %1954 = vmatpush.msrb.mxu3 %v5105_v52  ;;  %1915 = vmatpush.msrb.mxu1 %v5103_v14 }
 0x598   :  { %v3208_v30 = vmul.f32 -1.442695, %v1506_v40  ;;  %6473 = vst [vmem:[#allocation19_spill] sm:$0xff] %v5105_v52  ;;  %v5109_v40 = vld [vmem:[#allocation7 + $0x70] sm:$0xff] }
 0x599   :  { %v3360_v33 = vpop.eup %3359  ;;  %6474 = vst [vmem:[#allocation26_spill] sm:$0xff] %v5109_v40  ;;  %1933 = vmatpush.msrb.mxu2 %v5109_v40  ;;  %1955 = vmatpush.msrb.mxu3 %v5123_v60 }
 0x59a   :  { %v3362_v4 = vpop.eup %3361  ;;  %v5077_v11 = vadd.f32 1.0, %v3360_v33  ;;  %3363 = vpow2.f32 %v3208_v30  ;;  %v1480_v30 = vpop.f32.mrf.mxu2  ;;  %v5113_v33 = vld [vmem:[#allocation7] sm:$0xff]  ;;  %6479 = vst [vmem:[#allocation41_spill] sm:$0xff] %v5123_v60  ;;  %v5140_v60 = vld [vmem:[#allocation7 + $0x10] sm:$0xff] }
 0x59b   :  { %v5085_v5 = vadd.f32 1.0, %v3362_v4  ;;  %6475 = vst [vmem:[#allocation36_spill] sm:$0xff] %v5113_v33  ;;  %v5115_v4 = vld [vmem:[#allocation7 + $0x8] sm:$0xff]  ;;  %v1505_v8 = vadd.f32 %v1480_v30, %v280_v62  ;;  %1896 = vmatpush.msrb.mxu0 %v5113_v33  ;;  %1934 = vmatpush.msrb.mxu2 %v5121_v61 }
 0x59c   :  { %3365 = vrcp.f32 %v5077_v11  ;;  %6476 = vst [vmem:[#allocation15_spill] sm:$0xff] %v5115_v4  ;;  %1916 = vmatpush.msrb.mxu1 %v5115_v4  ;;  %1956 = vmatpush.msrb.mxu3 %v5125_v25  ;;  %v1522_v4 = vand.u32 2147483648, %v5077_v11  ;;  %vm1516_vm8 = vweird.f32 %v5077_v11 }
 0x59d   :  { %3367 = vrcp.f32 %v5085_v5  ;;  %6481 = vst [vmem:[#allocation22_spill] sm:$0xff] %v5133_v28  ;;  %2029 = vmatpush.msra.mxu0 %v4921_v13  ;;  %1935 = vmatpush.msrb.mxu2 %v5133_v28  ;;  %v1541_v25 = vand.u32 2147483648, %v5085_v5  ;;  %v1520_v13 = vand.u32 2147483647, %v5077_v11  ;;  %vm1535_vm9 = vweird.f32 %v5085_v5 }
 0x59e   :  { %6482 = vst [vmem:[#allocation40_spill] sm:$0xff] %v5140_v60  ;;  %2049 = vmatpush.msra.mxu1 %v4923_v38  ;;  %2089 = vmatpush.msra.mxu3 %v4931_v18 }
 0x59f   :  { %2030 = vmatpush.msra.mxu0 %v4925_v26  ;;  %1936 = vmatpush.msrb.mxu2 %v5140_v60  ;;  %vm1521_vm12 = vcmp.eq.f32.partialorder %v1520_v13, 8.507059e+37 }
 0x5a0   :  { %v3364_v57 = vpop.eup %3363  ;;  %2050 = vmatpush.msra.mxu1 %v4929_v47  ;;  %2090 = vmatpush.msra.mxu3 %v4938_v48 }
 0x5a1   :  { %v5127_v41 = vadd.f32 1.0, %v3364_v57  ;;  %2069 = vmatpush.msra.mxu2 %v4957_v16  ;;  %2031 = vmatpush.msra.mxu0 %v4934_v15 }
 0x5a2   :  { %v3366_v52 = vpop.eup %3365  ;;  %2051 = vmatpush.msra.mxu1 %v4936_v39  ;;  %2091 = vmatpush.msra.mxu3 %v4963_v32 }
 0x5a3   :  { %v3368_v42 = vpop.eup %3367  ;;  %v1512_v14 = vmul.f32 %v3366_v52, %v5077_v11  ;;  %3369 = vrcp.f32 %v5127_v41  ;;  %vm1517_vm6 = vweird.f32 %v3366_v52  ;;  %2070 = vmatpush.msra.mxu2 %v4960_v37  ;;  %2032 = vmatpush.msra.mxu0 %v4967_v22  ;;  %v1542_v11 = vor.u32 1.1754944e-38, %v1541_v25 }
 0x5a4   :  { %v1531_v57 = vmul.f32 %v3368_v42, %v5085_v5  ;;  %3371 = vtanh.f32 %v1505_v8  ;;  %vm1536_vm7 = vweird.f32 %v3368_v42  ;;  %vm1518_vm10 = vmor %vm1516_vm8, %vm1517_vm6  ;;  %2052 = vmatpush.msra.mxu1 %v4969_v24  ;;  %2092 = vmatpush.msra.mxu3 %v4979_v19  ;;  %vm1555_vm15 = vweird.f32 %v5127_v41 }
 0x5a5   :  { %v1513_v62 = vsub.f32 1.0, %v1512_v14  ;;  %vm1537_vm11 = vmor %vm1535_vm9, %vm1536_vm7  ;;  %2071 = vmatpush.msra.mxu2 %v4965_v46  ;;  %2033 = vmatpush.msra.mxu0 %v4972_v56 }
 0x5a6   :  { %v1532_v30 = vsub.f32 1.0, %v1531_v57  ;;  %v1539_v57 = vand.u32 2147483647, %v5085_v5  ;;  %2053 = vmatpush.msra.mxu1 %v4977_v34  ;;  %2093 = vmatpush.msra.mxu3 %v4987_v55 }
 0x5a7   :  { %v1514_v33 = vmul.f32 %v3366_v52, %v1513_v62  ;;  %v1523_v62 = vor.u32 1.1754944e-38, %v1522_v4  ;;  %2072 = vmatpush.msra.mxu2 %v4981_v36  ;;  %2034 = vmatpush.msra.mxu0 %v4997_v2 }
 0x5a8   :  { %v1533_v14 = vmul.f32 %v3368_v42, %v1532_v30  ;;  %vm1540_vm13 = vcmp.eq.f32.partialorder %v1539_v57, 8.507059e+37  ;;  %2054 = vmatpush.msra.mxu1 %v4999_v54  ;;  %2094 = vmatpush.msra.mxu3 %v5001_v59  ;;  %v6483_v57 = vld [vmem:[#allocation14_spill] sm:$0xff] }
 0x5a9   :  { %v5156_v8 = vpop.eup %3369  ;;  %v1515_v47 = vadd.f32 %v3366_v52, %v1514_v33  ;;  %2073 = vmatpush.msra.mxu2 %v4989_v12  ;;  %2035 = vmatpush.msra.mxu0 %v5007_v21 }
 0x5aa   :  { %v1534_v30 = vadd.f32 %v3368_v42, %v1533_v14  ;;  %v1551_v48 = vmul.f32 %v5156_v8, %v5127_v41  ;;  %v3372_v5 = vpop.eup %3371  ;;  %vm1556_vm14 = vweird.f32 %v5156_v8  ;;  %2055 = vmatpush.msra.mxu1 %v5009_v31  ;;  %2095 = vmatpush.msra.mxu3 %v5012_v10 }
 0x5ab   :  { %v1519_v33 = vsel %vm1518_vm10, %v3366_v52, %v1515_v47  ;;  %2074 = vmatpush.msra.mxu2 %v5005_v53  ;;  %2036 = vmatpush.msra.mxu0 %v5019_v50  ;;  %vm1557_vm0 = vmor %vm1555_vm15, %vm1556_vm14 }
 0x5ac   :  { %v1524_v32 = vsel %vm1521_vm12, %v1523_v62, %v1519_v33  ;;  %v1538_v4 = vsel %vm1537_vm11, %v3368_v42, %v1534_v30  ;;  %v1552_v14 = vsub.f32 1.0, %v1551_v48  ;;  %2056 = vmatpush.msra.mxu1 %v5021_v63  ;;  %2096 = vmatpush.msra.mxu3 %v5031_v51  ;;  %v6485_v62 = vld [vmem:[#allocation35_spill] sm:$0xff]  ;;  %v6486_v30 = vld [vmem:[#allocation20_spill] sm:$0xff]  ;;  %v6488_v33 = vld [vmem:[#allocation18_spill] sm:$0xff] }
 0x5ad   :  { %v1543_v39 = vsel %vm1540_vm13, %v1542_v11, %v1538_v4  ;;  %v1566_v22 = vmul.f32 %v3372_v5, %v1524_v32  ;;  %2075 = vmatpush.msra.mxu2 %v5017_v45  ;;  %2037 = vmatpush.msra.mxu0 %v5027_v0  ;;  %v6487_v11 = vld [vmem:[#allocation34_spill] sm:$0xff]  ;;  %v6489_v5 = vld [vmem:[#allocation32_spill] sm:$0xff]  ;;  %v6490_v4 = vld [vmem:[#allocation25_spill] sm:$0xff] }
 0x5ae   :  { %v1565_v13 = vmul.f32 %v1543_v39, %v4906_v17  ;;  %v1553_v47 = vmul.f32 %v5156_v8, %v1552_v14  ;;  %v1561_v17 = vand.u32 2147483648, %v5127_v41  ;;  %v1559_v39 = vand.u32 2147483647, %v5127_v41  ;;  %2057 = vmatpush.msra.mxu1 %v5029_v3  ;;  %2097 = vmatpush.msra.mxu3 %v5038_v29  ;;  %v6491_v14 = vld [vmem:[#allocation19_spill] sm:$0xff] }
 0x5af   :  { %2076 = vmatpush.msra.mxu2 %v5051_v20  ;;  %2038 = vmatpush.msra.mxu0 %v5034_v9 }
 0x5b0   :  { %v1567_v48 = vadd.f32 %v1566_v22, %v1565_v13  ;;  %v1554_v32 = vadd.f32 %v5156_v8, %v1553_v47  ;;  %v1562_v25 = vor.u32 1.1754944e-38, %v1561_v17  ;;  %vm1560_vm1 = vcmp.eq.f32.partialorder %v1559_v39, 8.507059e+37  ;;  %2058 = vmatpush.msra.mxu1 %v5036_v6  ;;  %2098 = vmatpush.msra.mxu3 %v5044_v44  ;;  %v6493_v47 = vld [vmem:[#allocation23_spill] sm:$0xff]  ;;  %v6497_v39 = vld [vmem:[#allocation48_spill] sm:$0xff] }
 0x5b1   :  { %2077 = vmatpush.msra.mxu2 %v5057_v43  ;;  %2039 = vmatpush.msra.mxu0 %v5047_v49  ;;  %v6492_v13 = vmov 0.0   ;;  %v6496_v17 = vld [vmem:[#allocation15_spill] sm:$0xff] }
 0x5b2   :  { %3373 = vtanh.f32 %v1567_v48  ;;  %v1558_v22 = vsel %vm1557_vm0, %v5156_v8, %v1554_v32  ;;  %2059 = vmatpush.msra.mxu1 %v5049_v23  ;;  %2099 = vmatpush.msra.mxu3 %v5055_v58  ;;  %v6484_v8 = vld [vmem:[#allocation16_spill] sm:$0xff]  ;;  %v6494_v48 = vld [vmem:[#allocation41_spill] sm:$0xff] }
 0x5b3   :  { %v1563_v52 = vsel %vm1560_vm1, %v1562_v25, %v1558_v22  ;;  %2078 = vmatpush.msra.mxu2 %v5069_v27  ;;  %2040 = vmatpush.msra.mxu0 %v5061_v35  ;;  %v6495_v32 = vld [vmem:[#allocation36_spill] sm:$0xff]  ;;  %v6498_v22 = vld [vmem:[#allocation46_spill] sm:$0xff]  ;;  %v6499_v25 = vld [vmem:[#allocation13_spill] sm:$0xff] }
 0x5b4   :  { %2060 = vmatpush.msra.mxu1 %v6483_v57  ;;  %2100 = vmatpush.msra.mxu3 %v6484_v8 }
 0x5b5   :  { %2079 = vmatpush.msra.mxu2 %v5081_v1  ;;  %2041 = vmatpush.msra.mxu0 %v6486_v30 }
 0x5b6   :  { %2061 = vmatpush.msra.mxu1 %v6487_v11  ;;  %2101 = vmatpush.msra.mxu3 %v6488_v33 }
 0x5b7   :  { %2080 = vmatpush.msra.mxu2 %v6485_v62  ;;  %2042 = vmatpush.msra.mxu0 %v6489_v5 }
 0x5b8   :  { %v3374_v41 = vpop.eup %3373  ;;  %2062 = vmatpush.msra.mxu1 %v6490_v4  ;;  %2102 = vmatpush.msra.mxu3 %v6491_v14 }
 0x5b9   :  { %v1569_v42 = vmul.f32 %v3374_v41, %v1563_v52  ;;  %2081 = vmatpush.msra.mxu2 %v5109_v40  ;;  %2043 = vmatpush.msra.mxu0 %v5101_v7  ;;  %v6500_v41 = vld [vmem:[#allocation45_spill] sm:$0xff]  ;;  %v6501_v52 = vld [vmem:[#allocation54_spill] sm:$0xff] }
 0x5ba   :  { %2063 = vmatpush.msra.mxu1 %v6493_v47  ;;  %2103 = vmatpush.msra.mxu3 %v6494_v48 }
 0x5bb   :  { %1690 = vmatmul.f32.gmra.mxu0 %v1569_v42  ;;  %1731 = vmatmul.f32.gmra.mxu1 %v1569_v42 }
 0x5bc   :  { %1772 = vmatmul.f32.gmra.mxu2 %v1569_v42  ;;  %1813 = vmatmul.f32.gmra.mxu3 %v1569_v42  ;;  %v6502_v42 = vld [vmem:[#allocation37_spill] sm:$0xff] }
 0x5bd   :  { %2082 = vmatpush.msra.mxu2 %v5121_v61  ;;  %2044 = vmatpush.msra.mxu0 %v6495_v32 }
 0x5be   :  { %2064 = vmatpush.msra.mxu1 %v6496_v17  ;;  %2104 = vmatpush.msra.mxu3 %v6497_v39 }
 0x5bf   :  { %2083 = vmatpush.msra.mxu2 %v5133_v28 }
 0x5c1   :  { %2084 = vmatpush.msra.mxu2 %v5140_v60 }
 0x5c3   :  { %1897 = vmatmul.f32.vlgmr.msrb.gmra.mxu0 %v6492_v13  ;;  %1917 = vmatmul.f32.vlgmr.msrb.gmra.mxu1 %v6492_v13 }
 0x5c4   :  { %1937 = vmatmul.f32.vlgmr.msrb.gmra.mxu2 %v6492_v13  ;;  %1957 = vmatmul.f32.vlgmr.msrb.gmra.mxu3 %v6492_v13  ;;  %v6503_v13 = vld [vmem:[#allocation49_spill] sm:$0xff] }
 0x5c5   :  { %2177 = vmatpush.msrb.mxu0 %v6498_v22  ;;  %2197 = vmatpush.msrb.mxu1 %v4923_v38 }
 0x5c6   :  { %2217 = vmatpush.msrb.mxu2 %v4957_v16  ;;  %2237 = vmatpush.msrb.mxu3 %v4931_v18 }
 0x5c7   :  { %2178 = vmatpush.msrb.mxu0 %v4925_v26  ;;  %2198 = vmatpush.msrb.mxu1 %v6499_v25 }
 0x5c8   :  { %2218 = vmatpush.msrb.mxu2 %v4960_v37  ;;  %2238 = vmatpush.msrb.mxu3 %v6500_v41 }
 0x5c9   :  { %2179 = vmatpush.msrb.mxu0 %v4934_v15  ;;  %2199 = vmatpush.msrb.mxu1 %v6501_v52 }
 0x5ca   :  { %2219 = vmatpush.msrb.mxu2 %v4965_v46  ;;  %2239 = vmatpush.msrb.mxu3 %v6502_v42 }
 0x5cb   :  { %2180 = vmatpush.msrb.mxu0 %v6503_v13  ;;  %2200 = vmatpush.msrb.mxu1 %v4969_v24 }
 0x5cc   :  { %2220 = vmatpush.msrb.mxu2 %v4981_v36  ;;  %2240 = vmatpush.msrb.mxu3 %v4979_v19 }
 0x5cd   :  { %2181 = vmatpush.msrb.mxu0 %v4972_v56  ;;  %2201 = vmatpush.msrb.mxu1 %v4977_v34 }
 0x5ce   :  { %2221 = vmatpush.msrb.mxu2 %v4989_v12  ;;  %2241 = vmatpush.msrb.mxu3 %v4987_v55 }
 0x5cf   :  { %2182 = vmatpush.msrb.mxu0 %v4997_v2  ;;  %2202 = vmatpush.msrb.mxu1 %v4999_v54 }
 0x5d0   :  { %2222 = vmatpush.msrb.mxu2 %v5005_v53  ;;  %2242 = vmatpush.msrb.mxu3 %v5001_v59 }
 0x5d1   :  { %2183 = vmatpush.msrb.mxu0 %v5007_v21  ;;  %2203 = vmatpush.msrb.mxu1 %v5009_v31 }
 0x5d2   :  { %2223 = vmatpush.msrb.mxu2 %v5017_v45  ;;  %2243 = vmatpush.msrb.mxu3 %v5012_v10 }
 0x5d3   :  { %2184 = vmatpush.msrb.mxu0 %v5019_v50  ;;  %2204 = vmatpush.msrb.mxu1 %v5021_v63 }
 0x5d4   :  { %2224 = vmatpush.msrb.mxu2 %v5051_v20  ;;  %2244 = vmatpush.msrb.mxu3 %v5031_v51 }
 0x5d5   :  { %2185 = vmatpush.msrb.mxu0 %v5027_v0  ;;  %2205 = vmatpush.msrb.mxu1 %v5029_v3 }
 0x5d6   :  { %2225 = vmatpush.msrb.mxu2 %v5057_v43  ;;  %2245 = vmatpush.msrb.mxu3 %v5038_v29 }
 0x5d7   :  { %2186 = vmatpush.msrb.mxu0 %v5034_v9  ;;  %2206 = vmatpush.msrb.mxu1 %v5036_v6 }
 0x5d8   :  { %2226 = vmatpush.msrb.mxu2 %v5069_v27  ;;  %2246 = vmatpush.msrb.mxu3 %v5044_v44 }
 0x5d9   :  { %2187 = vmatpush.msrb.mxu0 %v5047_v49  ;;  %2207 = vmatpush.msrb.mxu1 %v5049_v23 }
 0x5da   :  { %2227 = vmatpush.msrb.mxu2 %v5081_v1  ;;  %2247 = vmatpush.msrb.mxu3 %v5055_v58 }
 0x5db   :  { %2188 = vmatpush.msrb.mxu0 %v5061_v35  ;;  %2208 = vmatpush.msrb.mxu1 %v6483_v57 }
 0x5dc   :  { %2228 = vmatpush.msrb.mxu2 %v6485_v62  ;;  %2248 = vmatpush.msrb.mxu3 %v6484_v8 }
 0x5dd   :  { %2189 = vmatpush.msrb.mxu0 %v6486_v30  ;;  %2209 = vmatpush.msrb.mxu1 %v6487_v11 }
 0x5de   :  { %2229 = vmatpush.msrb.mxu2 %v5109_v40  ;;  %2249 = vmatpush.msrb.mxu3 %v6488_v33 }
 0x5df   :  { %2190 = vmatpush.msrb.mxu0 %v6489_v5  ;;  %2210 = vmatpush.msrb.mxu1 %v6490_v4  ;;  %v1670_v4 = vpop.f32.mrf.mxu0  ;;  %v1793_v5 = vpop.f32.mrf.mxu3 }
 0x5e0   :  { %2230 = vmatpush.msrb.mxu2 %v5121_v61  ;;  %2250 = vmatpush.msrb.mxu3 %v6491_v14  ;;  %v1711_v61 = vpop.f32.mrf.mxu1 }
 0x5e1   :  { %2191 = vmatpush.msrb.mxu0 %v5101_v7  ;;  %2211 = vmatpush.msrb.mxu1 %v6493_v47  ;;  %v1752_v47 = vpop.f32.mrf.mxu2 }
 0x5e2   :  { %2231 = vmatpush.msrb.mxu2 %v5133_v28  ;;  %2251 = vmatpush.msrb.mxu3 %v6494_v48 }
 0x5e3   :  { %2192 = vmatpush.msrb.mxu0 %v6495_v32  ;;  %2212 = vmatpush.msrb.mxu1 %v6496_v17 }
 0x5e4   :  { %2232 = vmatpush.msrb.mxu2 %v5140_v60  ;;  %2252 = vmatpush.msrb.mxu3 %v6497_v39 }
 0x5e7   :  { %v5296_v14 = vpop.f32.mrf.mxu0  ;;  %v5300_v33 = vpop.f32.mrf.mxu3 }
 0x5e8   :  { %6504 = vst [vmem:[#allocation44_spill] sm:$0xff] %v5296_v14  ;;  %v5298_v7 = vpop.f32.mrf.mxu1 }
 0x5e9   :  { %6505 = vst [vmem:[#allocation51_spill] sm:$0xff] %v5298_v7  ;;  %v5306_v32 = vpop.f32.mrf.mxu2 }
 0x5ea   :  { %6506 = vst [vmem:[#allocation59_spill] sm:$0xff] %v5300_v33 }
 0x5eb   :  { %6509 = vst [vmem:[#allocation52_spill] sm:$0xff] %v5306_v32 }
 0x5ef   :  { %v5302_v28 = vpop.f32.mrf.mxu0  ;;  %v5308_v17 = vpop.f32.mrf.mxu3 }
 0x5f0   :  { %6507 = vst [vmem:[#allocation38_spill] sm:$0xff] %v5302_v28  ;;  %v5304_v48 = vpop.f32.mrf.mxu1 }
 0x5f1   :  { %6508 = vst [vmem:[#allocation60_spill] sm:$0xff] %v5304_v48  ;;  %v5314_v40 = vpop.f32.mrf.mxu2 }
 0x5f2   :  { %6510 = vst [vmem:[#allocation64_spill] sm:$0xff] %v5308_v17 }
 0x5f3   :  { %6513 = vst [vmem:[#allocation50_spill] sm:$0xff] %v5314_v40 }
 0x5f7   :  { %v5310_v60 = vpop.f32.mrf.mxu0  ;;  %v5316_v14 = vpop.f32.mrf.mxu3 }
 0x5f8   :  { %6511 = vst [vmem:[#allocation61_spill] sm:$0xff] %v5310_v60  ;;  %v5312_v39 = vpop.f32.mrf.mxu1 }
 0x5f9   :  { %6512 = vst [vmem:[#allocation65_spill] sm:$0xff] %v5312_v39  ;;  %v5322_v33 = vpop.f32.mrf.mxu2 }
 0x5fa   :  { %6514 = vst [vmem:[#allocation39_spill] sm:$0xff] %v5316_v14 }
 0x5fb   :  { %6517 = vst [vmem:[#allocation53_spill] sm:$0xff] %v5322_v33 }
 0x5ff   :  { %v5318_v7 = vpop.f32.mrf.mxu0  ;;  %v5324_v28 = vpop.f32.mrf.mxu3 }
 0x600   :  { %6515 = vst [vmem:[#allocation55_spill] sm:$0xff] %v5318_v7  ;;  %v5320_v11 = vpop.f32.mrf.mxu1 }
 0x601   :  { %6516 = vst [vmem:[#allocation62_spill] sm:$0xff] %v5320_v11  ;;  %v5330_v17 = vpop.f32.mrf.mxu2 }
 0x602   :  { %6518 = vst [vmem:[#allocation66_spill] sm:$0xff] %v5324_v28  ;;  %v1643_v28 = vld [vmem:[%s5984_s6] sm:$0xf] }
 0x603   :  { %6521 = vst [vmem:[#allocation43_spill] sm:$0xff] %v5330_v17  ;;  %v5351_v17 = vperm.slane %v1643_v28, 1  ;;  %v5359_v62 = vperm.slane %v1643_v28, 3 }
 0x605   :  { %6530 = vst [vmem:[#allocation37_spill] sm:$0xff] %v5351_v17  ;;  %v1794_v57 = vadd.f32 %v1793_v5, %v5359_v62 }
 0x606   :  { %6533 = vst [vmem:[#allocation68_spill] sm:$0xff] %v5359_v62 }
 0x607   :  { %v5326_v48 = vpop.f32.mrf.mxu0  ;;  %v5332_v60 = vpop.f32.mrf.mxu3 }
 0x608   :  { %6519 = vst [vmem:[#allocation17_spill] sm:$0xff] %v5326_v48  ;;  %v5328_v32 = vpop.f32.mrf.mxu1 }
 0x609   :  { %6520 = vst [vmem:[#allocation33_spill] sm:$0xff] %v5328_v32  ;;  %v5338_v14 = vpop.f32.mrf.mxu2  ;;  %v5349_v32 = vperm.slane %v1643_v28, 0 }
 0x60a   :  { %6522 = vst [vmem:[#allocation42_spill] sm:$0xff] %v5332_v60 }
 0x60b   :  { %6525 = vst [vmem:[#allocation56_spill] sm:$0xff] %v5338_v14 }
 0x60c   :  { %6529 = vst [vmem:[#allocation54_spill] sm:$0xff] %v5349_v32 }
 0x60f   :  { %v5334_v39 = vpop.f32.mrf.mxu0  ;;  %v5340_v7 = vpop.f32.mrf.mxu3 }
 0x610   :  { %6523 = vst [vmem:[#allocation58_spill] sm:$0xff] %v5334_v39  ;;  %v5336_v40 = vpop.f32.mrf.mxu1  ;;  %v1671_v39 = vadd.f32 %v1670_v4, %v5349_v32 }
 0x611   :  { %6524 = vst [vmem:[#allocation63_spill] sm:$0xff] %v5336_v40  ;;  %v1712_v40 = vadd.f32 %v1711_v61, %v5351_v17  ;;  %v5355_v60 = vpop.f32.mrf.mxu2 }
 0x612   :  { %6526 = vst [vmem:[#allocation46_spill] sm:$0xff] %v5340_v7 }
 0x613   :  { %6531 = vst [vmem:[#allocation49_spill] sm:$0xff] %v5355_v60 }
 0x638   :  { %v5345_v11 = vpop.f32.mrf.mxu0  ;;  %v5347_v48 = vpop.f32.mrf.mxu1 }
 0x639   :  { %6527 = vst [vmem:[#allocation13_spill] sm:$0xff] %v5345_v11 }
 0x63a   :  { %6528 = vst [vmem:[#allocation45_spill] sm:$0xff] %v5347_v48 }
 0x63f   :  { %v5357_v14 = vpop.f32.mrf.mxu3  ;;  %v5362_v35 = vpop.f32.mrf.mxu2 }
 0x640   :  { %6532 = vst [vmem:[#allocation67_spill] sm:$0xff] %v5357_v14  ;;  %v1898_v7 = vpop.f32.mrf.mxu0  ;;  %v1918_v33 = vpop.f32.mrf.mxu1 }
 0x641   :  { %v1961_v30 = vadd.f32 %v1898_v7, %v1671_v39  ;;  %v1962_v8 = vadd.f32 %v1918_v33, %v1712_v40  ;;  %6534 = vst [vmem:[#allocation69_spill] sm:$0xff] %v5362_v35  ;;  %v5364_v7 = vperm.slane %v1643_v28, 2 }
 0x643   :  { %v3209_v11 = vmul.f32 -1.442695, %v1961_v30  ;;  %v3210_v48 = vmul.f32 -1.442695, %v1962_v8  ;;  %6535 = vst [vmem:[#allocation70_spill] sm:$0xff] %v5364_v7  ;;  %v1753_v30 = vadd.f32 %v1752_v47, %v5364_v7 }
 0x645   :  { %3375 = vpow2.f32 %v3209_v11 }
 0x646   :  { %3377 = vpow2.f32 %v3210_v48 }
 0x647   :  { %v1958_v4 = vpop.f32.mrf.mxu3  ;;  %v1938_v40 = vpop.f32.mrf.mxu2 }
 0x648   :  { %v1964_v61 = vadd.f32 %v1958_v4, %v1794_v57  ;;  %v1963_v5 = vadd.f32 %v1938_v40, %v1753_v30 }
 0x64a   :  { %v3211_v17 = vmul.f32 -1.442695, %v1964_v61 }
 0x64b   :  { %v3376_v60 = vpop.eup %3375 }
 0x64c   :  { %v3378_v32 = vpop.eup %3377  ;;  %v1968_v14 = vadd.f32 1.0, %v3376_v60  ;;  %3379 = vpow2.f32 %v3211_v17 }
 0x64d   :  { %v1987_v58 = vadd.f32 1.0, %v3378_v32 }
 0x64e   :  { %3381 = vrcp.f32 %v1968_v14  ;;  %v1980_v60 = vand.u32 2147483648, %v1968_v14  ;;  %v1978_v17 = vand.u32 2147483647, %v1968_v14  ;;  %vm1974_vm4 = vweird.f32 %v1968_v14 }
 0x64f   :  { %3383 = vrcp.f32 %v1987_v58  ;;  %v1999_v32 = vand.u32 2147483648, %v1987_v58  ;;  %v1997_v62 = vand.u32 2147483647, %v1987_v58  ;;  %vm1993_vm5 = vweird.f32 %v1987_v58 }
 0x650   :  { %v1981_v40 = vor.u32 1.1754944e-38, %v1980_v60  ;;  %vm1979_vm7 = vcmp.eq.f32.partialorder %v1978_v17, 8.507059e+37 }
 0x651   :  { %v2000_v7 = vor.u32 1.1754944e-38, %v1999_v32  ;;  %vm1998_vm9 = vcmp.eq.f32.partialorder %v1997_v62, 8.507059e+37 }
 0x652   :  { %v3380_v8 = vpop.eup %3379 }
 0x653   :  { %v2007_v11 = vadd.f32 1.0, %v3380_v8 }
 0x654   :  { %v3382_v33 = vpop.eup %3381 }
 0x655   :  { %v3384_v48 = vpop.eup %3383  ;;  %v1970_v39 = vmul.f32 %v3382_v33, %v1968_v14  ;;  %3385 = vrcp.f32 %v2007_v11  ;;  %vm1975_vm2 = vweird.f32 %v3382_v33  ;;  %vm2013_vm11 = vweird.f32 %v2007_v11 }
 0x656   :  { %v1989_v57 = vmul.f32 %v3384_v48, %v1987_v58  ;;  %3387 = vtanh.f32 %v1963_v5  ;;  %vm1994_vm3 = vweird.f32 %v3384_v48  ;;  %vm1976_vm6 = vmor %vm1974_vm4, %vm1975_vm2  ;;  %v2017_v14 = vand.u32 2147483647, %v2007_v11 }
 0x657   :  { %v1971_v4 = vsub.f32 1.0, %v1970_v39  ;;  %vm1995_vm8 = vmor %vm1993_vm5, %vm1994_vm3 }
 0x658   :  { %v1990_v61 = vsub.f32 1.0, %v1989_v57  ;;  %vm2018_vm13 = vcmp.eq.f32.partialorder %v2017_v14, 8.507059e+37 }
 0x659   :  { %v1972_v28 = vmul.f32 %v3382_v33, %v1971_v4 }
 0x65a   :  { %v1991_v35 = vmul.f32 %v3384_v48, %v1990_v61 }
 0x65b   :  { %v3386_v1 = vpop.eup %3385  ;;  %v1973_v47 = vadd.f32 %v3382_v33, %v1972_v28 }
 0x65c   :  { %v1992_v8 = vadd.f32 %v3384_v48, %v1991_v35  ;;  %v2009_v30 = vmul.f32 %v3386_v1, %v2007_v11  ;;  %v3388_v5 = vpop.eup %3387  ;;  %vm2014_vm10 = vweird.f32 %v3386_v1  ;;  %v2019_v35 = vand.u32 2147483648, %v2007_v11 }
 0x65d   :  { %v1977_v39 = vsel %vm1976_vm6, %v3382_v33, %v1973_v47  ;;  %vm2015_vm12 = vmor %vm2013_vm11, %vm2014_vm10 }
 0x65e   :  { %v1982_v57 = vsel %vm1979_vm7, %v1981_v40, %v1977_v39  ;;  %v1996_v4 = vsel %vm1995_vm8, %v3384_v48, %v1992_v8  ;;  %v2010_v23 = vsub.f32 1.0, %v2009_v30  ;;  %v2020_v60 = vor.u32 1.1754944e-38, %v2019_v35  ;;  %v6569_v39 = vld [vmem:[#allocation70_spill] sm:$0xff] }
 0x65f   :  { %v2001_v61 = vsel %vm1998_vm9, %v2000_v7, %v1996_v4  ;;  %v2024_v49 = vmul.f32 %v3388_v5, %v1982_v57  ;;  %v6570_v5 = vld [vmem:[#allocation52_spill] sm:$0xff] }
 0x660   :  { %v2023_v44 = vmul.f32 0.0, %v2001_v61  ;;  %v2011_v27 = vmul.f32 %v3386_v1, %v2010_v23  ;;  %v1756_v57 = vadd.f32 %v6570_v5, %v6569_v39  ;;  %v5512_v5 = vld [vmem:[#allocation7 + $0x170] sm:$0xff] }
 0x662   :  { %v5367_v28 = vadd.f32 %v2024_v49, %v2023_v44  ;;  %v2012_v58 = vadd.f32 %v3386_v1, %v2011_v27  ;;  %v6566_v44 = vld [vmem:[#allocation51_spill] sm:$0xff] }
 0x664   :  { %3389 = vtanh.f32 %v5367_v28  ;;  %v2016_v33 = vsel %vm2015_vm12, %v3386_v1, %v2012_v58 }
 0x665   :  { %v2021_v62 = vsel %vm2018_vm13, %v2020_v60, %v2016_v33 }
 0x66a   :  { %v3390_v48 = vpop.eup %3389 }
 0x66b   :  { %v5370_v32 = vmul.f32 %v3390_v48, %v2021_v62 }
 0x66d   :  { %6536 = vst [vmem:[#allocation71_spill] sm:$0xff] %v5370_v32  ;;  %2045 = vmatmul.f32.vlgmr.msra.gmra.mxu0 %v5370_v32  ;;  %2065 = vmatmul.f32.vlgmr.msra.gmra.mxu1 %v5370_v32 }
 0x66e   :  { %2085 = vmatmul.f32.vlgmr.msra.gmra.mxu2 %v5370_v32  ;;  %2105 = vmatmul.f32.vlgmr.msra.gmra.mxu3 %v5370_v32  ;;  %v5629_v32 = vld [vmem:[#allocation7 + $0x28] sm:$0xff] }
 0x66f   :  { %2325 = vmatpush.msra.mxu0 %v6498_v22  ;;  %2345 = vmatpush.msra.mxu1 %v4923_v38  ;;  %v6537_v38 = vld [vmem:[#allocation24_spill] sm:$0xff] }
 0x670   :  { %2365 = vmatpush.msra.mxu2 %v4957_v16  ;;  %2385 = vmatpush.msra.mxu3 %v4931_v18  ;;  %v6539_v18 = vld [vmem:[#allocation47_spill] sm:$0xff]  ;;  %v6541_v16 = vld [vmem:[#allocation28_spill] sm:$0xff] }
 0x671   :  { %2326 = vmatpush.msra.mxu0 %v4925_v26  ;;  %2346 = vmatpush.msra.mxu1 %v6499_v25  ;;  %v6538_v26 = vld [vmem:[#allocation57_spill] sm:$0xff]  ;;  %v6567_v25 = vld [vmem:[#allocation68_spill] sm:$0xff] }
 0x672   :  { %2366 = vmatpush.msra.mxu2 %v4960_v37  ;;  %2386 = vmatpush.msra.mxu3 %v6500_v41  ;;  %v6542_v37 = vld [vmem:[#allocation31_spill] sm:$0xff] }
 0x673   :  { %2327 = vmatpush.msra.mxu0 %v4934_v15  ;;  %2347 = vmatpush.msra.mxu1 %v6501_v52  ;;  %v6540_v15 = vld [vmem:[#allocation27_spill] sm:$0xff] }
 0x674   :  { %2367 = vmatpush.msra.mxu2 %v4965_v46  ;;  %2387 = vmatpush.msra.mxu3 %v6502_v42  ;;  %v6543_v46 = vld [vmem:[#allocation21_spill] sm:$0xff]  ;;  %v6568_v41 = vld [vmem:[#allocation59_spill] sm:$0xff] }
 0x675   :  { %2328 = vmatpush.msra.mxu0 %v6503_v13  ;;  %2348 = vmatpush.msra.mxu1 %v4969_v24  ;;  %v6544_v24 = vld [vmem:[#allocation14_spill] sm:$0xff]  ;;  %v1797_v52 = vadd.f32 %v6568_v41, %v6567_v25  ;;  %v5479_v41 = vld [vmem:[#allocation7 + $0x1d8] sm:$0xff] }
 0x676   :  { %2368 = vmatpush.msra.mxu2 %v4981_v36  ;;  %2388 = vmatpush.msra.mxu3 %v4979_v19  ;;  %v6547_v19 = vld [vmem:[#allocation20_spill] sm:$0xff]  ;;  %v6548_v36 = vld [vmem:[#allocation34_spill] sm:$0xff] }
 0x677   :  { %2329 = vmatpush.msra.mxu0 %v4972_v56  ;;  %2349 = vmatpush.msra.mxu1 %v4977_v34  ;;  %v6545_v56 = vld [vmem:[#allocation35_spill] sm:$0xff]  ;;  %v6546_v34 = vld [vmem:[#allocation16_spill] sm:$0xff] }
 0x678   :  { %2369 = vmatpush.msra.mxu2 %v4989_v12  ;;  %2389 = vmatpush.msra.mxu3 %v4987_v55  ;;  %v6549_v55 = vld [vmem:[#allocation26_spill] sm:$0xff] }
 0x679   :  { %2330 = vmatpush.msra.mxu0 %v4997_v2  ;;  %2350 = vmatpush.msra.mxu1 %v4999_v54  ;;  %v6550_v12 = vld [vmem:[#allocation18_spill] sm:$0xff]  ;;  %v6551_v2 = vld [vmem:[#allocation32_spill] sm:$0xff]  ;;  %v6552_v54 = vld [vmem:[#allocation25_spill] sm:$0xff] }
 0x67a   :  { %2370 = vmatpush.msra.mxu2 %v5005_v53  ;;  %2390 = vmatpush.msra.mxu3 %v5001_v59  ;;  %v6553_v59 = vld [vmem:[#allocation30_spill] sm:$0xff]  ;;  %v6554_v53 = vld [vmem:[#allocation19_spill] sm:$0xff] }
 0x67b   :  { %2331 = vmatpush.msra.mxu0 %v5007_v21  ;;  %2351 = vmatpush.msra.mxu1 %v5009_v31  ;;  %v6555_v21 = vld [vmem:[#allocation29_spill] sm:$0xff]  ;;  %v6556_v31 = vld [vmem:[#allocation23_spill] sm:$0xff] }
 0x67c   :  { %2371 = vmatpush.msra.mxu2 %v5017_v45  ;;  %2391 = vmatpush.msra.mxu3 %v5012_v10  ;;  %v6557_v10 = vld [vmem:[#allocation22_spill] sm:$0xff]  ;;  %v6558_v45 = vld [vmem:[#allocation41_spill] sm:$0xff] }
 0x67d   :  { %2332 = vmatpush.msra.mxu0 %v5019_v50  ;;  %2352 = vmatpush.msra.mxu1 %v5021_v63  ;;  %v6559_v50 = vld [vmem:[#allocation36_spill] sm:$0xff]  ;;  %v6560_v63 = vld [vmem:[#allocation15_spill] sm:$0xff]  ;;  %6591 = vst [vmem:[#allocation22_spill] sm:$0xff] %v5629_v32 }
 0x67e   :  { %2372 = vmatpush.msra.mxu2 %v5051_v20  ;;  %2392 = vmatpush.msra.mxu3 %v5031_v51  ;;  %v6563_v51 = vld [vmem:[#allocation54_spill] sm:$0xff] }
 0x67f   :  { %2333 = vmatpush.msra.mxu0 %v5027_v0  ;;  %2353 = vmatpush.msra.mxu1 %v5029_v3  ;;  %v6561_v0 = vld [vmem:[#allocation40_spill] sm:$0xff] }
 0x680   :  { %2373 = vmatpush.msra.mxu2 %v5057_v43  ;;  %2393 = vmatpush.msra.mxu3 %v5038_v29  ;;  %v6562_v3 = vld [vmem:[#allocation48_spill] sm:$0xff]  ;;  %v6565_v29 = vld [vmem:[#allocation37_spill] sm:$0xff] }
 0x681   :  { %2334 = vmatpush.msra.mxu0 %v5034_v9  ;;  %2354 = vmatpush.msra.mxu1 %v5036_v6  ;;  %v6564_v9 = vld [vmem:[#allocation44_spill] sm:$0xff]  ;;  %v1715_v49 = vadd.f32 %v6566_v44, %v6565_v29 }
 0x682   :  { %2374 = vmatpush.msra.mxu2 %v6537_v38  ;;  %2394 = vmatpush.msra.mxu3 %v6538_v26  ;;  %v1674_v6 = vadd.f32 %v6564_v9, %v6563_v51 }
 0x683   :  { %2335 = vmatpush.msra.mxu0 %v6539_v18  ;;  %2355 = vmatpush.msra.mxu1 %v6540_v15 }
 0x684   :  { %2375 = vmatpush.msra.mxu2 %v6541_v16  ;;  %2395 = vmatpush.msra.mxu3 %v6542_v37 }
 0x685   :  { %2336 = vmatpush.msra.mxu0 %v6543_v46  ;;  %2356 = vmatpush.msra.mxu1 %v6544_v24 }
 0x686   :  { %2376 = vmatpush.msra.mxu2 %v6545_v56  ;;  %2396 = vmatpush.msra.mxu3 %v6546_v34 }
 0x687   :  { %2337 = vmatpush.msra.mxu0 %v6547_v19  ;;  %2357 = vmatpush.msra.mxu1 %v6548_v36 }
 0x688   :  { %2377 = vmatpush.msra.mxu2 %v6549_v55  ;;  %2397 = vmatpush.msra.mxu3 %v6550_v12 }
 0x689   :  { %2338 = vmatpush.msra.mxu0 %v6551_v2  ;;  %2358 = vmatpush.msra.mxu1 %v6552_v54 }
 0x68a   :  { %2378 = vmatpush.msra.mxu2 %v6553_v59  ;;  %2398 = vmatpush.msra.mxu3 %v6554_v53 }
 0x68b   :  { %2339 = vmatpush.msra.mxu0 %v6555_v21  ;;  %2359 = vmatpush.msra.mxu1 %v6556_v31 }
 0x68c   :  { %2379 = vmatpush.msra.mxu2 %v6557_v10  ;;  %2399 = vmatpush.msra.mxu3 %v6558_v45 }
 0x68d   :  { %2340 = vmatpush.msra.mxu0 %v6559_v50  ;;  %2360 = vmatpush.msra.mxu1 %v6560_v63 }
 0x68e   :  { %2380 = vmatpush.msra.mxu2 %v6561_v0  ;;  %2400 = vmatpush.msra.mxu3 %v6562_v3 }
 0x6ea   :  { %v2046_v23 = vpop.f32.mrf.mxu0  ;;  %v2066_v20 = vpop.f32.mrf.mxu1 }
 0x6eb   :  { %v2109_v43 = vadd.f32 %v2046_v23, %v1674_v6  ;;  %v2110_v27 = vadd.f32 %v2066_v20, %v1715_v49  ;;  %v5461_v23 = vld [vmem:[#allocation7 + $0x1e8] sm:$0xff]  ;;  %v5464_v20 = vld [vmem:[#allocation7 + $0x1f0] sm:$0xff] }
 0x6ed   :  { %v3212_v1 = vmul.f32 -1.442695, %v2109_v43  ;;  %v3213_v22 = vmul.f32 -1.442695, %v2110_v27  ;;  %v5467_v43 = vld [vmem:[#allocation7 + $0x1f8] sm:$0xff]  ;;  %v5470_v27 = vld [vmem:[#allocation7 + $0x1c0] sm:$0xff] }
 0x6ef   :  { %3391 = vpow2.f32 %v3212_v1  ;;  %v5473_v1 = vld [vmem:[#allocation7 + $0x1c8] sm:$0xff] }
 0x6f0   :  { %3393 = vpow2.f32 %v3213_v22  ;;  %v5476_v22 = vld [vmem:[#allocation7 + $0x1d0] sm:$0xff] }
 0x6f1   :  { %v2106_v42 = vpop.f32.mrf.mxu3  ;;  %v2086_v8 = vpop.f32.mrf.mxu2 }
 0x6f2   :  { %v2112_v13 = vadd.f32 %v2106_v42, %v1797_v52  ;;  %v2111_v58 = vadd.f32 %v2086_v8, %v1756_v57  ;;  %v5482_v52 = vld [vmem:[#allocation7 + $0x1a0] sm:$0xff]  ;;  %v5485_v42 = vld [vmem:[#allocation7 + $0x1a8] sm:$0xff]  ;;  %v5515_v57 = vld [vmem:[#allocation7 + $0x178] sm:$0xff] }
 0x6f3   :  { %v5506_v8 = vld [vmem:[#allocation7 + $0x160] sm:$0xff] }
 0x6f4   :  { %v3214_v7 = vmul.f32 -1.442695, %v2112_v13  ;;  %v5488_v13 = vld [vmem:[#allocation7 + $0x1b0] sm:$0xff] }
 0x6f5   :  { %v3392_v11 = vpop.eup %3391 }
 0x6f6   :  { %v3394_v17 = vpop.eup %3393  ;;  %v2116_v47 = vadd.f32 1.0, %v3392_v11  ;;  %3395 = vpow2.f32 %v3214_v7  ;;  %v5491_v7 = vld [vmem:[#allocation7 + $0x1b8] sm:$0xff]  ;;  %v5494_v11 = vld [vmem:[#allocation7 + $0x180] sm:$0xff] }
 0x6f7   :  { %v2135_v40 = vadd.f32 1.0, %v3394_v17  ;;  %v5497_v17 = vld [vmem:[#allocation7 + $0x188] sm:$0xff] }
 0x6f8   :  { %3397 = vrcp.f32 %v2116_v47  ;;  %v2128_v62 = vand.u32 2147483648, %v2116_v47  ;;  %v2126_v18 = vand.u32 2147483647, %v2116_v47  ;;  %vm2122_vm0 = vweird.f32 %v2116_v47 }
 0x6f9   :  { %3399 = vrcp.f32 %v2135_v40  ;;  %v2147_v38 = vand.u32 2147483648, %v2135_v40  ;;  %v2145_v16 = vand.u32 2147483647, %v2135_v40  ;;  %vm2141_vm1 = vweird.f32 %v2135_v40 }
 0x6fa   :  { %v2129_v24 = vor.u32 1.1754944e-38, %v2128_v62  ;;  %vm2127_vm4 = vcmp.eq.f32.partialorder %v2126_v18, 8.507059e+37  ;;  %v5542_v62 = vld [vmem:[#allocation7 + $0x100] sm:$0xff]  ;;  %v5551_v18 = vld [vmem:[#allocation7 + $0x118] sm:$0xff] }
 0x6fb   :  { %v2148_v19 = vor.u32 1.1754944e-38, %v2147_v38  ;;  %vm2146_vm5 = vcmp.eq.f32.partialorder %v2145_v16, 8.507059e+37  ;;  %v5545_v38 = vld [vmem:[#allocation7 + $0x108] sm:$0xff] }
 0x6fc   :  { %v3396_v30 = vpop.eup %3395  ;;  %v5557_v16 = vld [vmem:[#allocation7 + $0xe8] sm:$0xff] }
 0x6fd   :  { %v2155_v4 = vadd.f32 1.0, %v3396_v30  ;;  %v5509_v30 = vld [vmem:[#allocation7 + $0x168] sm:$0xff] }
 0x6fe   :  { %v3398_v61 = vpop.eup %3397 }
 0x6ff   :  { %v3400_v35 = vpop.eup %3399  ;;  %v2118_v14 = vmul.f32 %v3398_v61, %v2116_v47  ;;  %3401 = vrcp.f32 %v2155_v4  ;;  %vm2123_vm14 = vweird.f32 %v3398_v61  ;;  %v2167_v50 = vand.u32 2147483648, %v2155_v4  ;;  %v5500_v47 = vld [vmem:[#allocation7 + $0x190] sm:$0xff] }
 0x700   :  { %v2137_v33 = vmul.f32 %v3400_v35, %v2135_v40  ;;  %3403 = vtanh.f32 %v2111_v58  ;;  %vm2142_vm15 = vweird.f32 %v3400_v35  ;;  %vm2124_vm2 = vmor %vm2122_vm0, %vm2123_vm14  ;;  %vm2161_vm7 = vweird.f32 %v2155_v4  ;;  %v5503_v40 = vld [vmem:[#allocation7 + $0x198] sm:$0xff]  ;;  %v5524_v58 = vld [vmem:[#allocation7 + $0x150] sm:$0xff] }
 0x701   :  { %v2119_v60 = vsub.f32 1.0, %v2118_v14  ;;  %vm2143_vm3 = vmor %vm2141_vm1, %vm2142_vm15  ;;  %v2165_v63 = vand.u32 2147483647, %v2155_v4  ;;  %v2168_v9 = vor.u32 1.1754944e-38, %v2167_v50  ;;  %v5530_v14 = vld [vmem:[#allocation7 + $0x120] sm:$0xff]  ;;  %v5608_v50 = vld [vmem:[#allocation7 + $0x70] sm:$0xff] }
 0x702   :  { %v2138_v48 = vsub.f32 1.0, %v2137_v33  ;;  %v5533_v33 = vld [vmem:[#allocation7 + $0x128] sm:$0xff]  ;;  %6584 = vst [vmem:[#allocation18_spill] sm:$0xff] %v5608_v50 }
 0x703   :  { %v2120_v26 = vmul.f32 %v3398_v61, %v2119_v60  ;;  %vm2166_vm9 = vcmp.eq.f32.partialorder %v2165_v63, 8.507059e+37  ;;  %v5536_v60 = vld [vmem:[#allocation7 + $0x130] sm:$0xff]  ;;  %v5611_v63 = vld [vmem:[#allocation7 + $0x78] sm:$0xff] }
 0x704   :  { %v2139_v15 = vmul.f32 %v3400_v35, %v2138_v48  ;;  %v5539_v48 = vld [vmem:[#allocation7 + $0x138] sm:$0xff]  ;;  %6585 = vst [vmem:[#allocation32_spill] sm:$0xff] %v5611_v63 }
 0x705   :  { %v3402_v37 = vpop.eup %3401  ;;  %v2121_v46 = vadd.f32 %v3398_v61, %v2120_v26  ;;  %v5548_v26 = vld [vmem:[#allocation7 + $0x110] sm:$0xff] }
 0x706   :  { %v2140_v56 = vadd.f32 %v3400_v35, %v2139_v15  ;;  %v2157_v34 = vmul.f32 %v3402_v37, %v2155_v4  ;;  %v3404_v55 = vpop.eup %3403  ;;  %vm2162_vm6 = vweird.f32 %v3402_v37  ;;  %v5518_v4 = vld [vmem:[#allocation7 + $0x140] sm:$0xff] }
 0x707   :  { %v2125_v36 = vsel %vm2124_vm2, %v3398_v61, %v2121_v46  ;;  %vm2163_vm8 = vmor %vm2161_vm7, %vm2162_vm6  ;;  %v5521_v61 = vld [vmem:[#allocation7 + $0x148] sm:$0xff]  ;;  %v5554_v15 = vld [vmem:[#allocation7 + $0xe0] sm:$0xff] }
 0x708   :  { %v2130_v12 = vsel %vm2127_vm4, %v2129_v24, %v2125_v36  ;;  %v2144_v2 = vsel %vm2143_vm3, %v3400_v35, %v2140_v56  ;;  %v2158_v54 = vsub.f32 1.0, %v2157_v34  ;;  %v5527_v35 = vld [vmem:[#allocation7 + $0x158] sm:$0xff]  ;;  %v5566_v24 = vld [vmem:[#allocation7 + $0xc0] sm:$0xff]  ;;  %v5569_v56 = vld [vmem:[#allocation7 + $0xc8] sm:$0xff] }
 0x709   :  { %v2149_v59 = vsel %vm2146_vm5, %v2148_v19, %v2144_v2  ;;  %v2172_v53 = vmul.f32 %v3404_v55, %v2130_v12  ;;  %v5563_v46 = vld [vmem:[#allocation7 + $0xf8] sm:$0xff]  ;;  %v5572_v34 = vld [vmem:[#allocation7 + $0xd0] sm:$0xff]  ;;  %v5578_v36 = vld [vmem:[#allocation7 + $0xa0] sm:$0xff] }
 0x70a   :  { %v2171_v21 = vmul.f32 %v2149_v59, %v5367_v28  ;;  %v2159_v31 = vmul.f32 %v3402_v37, %v2158_v54  ;;  %v5458_v28 = vld [vmem:[#allocation7 + $0x1e0] sm:$0xff]  ;;  %6572 = vst [vmem:[#allocation57_spill] sm:$0xff] %v5572_v34  ;;  %v5575_v19 = vld [vmem:[#allocation7 + $0xd8] sm:$0xff]  ;;  %v5581_v55 = vld [vmem:[#allocation7 + $0xa8] sm:$0xff] }
 0x70b   :  { %6573 = vst [vmem:[#allocation47_spill] sm:$0xff] %v5575_v19  ;;  %v5584_v12 = vld [vmem:[#allocation7 + $0xb0] sm:$0xff]  ;;  %v5587_v2 = vld [vmem:[#allocation7 + $0xb8] sm:$0xff]  ;;  %v5590_v54 = vld [vmem:[#allocation7 + $0x80] sm:$0xff] }
 0x70c   :  { %v5449_v10 = vadd.f32 %v2172_v53, %v2171_v21  ;;  %v2160_v45 = vadd.f32 %v3402_v37, %v2159_v31  ;;  %6574 = vst [vmem:[#allocation27_spill] sm:$0xff] %v5578_v36  ;;  %v5593_v59 = vld [vmem:[#allocation7 + $0x88] sm:$0xff]  ;;  %v5596_v53 = vld [vmem:[#allocation7 + $0x90] sm:$0xff]  ;;  %v5599_v21 = vld [vmem:[#allocation7 + $0x98] sm:$0xff] }
 0x70d   :  { %6575 = vst [vmem:[#allocation28_spill] sm:$0xff] %v5581_v55  ;;  %v5602_v31 = vld [vmem:[#allocation7 + $0x60] sm:$0xff] }
 0x70e   :  { %3405 = vtanh.f32 %v5449_v10  ;;  %v2164_v3 = vsel %vm2163_vm8, %v3402_v37, %v2160_v45  ;;  %v5560_v37 = vld [vmem:[#allocation7 + $0xf0] sm:$0xff]  ;;  %6576 = vst [vmem:[#allocation31_spill] sm:$0xff] %v5584_v12  ;;  %v5605_v45 = vld [vmem:[#allocation7 + $0x68] sm:$0xff] }
 0x70f   :  { %v2169_v44 = vsel %vm2166_vm9, %v2168_v9, %v2164_v3  ;;  %6577 = vst [vmem:[#allocation21_spill] sm:$0xff] %v5587_v2  ;;  %v5614_v3 = vld [vmem:[#allocation7 + $0x40] sm:$0xff]  ;;  %v5617_v9 = vld [vmem:[#allocation7 + $0x48] sm:$0xff] }
 0x710   :  { %6578 = vst [vmem:[#allocation14_spill] sm:$0xff] %v5590_v54 }
 0x711   :  { %6579 = vst [vmem:[#allocation35_spill] sm:$0xff] %v5593_v59 }
 0x712   :  { %6580 = vst [vmem:[#allocation16_spill] sm:$0xff] %v5596_v53 }
 0x713   :  { %6581 = vst [vmem:[#allocation20_spill] sm:$0xff] %v5599_v21 }
 0x714   :  { %v3406_v6 = vpop.eup %3405  ;;  %6582 = vst [vmem:[#allocation34_spill] sm:$0xff] %v5602_v31 }
 0x715   :  { %v5452_v49 = vmul.f32 %v3406_v6, %v2169_v44  ;;  %6583 = vst [vmem:[#allocation26_spill] sm:$0xff] %v5605_v45  ;;  %v5620_v6 = vld [vmem:[#allocation7 + $0x50] sm:$0xff]  ;;  %v5623_v44 = vld [vmem:[#allocation7 + $0x58] sm:$0xff] }
 0x716   :  { %6586 = vst [vmem:[#allocation25_spill] sm:$0xff] %v5614_v3 }
 0x717   :  { %6571 = vst [vmem:[#allocation24_spill] sm:$0xff] %v5452_v49  ;;  %2193 = vmatmul.f32.vlgmr.msrb.gmra.mxu0 %v5452_v49  ;;  %2213 = vmatmul.f32.vlgmr.msrb.gmra.mxu1 %v5452_v49 }
 0x718   :  { %2233 = vmatmul.f32.vlgmr.msrb.gmra.mxu2 %v5452_v49  ;;  %2253 = vmatmul.f32.vlgmr.msrb.gmra.mxu3 %v5452_v49  ;;  %6587 = vst [vmem:[#allocation30_spill] sm:$0xff] %v5617_v9  ;;  %v5626_v49 = vld [vmem:[#allocation7 + $0x20] sm:$0xff] }
 0x719   :  { %2473 = vmatpush.msrb.mxu0 %v5458_v28  ;;  %2493 = vmatpush.msrb.mxu1 %v5461_v23  ;;  %6588 = vst [vmem:[#allocation19_spill] sm:$0xff] %v5620_v6 }
 0x71a   :  { %2513 = vmatpush.msrb.mxu2 %v5464_v20  ;;  %2533 = vmatpush.msrb.mxu3 %v5467_v43  ;;  %6589 = vst [vmem:[#allocation29_spill] sm:$0xff] %v5623_v44 }
 0x71b   :  { %2474 = vmatpush.msrb.mxu0 %v5470_v27  ;;  %2494 = vmatpush.msrb.mxu1 %v5473_v1  ;;  %6590 = vst [vmem:[#allocation23_spill] sm:$0xff] %v5626_v49 }
 0x71c   :  { %2514 = vmatpush.msrb.mxu2 %v5476_v22  ;;  %2534 = vmatpush.msrb.mxu3 %v5479_v41 }
 0x71d   :  { %2475 = vmatpush.msrb.mxu0 %v5482_v52  ;;  %2495 = vmatpush.msrb.mxu1 %v5485_v42 }
 0x71e   :  { %2515 = vmatpush.msrb.mxu2 %v5488_v13  ;;  %2535 = vmatpush.msrb.mxu3 %v5491_v7 }
 0x71f   :  { %2476 = vmatpush.msrb.mxu0 %v5494_v11  ;;  %2496 = vmatpush.msrb.mxu1 %v5497_v17 }
 0x720   :  { %2516 = vmatpush.msrb.mxu2 %v5500_v47  ;;  %2536 = vmatpush.msrb.mxu3 %v5503_v40 }
 0x721   :  { %2477 = vmatpush.msrb.mxu0 %v5506_v8  ;;  %2497 = vmatpush.msrb.mxu1 %v5509_v30 }
 0x722   :  { %2517 = vmatpush.msrb.mxu2 %v5512_v5  ;;  %2537 = vmatpush.msrb.mxu3 %v5515_v57 }
 0x723   :  { %2478 = vmatpush.msrb.mxu0 %v5518_v4  ;;  %2498 = vmatpush.msrb.mxu1 %v5521_v61 }
 0x724   :  { %2518 = vmatpush.msrb.mxu2 %v5524_v58  ;;  %2538 = vmatpush.msrb.mxu3 %v5527_v35 }
 0x725   :  { %2479 = vmatpush.msrb.mxu0 %v5530_v14  ;;  %2499 = vmatpush.msrb.mxu1 %v5533_v33 }
 0x726   :  { %2519 = vmatpush.msrb.mxu2 %v5536_v60  ;;  %2539 = vmatpush.msrb.mxu3 %v5539_v48 }
 0x727   :  { %2480 = vmatpush.msrb.mxu0 %v5542_v62  ;;  %2500 = vmatpush.msrb.mxu1 %v5545_v38 }
 0x728   :  { %2520 = vmatpush.msrb.mxu2 %v5548_v26  ;;  %2540 = vmatpush.msrb.mxu3 %v5551_v18 }
 0x729   :  { %2481 = vmatpush.msrb.mxu0 %v5554_v15  ;;  %2501 = vmatpush.msrb.mxu1 %v5557_v16 }
 0x72a   :  { %2521 = vmatpush.msrb.mxu2 %v5560_v37  ;;  %2541 = vmatpush.msrb.mxu3 %v5563_v46 }
 0x72b   :  { %2482 = vmatpush.msrb.mxu0 %v5566_v24  ;;  %2502 = vmatpush.msrb.mxu1 %v5569_v56 }
 0x72c   :  { %2522 = vmatpush.msrb.mxu2 %v5572_v34  ;;  %2542 = vmatpush.msrb.mxu3 %v5575_v19 }
 0x72d   :  { %2483 = vmatpush.msrb.mxu0 %v5578_v36  ;;  %2503 = vmatpush.msrb.mxu1 %v5581_v55 }
 0x72e   :  { %2523 = vmatpush.msrb.mxu2 %v5584_v12  ;;  %2543 = vmatpush.msrb.mxu3 %v5587_v2 }
 0x72f   :  { %2484 = vmatpush.msrb.mxu0 %v5590_v54  ;;  %2504 = vmatpush.msrb.mxu1 %v5593_v59 }
 0x730   :  { %2524 = vmatpush.msrb.mxu2 %v5596_v53  ;;  %2544 = vmatpush.msrb.mxu3 %v5599_v21 }
 0x731   :  { %2485 = vmatpush.msrb.mxu0 %v5602_v31  ;;  %2505 = vmatpush.msrb.mxu1 %v5605_v45 }
 0x732   :  { %2525 = vmatpush.msrb.mxu2 %v5608_v50  ;;  %2545 = vmatpush.msrb.mxu3 %v5611_v63  ;;  %v6598_v63 = vld [vmem:[#allocation60_spill] sm:$0xff] }
 0x733   :  { %2486 = vmatpush.msrb.mxu0 %v5614_v3  ;;  %2506 = vmatpush.msrb.mxu1 %v5617_v9  ;;  %v5632_v3 = vld [vmem:[#allocation7 + $0x30] sm:$0xff]  ;;  %v5635_v9 = vld [vmem:[#allocation7 + $0x38] sm:$0xff] }
 0x734   :  { %2526 = vmatpush.msrb.mxu2 %v5620_v6  ;;  %2546 = vmatpush.msrb.mxu3 %v5623_v44  ;;  %6592 = vst [vmem:[#allocation41_spill] sm:$0xff] %v5632_v3  ;;  %v5638_v6 = vld [vmem:[#allocation7] sm:$0xff]  ;;  %v5641_v44 = vld [vmem:[#allocation7 + $0x8] sm:$0xff] }
 0x735   :  { %2487 = vmatpush.msrb.mxu0 %v5626_v49  ;;  %2507 = vmatpush.msrb.mxu1 %v5629_v32  ;;  %6593 = vst [vmem:[#allocation36_spill] sm:$0xff] %v5635_v9  ;;  %v5645_v49 = vld [vmem:[#allocation7 + $0x18] sm:$0xff] }
 0x736   :  { %2527 = vmatpush.msrb.mxu2 %v5632_v3  ;;  %2547 = vmatpush.msrb.mxu3 %v5635_v9  ;;  %6594 = vst [vmem:[#allocation15_spill] sm:$0xff] %v5638_v6  ;;  %v6597_v3 = vld [vmem:[#allocation38_spill] sm:$0xff]  ;;  %v1718_v9 = vadd.f32 %v6598_v63, %v6565_v29 }
 0x737   :  { %2488 = vmatpush.msrb.mxu0 %v5638_v6  ;;  %6595 = vst [vmem:[#allocation40_spill] sm:$0xff] %v5641_v44  ;;  %2508 = vmatpush.msrb.mxu1 %v5641_v44  ;;  %v1677_v32 = vadd.f32 %v6597_v3, %v6563_v51  ;;  %v6599_v44 = vld [vmem:[#allocation64_spill] sm:$0xff] }
 0x738   :  { %2528 = vmatpush.msrb.mxu2 %v6561_v0  ;;  %6596 = vst [vmem:[#allocation48_spill] sm:$0xff] %v5645_v49  ;;  %2548 = vmatpush.msrb.mxu3 %v5645_v49  ;;  %v1800_v0 = vadd.f32 %v6599_v44, %v6567_v25 }
 0x794   :  { %v2194_v50 = vpop.f32.mrf.mxu0  ;;  %v2214_v45 = vpop.f32.mrf.mxu1 }
 0x795   :  { %v2257_v31 = vadd.f32 %v2194_v50, %v1677_v32  ;;  %v2258_v6 = vadd.f32 %v2214_v45, %v1718_v9 }
 0x797   :  { %v3215_v21 = vmul.f32 -1.442695, %v2257_v31  ;;  %v3216_v53 = vmul.f32 -1.442695, %v2258_v6  ;;  %v6600_v31 = vld [vmem:[#allocation50_spill] sm:$0xff] }
 0x798   :  { %v1759_v45 = vadd.f32 %v6600_v31, %v6569_v39 }
 0x799   :  { %3407 = vpow2.f32 %v3215_v21 }
 0x79a   :  { %3409 = vpow2.f32 %v3216_v53 }
 0x79b   :  { %v2254_v59 = vpop.f32.mrf.mxu3  ;;  %v2234_v63 = vpop.f32.mrf.mxu2 }
 0x79c   :  { %v2260_v54 = vadd.f32 %v2254_v59, %v1800_v0  ;;  %v2259_v9 = vadd.f32 %v2234_v63, %v1759_v45 }
 0x79e   :  { %v3217_v49 = vmul.f32 -1.442695, %v2260_v54 }
 0x79f   :  { %v3408_v2 = vpop.eup %3407 }
 0x7a0   :  { %v3410_v12 = vpop.eup %3409  ;;  %v2264_v3 = vadd.f32 1.0, %v3408_v2  ;;  %3411 = vpow2.f32 %v3217_v49 }
 0x7a1   :  { %v2283_v51 = vadd.f32 1.0, %v3410_v12 }
 0x7a2   :  { %3413 = vrcp.f32 %v2264_v3  ;;  %v2276_v0 = vand.u32 2147483648, %v2264_v3  ;;  %v2274_v2 = vand.u32 2147483647, %v2264_v3  ;;  %vm2270_vm12 = vweird.f32 %v2264_v3 }
 0x7a3   :  { %3415 = vrcp.f32 %v2283_v51  ;;  %v2295_v49 = vand.u32 2147483648, %v2283_v51  ;;  %v2293_v29 = vand.u32 2147483647, %v2283_v51  ;;  %vm2289_vm13 = vweird.f32 %v2283_v51 }
 0x7a4   :  { %v2277_v63 = vor.u32 1.1754944e-38, %v2276_v0  ;;  %vm2275_vm0 = vcmp.eq.f32.partialorder %v2274_v2, 8.507059e+37 }
 0x7a5   :  { %vm2294_vm1 = vcmp.eq.f32.partialorder %v2293_v29, 8.507059e+37 }
 0x7a6   :  { %v3412_v32 = vpop.eup %3411 }
 0x7a7   :  { %v2303_v21 = vadd.f32 1.0, %v3412_v32 }
 0x7a8   :  { %v3414_v50 = vpop.eup %3413 }
 0x7a9   :  { %v3416_v6 = vpop.eup %3415  ;;  %v2266_v53 = vmul.f32 %v3414_v50, %v2264_v3  ;;  %3417 = vrcp.f32 %v2303_v21  ;;  %vm2271_vm10 = vweird.f32 %v3414_v50  ;;  %vm2309_vm3 = vweird.f32 %v2303_v21 }
 0x7aa   :  { %v2285_v59 = vmul.f32 %v3416_v6, %v2283_v51  ;;  %3419 = vtanh.f32 %v2259_v9  ;;  %vm2290_vm11 = vweird.f32 %v3416_v6  ;;  %vm2272_vm14 = vmor %vm2270_vm12, %vm2271_vm10 }
 0x7ab   :  { %v2267_v54 = vsub.f32 1.0, %v2266_v53  ;;  %vm2291_vm15 = vmor %vm2289_vm13, %vm2290_vm11  ;;  %v2296_v53 = vor.u32 1.1754944e-38, %v2295_v49 }
 0x7ac   :  { %v2286_v44 = vsub.f32 1.0, %v2285_v59 }
 0x7ad   :  { %v2268_v12 = vmul.f32 %v3414_v50, %v2267_v54 }
 0x7ae   :  { %v2287_v25 = vmul.f32 %v3416_v6, %v2286_v44 }
 0x7af   :  { %v3418_v55 = vpop.eup %3417  ;;  %v2269_v31 = vadd.f32 %v3414_v50, %v2268_v12 }
 0x7b0   :  { %v2288_v32 = vadd.f32 %v3416_v6, %v2287_v25  ;;  %v2305_v45 = vmul.f32 %v3418_v55, %v2303_v21  ;;  %v3420_v9 = vpop.eup %3419  ;;  %vm2310_vm2 = vweird.f32 %v3418_v55  ;;  %v2315_v25 = vand.u32 2147483648, %v2303_v21 }
 0x7b1   :  { %v2273_v59 = vsel %vm2272_vm14, %v3414_v50, %v2269_v31  ;;  %v2313_v50 = vand.u32 2147483647, %v2303_v21  ;;  %vm2311_vm4 = vmor %vm2309_vm3, %vm2310_vm2  ;;  %v6608_v21 = vld [vmem:[#allocation14_spill] sm:$0xff]  ;;  %v6609_v31 = vld [vmem:[#allocation35_spill] sm:$0xff] }
 0x7b2   :  { %v2278_v39 = vsel %vm2275_vm0, %v2277_v63, %v2273_v59  ;;  %v2292_v54 = vsel %vm2291_vm15, %v3416_v6, %v2288_v32  ;;  %v2306_v36 = vsub.f32 1.0, %v2305_v45  ;;  %v2316_v49 = vor.u32 1.1754944e-38, %v2315_v25  ;;  %v6610_v63 = vld [vmem:[#allocation16_spill] sm:$0xff]  ;;  %v6612_v45 = vld [vmem:[#allocation34_spill] sm:$0xff]  ;;  %v6620_v25 = vld [vmem:[#allocation23_spill] sm:$0xff] }
 0x7b3   :  { %v2297_v44 = vsel %vm2294_vm1, %v2296_v53, %v2292_v54  ;;  %v2320_v19 = vmul.f32 %v3420_v9, %v2278_v39  ;;  %vm2314_vm5 = vcmp.eq.f32.partialorder %v2313_v50, 8.507059e+37  ;;  %v6602_v39 = vld [vmem:[#allocation57_spill] sm:$0xff]  ;;  %v6611_v32 = vld [vmem:[#allocation20_spill] sm:$0xff]  ;;  %v6613_v53 = vld [vmem:[#allocation26_spill] sm:$0xff] }
 0x7b4   :  { %v2319_v34 = vmul.f32 %v2297_v44, %v5449_v10  ;;  %v2307_v12 = vmul.f32 %v3418_v55, %v2306_v36  ;;  %v6603_v10 = vld [vmem:[#allocation47_spill] sm:$0xff]  ;;  %v6614_v59 = vld [vmem:[#allocation18_spill] sm:$0xff]  ;;  %v6615_v9 = vld [vmem:[#allocation32_spill] sm:$0xff] }
 0x7b5   :  { %v6606_v36 = vld [vmem:[#allocation31_spill] sm:$0xff]  ;;  %v6616_v54 = vld [vmem:[#allocation25_spill] sm:$0xff]  ;;  %v6617_v44 = vld [vmem:[#allocation30_spill] sm:$0xff] }
 0x7b6   :  { %v5657_v3 = vadd.f32 %v2320_v19, %v2319_v34  ;;  %v2308_v51 = vadd.f32 %v3418_v55, %v2307_v12  ;;  %v6604_v34 = vld [vmem:[#allocation27_spill] sm:$0xff]  ;;  %v6605_v19 = vld [vmem:[#allocation28_spill] sm:$0xff]  ;;  %v6621_v50 = vld [vmem:[#allocation22_spill] sm:$0xff] }
 0x7b7   :  { %v6618_v12 = vld [vmem:[#allocation19_spill] sm:$0xff] }
 0x7b8   :  { %3421 = vtanh.f32 %v5657_v3  ;;  %v2312_v0 = vsel %vm2311_vm4, %v3418_v55, %v2308_v51  ;;  %v6607_v55 = vld [vmem:[#allocation21_spill] sm:$0xff] }
 0x7b9   :  { %v2317_v6 = vsel %vm2314_vm5, %v2316_v49, %v2312_v0  ;;  %v6619_v51 = vld [vmem:[#allocation29_spill] sm:$0xff]  ;;  %v6623_v49 = vld [vmem:[#allocation36_spill] sm:$0xff] }
 0x7ba   :  { %v6622_v0 = vld [vmem:[#allocation41_spill] sm:$0xff] }
 0x7be   :  { %v3422_v29 = vpop.eup %3421 }
 0x7bf   :  { %v5660_v2 = vmul.f32 %v3422_v29, %v2317_v6  ;;  %v6624_v29 = vld [vmem:[#allocation15_spill] sm:$0xff]  ;;  %v6625_v6 = vld [vmem:[#allocation40_spill] sm:$0xff] }
 0x7c1   :  { %6601 = vst [vmem:[#allocation44_spill] sm:$0xff] %v5660_v2  ;;  %2341 = vmatmul.f32.vlgmr.msra.gmra.mxu0 %v5660_v2  ;;  %2361 = vmatmul.f32.vlgmr.msra.gmra.mxu1 %v5660_v2 }
 0x7c2   :  { %2381 = vmatmul.f32.vlgmr.msra.gmra.mxu2 %v5660_v2  ;;  %2401 = vmatmul.f32.vlgmr.msra.gmra.mxu3 %v5660_v2  ;;  %v5728_v2 = vld [vmem:[#allocation7 + $0x10] sm:$0xff] }
 0x7c3   :  { %2621 = vmatpush.msra.mxu0 %v5458_v28  ;;  %2641 = vmatpush.msra.mxu1 %v5461_v23  ;;  %6626 = vst [vmem:[#allocation51_spill] sm:$0xff] %v5728_v2 }
 0x7c4   :  { %2661 = vmatpush.msra.mxu2 %v5464_v20  ;;  %2681 = vmatpush.msra.mxu3 %v5467_v43 }
 0x7c5   :  { %2622 = vmatpush.msra.mxu0 %v5470_v27  ;;  %2642 = vmatpush.msra.mxu1 %v5473_v1 }
 0x7c6   :  { %2662 = vmatpush.msra.mxu2 %v5476_v22  ;;  %2682 = vmatpush.msra.mxu3 %v5479_v41 }
 0x7c7   :  { %2623 = vmatpush.msra.mxu0 %v5482_v52  ;;  %2643 = vmatpush.msra.mxu1 %v5485_v42 }
 0x7c8   :  { %2663 = vmatpush.msra.mxu2 %v5488_v13  ;;  %2683 = vmatpush.msra.mxu3 %v5491_v7 }
 0x7c9   :  { %2624 = vmatpush.msra.mxu0 %v5494_v11  ;;  %2644 = vmatpush.msra.mxu1 %v5497_v17 }
 0x7ca   :  { %2664 = vmatpush.msra.mxu2 %v5500_v47  ;;  %2684 = vmatpush.msra.mxu3 %v5503_v40 }
 0x7cb   :  { %2625 = vmatpush.msra.mxu0 %v5506_v8  ;;  %2645 = vmatpush.msra.mxu1 %v5509_v30 }
 0x7cc   :  { %2665 = vmatpush.msra.mxu2 %v5512_v5  ;;  %2685 = vmatpush.msra.mxu3 %v5515_v57 }
 0x7cd   :  { %2626 = vmatpush.msra.mxu0 %v5518_v4  ;;  %2646 = vmatpush.msra.mxu1 %v5521_v61 }
 0x7ce   :  { %2666 = vmatpush.msra.mxu2 %v5524_v58  ;;  %2686 = vmatpush.msra.mxu3 %v5527_v35 }
 0x7cf   :  { %2627 = vmatpush.msra.mxu0 %v5530_v14  ;;  %2647 = vmatpush.msra.mxu1 %v5533_v33 }
 0x7d0   :  { %2667 = vmatpush.msra.mxu2 %v5536_v60  ;;  %2687 = vmatpush.msra.mxu3 %v5539_v48 }
 0x7d1   :  { %2628 = vmatpush.msra.mxu0 %v5542_v62  ;;  %2648 = vmatpush.msra.mxu1 %v5545_v38 }
 0x7d2   :  { %2668 = vmatpush.msra.mxu2 %v5548_v26  ;;  %2688 = vmatpush.msra.mxu3 %v5551_v18 }
 0x7d3   :  { %2629 = vmatpush.msra.mxu0 %v5554_v15  ;;  %2649 = vmatpush.msra.mxu1 %v5557_v16 }
 0x7d4   :  { %2669 = vmatpush.msra.mxu2 %v5560_v37  ;;  %2689 = vmatpush.msra.mxu3 %v5563_v46 }
 0x7d5   :  { %2630 = vmatpush.msra.mxu0 %v5566_v24  ;;  %2650 = vmatpush.msra.mxu1 %v5569_v56 }
 0x7d6   :  { %2670 = vmatpush.msra.mxu2 %v6602_v39  ;;  %2690 = vmatpush.msra.mxu3 %v6603_v10 }
 0x7d7   :  { %2631 = vmatpush.msra.mxu0 %v6604_v34  ;;  %2651 = vmatpush.msra.mxu1 %v6605_v19 }
 0x7d8   :  { %2671 = vmatpush.msra.mxu2 %v6606_v36  ;;  %2691 = vmatpush.msra.mxu3 %v6607_v55 }
 0x7d9   :  { %2632 = vmatpush.msra.mxu0 %v6608_v21  ;;  %2652 = vmatpush.msra.mxu1 %v6609_v31 }
 0x7da   :  { %2672 = vmatpush.msra.mxu2 %v6610_v63  ;;  %2692 = vmatpush.msra.mxu3 %v6611_v32  ;;  %v6633_v32 = vld [vmem:[#allocation39_spill] sm:$0xff] }
 0x7db   :  { %2633 = vmatpush.msra.mxu0 %v6612_v45  ;;  %2653 = vmatpush.msra.mxu1 %v6613_v53 }
 0x7dc   :  { %2673 = vmatpush.msra.mxu2 %v6614_v59  ;;  %2693 = vmatpush.msra.mxu3 %v6615_v9  ;;  %v6631_v9 = vld [vmem:[#allocation65_spill] sm:$0xff] }
 0x7dd   :  { %2634 = vmatpush.msra.mxu0 %v6616_v54  ;;  %2654 = vmatpush.msra.mxu1 %v6617_v44  ;;  %v6627_v44 = vld [vmem:[#allocation48_spill] sm:$0xff] }
 0x7de   :  { %2674 = vmatpush.msra.mxu2 %v6618_v12  ;;  %2694 = vmatpush.msra.mxu3 %v6619_v51  ;;  %v6628_v12 = vld [vmem:[#allocation54_spill] sm:$0xff]  ;;  %v6629_v51 = vld [vmem:[#allocation61_spill] sm:$0xff] }
 0x7df   :  { %2635 = vmatpush.msra.mxu0 %v6620_v25  ;;  %2655 = vmatpush.msra.mxu1 %v6621_v50  ;;  %v1680_v54 = vadd.f32 %v6629_v51, %v6628_v12  ;;  %v6630_v25 = vld [vmem:[#allocation37_spill] sm:$0xff] }
 0x7e0   :  { %2675 = vmatpush.msra.mxu2 %v6622_v0  ;;  %2695 = vmatpush.msra.mxu3 %v6623_v49  ;;  %v1721_v50 = vadd.f32 %v6631_v9, %v6630_v25 }
 0x7e1   :  { %2636 = vmatpush.msra.mxu0 %v6624_v29  ;;  %2656 = vmatpush.msra.mxu1 %v6625_v6  ;;  %v6632_v6 = vld [vmem:[#allocation68_spill] sm:$0xff] }
 0x7e2   :  { %2676 = vmatpush.msra.mxu2 %v5728_v2  ;;  %2696 = vmatpush.msra.mxu3 %v6627_v44  ;;  %v1803_v63 = vadd.f32 %v6633_v32, %v6632_v6 }
 0x83e   :  { %v2342_v59 = vpop.f32.mrf.mxu0  ;;  %v2362_v0 = vpop.f32.mrf.mxu1 }
 0x83f   :  { %v2405_v53 = vadd.f32 %v2342_v59, %v1680_v54  ;;  %v2406_v49 = vadd.f32 %v2362_v0, %v1721_v50  ;;  %v6634_v54 = vld [vmem:[#allocation70_spill] sm:$0xff] }
 0x841   :  { %v3218_v45 = vmul.f32 -1.442695, %v2405_v53  ;;  %v3219_v29 = vmul.f32 -1.442695, %v2406_v49  ;;  %v6635_v53 = vld [vmem:[#allocation53_spill] sm:$0xff] }
 0x842   :  { %v1762_v50 = vadd.f32 %v6635_v53, %v6634_v54 }
 0x843   :  { %3423 = vpow2.f32 %v3218_v45 }
 0x844   :  { %3425 = vpow2.f32 %v3219_v29 }
 0x845   :  { %v2402_v2 = vpop.f32.mrf.mxu3  ;;  %v2382_v9 = vpop.f32.mrf.mxu2 }
 0x846   :  { %v2408_v31 = vadd.f32 %v2402_v2, %v1803_v63  ;;  %v2407_v49 = vadd.f32 %v2382_v9, %v1762_v50 }
 0x848   :  { %v3220_v44 = vmul.f32 -1.442695, %v2408_v31 }
 0x849   :  { %v3424_v21 = vpop.eup %3423 }
 0x84a   :  { %v3426_v55 = vpop.eup %3425  ;;  %v2412_v51 = vadd.f32 1.0, %v3424_v21  ;;  %3427 = vpow2.f32 %v3220_v44 }
 0x84b   :  { %v2431_v12 = vadd.f32 1.0, %v3426_v55 }
 0x84c   :  { %3429 = vrcp.f32 %v2412_v51  ;;  %v2424_v6 = vand.u32 2147483648, %v2412_v51  ;;  %v2422_v44 = vand.u32 2147483647, %v2412_v51  ;;  %vm2418_vm8 = vweird.f32 %v2412_v51 }
 0x84d   :  { %3431 = vrcp.f32 %v2431_v12  ;;  %v2443_v21 = vand.u32 2147483648, %v2431_v12  ;;  %v2441_v36 = vand.u32 2147483647, %v2431_v12  ;;  %vm2437_vm9 = vweird.f32 %v2431_v12 }
 0x84e   :  { %v2425_v9 = vor.u32 1.1754944e-38, %v2424_v6  ;;  %vm2423_vm12 = vcmp.eq.f32.partialorder %v2422_v44, 8.507059e+37 }
 0x84f   :  { %vm2442_vm13 = vcmp.eq.f32.partialorder %v2441_v36, 8.507059e+37 }
 0x850   :  { %v3428_v59 = vpop.eup %3427 }
 0x851   :  { %v2451_v45 = vadd.f32 1.0, %v3428_v59 }
 0x852   :  { %v3430_v0 = vpop.eup %3429 }
 0x853   :  { %v3432_v32 = vpop.eup %3431  ;;  %v2414_v29 = vmul.f32 %v3430_v0, %v2412_v51  ;;  %3433 = vrcp.f32 %v2451_v45  ;;  %vm2419_vm6 = vweird.f32 %v3430_v0  ;;  %vm2457_vm15 = vweird.f32 %v2451_v45 }
 0x854   :  { %v2433_v2 = vmul.f32 %v3432_v32, %v2431_v12  ;;  %3435 = vtanh.f32 %v2407_v49  ;;  %vm2438_vm7 = vweird.f32 %v3432_v32  ;;  %vm2420_vm10 = vmor %vm2418_vm8, %vm2419_vm6  ;;  %v2461_v6 = vand.u32 2147483647, %v2451_v45 }
 0x855   :  { %v2415_v31 = vsub.f32 1.0, %v2414_v29  ;;  %vm2439_vm11 = vmor %vm2437_vm9, %vm2438_vm7  ;;  %v2444_v29 = vor.u32 1.1754944e-38, %v2443_v21 }
 0x856   :  { %v2434_v63 = vsub.f32 1.0, %v2433_v2  ;;  %vm2462_vm1 = vcmp.eq.f32.partialorder %v2461_v6, 8.507059e+37  ;;  %v6656_v6 = vld [vmem:[#allocation22_spill] sm:$0xff] }
 0x857   :  { %v2416_v55 = vmul.f32 %v3430_v0, %v2415_v31 }
 0x858   :  { %v2435_v25 = vmul.f32 %v3432_v32, %v2434_v63 }
 0x859   :  { %v3434_v19 = vpop.eup %3433  ;;  %v2417_v53 = vadd.f32 %v3430_v0, %v2416_v55 }
 0x85a   :  { %v2436_v59 = vadd.f32 %v3432_v32, %v2435_v25  ;;  %v2453_v50 = vmul.f32 %v3434_v19, %v2451_v45  ;;  %v3436_v49 = vpop.eup %3435  ;;  %vm2458_vm14 = vweird.f32 %v3434_v19  ;;  %v2463_v25 = vand.u32 2147483648, %v2451_v45  ;;  %v6643_v45 = vld [vmem:[#allocation14_spill] sm:$0xff] }
 0x85b   :  { %v2421_v2 = vsel %vm2420_vm10, %v3430_v0, %v2417_v53  ;;  %vm2459_vm0 = vmor %vm2457_vm15, %vm2458_vm14  ;;  %v6644_v53 = vld [vmem:[#allocation35_spill] sm:$0xff] }
 0x85c   :  { %v2426_v54 = vsel %vm2423_vm12, %v2425_v9, %v2421_v2  ;;  %v2440_v31 = vsel %vm2439_vm11, %v3432_v32, %v2436_v59  ;;  %v2454_v34 = vsub.f32 1.0, %v2453_v50  ;;  %v2464_v21 = vor.u32 1.1754944e-38, %v2463_v25  ;;  %v6645_v9 = vld [vmem:[#allocation16_spill] sm:$0xff]  ;;  %v6647_v50 = vld [vmem:[#allocation34_spill] sm:$0xff]  ;;  %v6655_v25 = vld [vmem:[#allocation23_spill] sm:$0xff] }
 0x85d   :  { %v2445_v63 = vsel %vm2442_vm13, %v2444_v29, %v2440_v31  ;;  %v2468_v10 = vmul.f32 %v3436_v49, %v2426_v54  ;;  %v6642_v54 = vld [vmem:[#allocation21_spill] sm:$0xff]  ;;  %v6646_v59 = vld [vmem:[#allocation20_spill] sm:$0xff]  ;;  %v6648_v29 = vld [vmem:[#allocation26_spill] sm:$0xff] }
 0x85e   :  { %v2467_v39 = vmul.f32 %v2445_v63, %v5657_v3  ;;  %v2455_v55 = vmul.f32 %v3434_v19, %v2454_v34  ;;  %v6637_v3 = vld [vmem:[#allocation57_spill] sm:$0xff]  ;;  %v6640_v34 = vld [vmem:[#allocation28_spill] sm:$0xff]  ;;  %v6649_v2 = vld [vmem:[#allocation18_spill] sm:$0xff] }
 0x85f   :  { %v6650_v49 = vld [vmem:[#allocation32_spill] sm:$0xff]  ;;  %v6651_v31 = vld [vmem:[#allocation25_spill] sm:$0xff]  ;;  %v6652_v63 = vld [vmem:[#allocation30_spill] sm:$0xff] }
 0x860   :  { %v5741_v51 = vadd.f32 %v2468_v10, %v2467_v39  ;;  %v2456_v12 = vadd.f32 %v3434_v19, %v2455_v55  ;;  %v6638_v39 = vld [vmem:[#allocation47_spill] sm:$0xff] }
 0x861   :  { %v6639_v10 = vld [vmem:[#allocation27_spill] sm:$0xff] }
 0x862   :  { %3437 = vtanh.f32 %v5741_v51  ;;  %v2460_v0 = vsel %vm2459_vm0, %v3434_v19, %v2456_v12  ;;  %v6641_v19 = vld [vmem:[#allocation31_spill] sm:$0xff]  ;;  %v6654_v12 = vld [vmem:[#allocation29_spill] sm:$0xff] }
 0x863   :  { %v2465_v32 = vsel %vm2462_vm1, %v2464_v21, %v2460_v0  ;;  %v6653_v55 = vld [vmem:[#allocation19_spill] sm:$0xff]  ;;  %v6657_v0 = vld [vmem:[#allocation41_spill] sm:$0xff]  ;;  %v6658_v21 = vld [vmem:[#allocation36_spill] sm:$0xff] }
 0x868   :  { %v3438_v36 = vpop.eup %3437 }
 0x869   :  { %v5744_v44 = vmul.f32 %v3438_v36, %v2465_v32  ;;  %v6659_v36 = vld [vmem:[#allocation15_spill] sm:$0xff]  ;;  %v6660_v32 = vld [vmem:[#allocation40_spill] sm:$0xff] }
 0x86b   :  { %6636 = vst [vmem:[#allocation59_spill] sm:$0xff] %v5744_v44  ;;  %2489 = vmatmul.f32.vlgmr.msrb.gmra.mxu0 %v5744_v44  ;;  %2509 = vmatmul.f32.vlgmr.msrb.gmra.mxu1 %v5744_v44 }
 0x86c   :  { %2529 = vmatmul.f32.vlgmr.msrb.gmra.mxu2 %v5744_v44  ;;  %2549 = vmatmul.f32.vlgmr.msrb.gmra.mxu3 %v5744_v44  ;;  %v6661_v44 = vld [vmem:[#allocation51_spill] sm:$0xff] }
 0x86d   :  { %2769 = vmatpush.msrb.mxu0 %v5458_v28  ;;  %2789 = vmatpush.msrb.mxu1 %v5461_v23 }
 0x86e   :  { %2809 = vmatpush.msrb.mxu2 %v5464_v20  ;;  %2829 = vmatpush.msrb.mxu3 %v5467_v43 }
 0x86f   :  { %2770 = vmatpush.msrb.mxu0 %v5470_v27  ;;  %2790 = vmatpush.msrb.mxu1 %v5473_v1 }
 0x870   :  { %2810 = vmatpush.msrb.mxu2 %v5476_v22  ;;  %2830 = vmatpush.msrb.mxu3 %v5479_v41 }
 0x871   :  { %2771 = vmatpush.msrb.mxu0 %v5482_v52  ;;  %2791 = vmatpush.msrb.mxu1 %v5485_v42 }
 0x872   :  { %2811 = vmatpush.msrb.mxu2 %v5488_v13  ;;  %2831 = vmatpush.msrb.mxu3 %v5491_v7 }
 0x873   :  { %2772 = vmatpush.msrb.mxu0 %v5494_v11  ;;  %2792 = vmatpush.msrb.mxu1 %v5497_v17 }
 0x874   :  { %2812 = vmatpush.msrb.mxu2 %v5500_v47  ;;  %2832 = vmatpush.msrb.mxu3 %v5503_v40 }
 0x875   :  { %2773 = vmatpush.msrb.mxu0 %v5506_v8  ;;  %2793 = vmatpush.msrb.mxu1 %v5509_v30 }
 0x876   :  { %2813 = vmatpush.msrb.mxu2 %v5512_v5  ;;  %2833 = vmatpush.msrb.mxu3 %v5515_v57 }
 0x877   :  { %2774 = vmatpush.msrb.mxu0 %v5518_v4  ;;  %2794 = vmatpush.msrb.mxu1 %v5521_v61 }
 0x878   :  { %2814 = vmatpush.msrb.mxu2 %v5524_v58  ;;  %2834 = vmatpush.msrb.mxu3 %v5527_v35 }
 0x879   :  { %2775 = vmatpush.msrb.mxu0 %v5530_v14  ;;  %2795 = vmatpush.msrb.mxu1 %v5533_v33 }
 0x87a   :  { %2815 = vmatpush.msrb.mxu2 %v5536_v60  ;;  %2835 = vmatpush.msrb.mxu3 %v5539_v48 }
 0x87b   :  { %2776 = vmatpush.msrb.mxu0 %v5542_v62  ;;  %2796 = vmatpush.msrb.mxu1 %v5545_v38 }
 0x87c   :  { %2816 = vmatpush.msrb.mxu2 %v5548_v26  ;;  %2836 = vmatpush.msrb.mxu3 %v5551_v18 }
 0x87d   :  { %2777 = vmatpush.msrb.mxu0 %v5554_v15  ;;  %2797 = vmatpush.msrb.mxu1 %v5557_v16 }
 0x87e   :  { %2817 = vmatpush.msrb.mxu2 %v5560_v37  ;;  %2837 = vmatpush.msrb.mxu3 %v5563_v46 }
 0x87f   :  { %2778 = vmatpush.msrb.mxu0 %v5566_v24  ;;  %2798 = vmatpush.msrb.mxu1 %v5569_v56 }
 0x880   :  { %2818 = vmatpush.msrb.mxu2 %v6637_v3  ;;  %2838 = vmatpush.msrb.mxu3 %v6638_v39 }
 0x881   :  { %2779 = vmatpush.msrb.mxu0 %v6639_v10  ;;  %2799 = vmatpush.msrb.mxu1 %v6640_v34 }
 0x882   :  { %2819 = vmatpush.msrb.mxu2 %v6641_v19  ;;  %2839 = vmatpush.msrb.mxu3 %v6642_v54 }
 0x883   :  { %2780 = vmatpush.msrb.mxu0 %v6643_v45  ;;  %2800 = vmatpush.msrb.mxu1 %v6644_v53 }
 0x884   :  { %2820 = vmatpush.msrb.mxu2 %v6645_v9  ;;  %2840 = vmatpush.msrb.mxu3 %v6646_v59  ;;  %v6668_v9 = vld [vmem:[#allocation66_spill] sm:$0xff] }
 0x885   :  { %2781 = vmatpush.msrb.mxu0 %v6647_v50  ;;  %2801 = vmatpush.msrb.mxu1 %v6648_v29 }
 0x886   :  { %2821 = vmatpush.msrb.mxu2 %v6649_v2  ;;  %2841 = vmatpush.msrb.mxu3 %v6650_v49  ;;  %v6666_v2 = vld [vmem:[#allocation62_spill] sm:$0xff] }
 0x887   :  { %2782 = vmatpush.msrb.mxu0 %v6651_v31  ;;  %2802 = vmatpush.msrb.mxu1 %v6652_v63  ;;  %v6662_v31 = vld [vmem:[#allocation48_spill] sm:$0xff]  ;;  %v6663_v63 = vld [vmem:[#allocation54_spill] sm:$0xff] }
 0x888   :  { %2822 = vmatpush.msrb.mxu2 %v6653_v55  ;;  %2842 = vmatpush.msrb.mxu3 %v6654_v12  ;;  %v6664_v55 = vld [vmem:[#allocation55_spill] sm:$0xff]  ;;  %v6665_v12 = vld [vmem:[#allocation37_spill] sm:$0xff] }
 0x889   :  { %2783 = vmatpush.msrb.mxu0 %v6655_v25  ;;  %2803 = vmatpush.msrb.mxu1 %v6656_v6  ;;  %v1683_v49 = vadd.f32 %v6664_v55, %v6663_v63  ;;  %v1724_v25 = vadd.f32 %v6666_v2, %v6665_v12 }
 0x88a   :  { %2823 = vmatpush.msrb.mxu2 %v6657_v0  ;;  %2843 = vmatpush.msrb.mxu3 %v6658_v21 }
 0x88b   :  { %2784 = vmatpush.msrb.mxu0 %v6659_v36  ;;  %2804 = vmatpush.msrb.mxu1 %v6660_v32  ;;  %v6667_v36 = vld [vmem:[#allocation68_spill] sm:$0xff] }
 0x88c   :  { %2824 = vmatpush.msrb.mxu2 %v6661_v44  ;;  %2844 = vmatpush.msrb.mxu3 %v6662_v31  ;;  %v1806_v32 = vadd.f32 %v6668_v9, %v6667_v36 }
 0x8e8   :  { %v2490_v29 = vpop.f32.mrf.mxu0  ;;  %v2510_v6 = vpop.f32.mrf.mxu1 }
 0x8e9   :  { %v2553_v50 = vadd.f32 %v2490_v29, %v1683_v49  ;;  %v2554_v0 = vadd.f32 %v2510_v6, %v1724_v25  ;;  %v6669_v49 = vld [vmem:[#allocation70_spill] sm:$0xff] }
 0x8eb   :  { %v3221_v59 = vmul.f32 -1.442695, %v2553_v50  ;;  %v3222_v21 = vmul.f32 -1.442695, %v2554_v0  ;;  %v6670_v50 = vld [vmem:[#allocation43_spill] sm:$0xff] }
 0x8ec   :  { %v1765_v25 = vadd.f32 %v6670_v50, %v6669_v49 }
 0x8ed   :  { %3439 = vpow2.f32 %v3221_v59 }
 0x8ee   :  { %3441 = vpow2.f32 %v3222_v21 }
 0x8ef   :  { %v2550_v44 = vpop.f32.mrf.mxu3  ;;  %v2530_v2 = vpop.f32.mrf.mxu2 }
 0x8f0   :  { %v2556_v53 = vadd.f32 %v2550_v44, %v1806_v32  ;;  %v2555_v0 = vadd.f32 %v2530_v2, %v1765_v25 }
 0x8f2   :  { %v3223_v31 = vmul.f32 -1.442695, %v2556_v53 }
 0x8f3   :  { %v3440_v45 = vpop.eup %3439 }
 0x8f4   :  { %v3442_v54 = vpop.eup %3441  ;;  %v2560_v55 = vadd.f32 1.0, %v3440_v45  ;;  %3443 = vpow2.f32 %v3223_v31 }
 0x8f5   :  { %v2579_v63 = vadd.f32 1.0, %v3442_v54 }
 0x8f6   :  { %3445 = vrcp.f32 %v2560_v55  ;;  %v2572_v36 = vand.u32 2147483648, %v2560_v55  ;;  %v2570_v31 = vand.u32 2147483647, %v2560_v55  ;;  %vm2566_vm4 = vweird.f32 %v2560_v55 }
 0x8f7   :  { %3447 = vrcp.f32 %v2579_v63  ;;  %v2591_v45 = vand.u32 2147483648, %v2579_v63  ;;  %v2589_v19 = vand.u32 2147483647, %v2579_v63  ;;  %vm2585_vm5 = vweird.f32 %v2579_v63 }
 0x8f8   :  { %v2573_v2 = vor.u32 1.1754944e-38, %v2572_v36  ;;  %vm2571_vm8 = vcmp.eq.f32.partialorder %v2570_v31, 8.507059e+37 }
 0x8f9   :  { %vm2590_vm9 = vcmp.eq.f32.partialorder %v2589_v19, 8.507059e+37 }
 0x8fa   :  { %v3444_v29 = vpop.eup %3443 }
 0x8fb   :  { %v2599_v59 = vadd.f32 1.0, %v3444_v29 }
 0x8fc   :  { %v3446_v6 = vpop.eup %3445 }
 0x8fd   :  { %v3448_v9 = vpop.eup %3447  ;;  %v2562_v21 = vmul.f32 %v3446_v6, %v2560_v55  ;;  %3449 = vrcp.f32 %v2599_v59  ;;  %vm2567_vm2 = vweird.f32 %v3446_v6  ;;  %vm2605_vm11 = vweird.f32 %v2599_v59 }
 0x8fe   :  { %v2581_v44 = vmul.f32 %v3448_v9, %v2579_v63  ;;  %3451 = vtanh.f32 %v2555_v0  ;;  %vm2586_vm3 = vweird.f32 %v3448_v9  ;;  %vm2568_vm6 = vmor %vm2566_vm4, %vm2567_vm2  ;;  %v2609_v36 = vand.u32 2147483647, %v2599_v59 }
 0x8ff   :  { %v2563_v53 = vsub.f32 1.0, %v2562_v21  ;;  %vm2587_vm7 = vmor %vm2585_vm5, %vm2586_vm3  ;;  %v2592_v21 = vor.u32 1.1754944e-38, %v2591_v45 }
 0x900   :  { %v2582_v32 = vsub.f32 1.0, %v2581_v44  ;;  %vm2610_vm13 = vcmp.eq.f32.partialorder %v2609_v36, 8.507059e+37 }
 0x901   :  { %v2564_v54 = vmul.f32 %v3446_v6, %v2563_v53 }
 0x902   :  { %v2583_v12 = vmul.f32 %v3448_v9, %v2582_v32 }
 0x903   :  { %v3450_v34 = vpop.eup %3449  ;;  %v2565_v50 = vadd.f32 %v3446_v6, %v2564_v54 }
 0x904   :  { %v2584_v29 = vadd.f32 %v3448_v9, %v2583_v12  ;;  %v2601_v25 = vmul.f32 %v3450_v34, %v2599_v59  ;;  %v3452_v0 = vpop.eup %3451  ;;  %vm2606_vm10 = vweird.f32 %v3450_v34  ;;  %v2611_v12 = vand.u32 2147483648, %v2599_v59 }
 0x905   :  { %v2569_v44 = vsel %vm2568_vm6, %v3446_v6, %v2565_v50  ;;  %vm2607_vm12 = vmor %vm2605_vm11, %vm2606_vm10 }
 0x906   :  { %v2574_v49 = vsel %vm2571_vm8, %v2573_v2, %v2569_v44  ;;  %v2588_v53 = vsel %vm2587_vm7, %v3448_v9, %v2584_v29  ;;  %v2602_v10 = vsub.f32 1.0, %v2601_v25  ;;  %v2612_v45 = vor.u32 1.1754944e-38, %v2611_v12  ;;  %v6703_v44 = vld [vmem:[#allocation70_spill] sm:$0xff] }
 0x907   :  { %v2593_v32 = vsel %vm2590_vm9, %v2592_v21, %v2588_v53  ;;  %v2616_v39 = vmul.f32 %v3452_v0, %v2574_v49  ;;  %v6704_v0 = vld [vmem:[#allocation56_spill] sm:$0xff] }
 0x908   :  { %v2615_v3 = vmul.f32 %v2593_v32, %v5741_v51  ;;  %v2603_v54 = vmul.f32 %v3450_v34, %v2602_v10  ;;  %v6701_v51 = vld [vmem:[#allocation68_spill] sm:$0xff]  ;;  %v1768_v53 = vadd.f32 %v6704_v0, %v6703_v44  ;;  %v6707_v0 = vld [vmem:[#allocation46_spill] sm:$0xff] }
 0x90a   :  { %v5823_v55 = vadd.f32 %v2616_v39, %v2615_v3  ;;  %v2604_v63 = vadd.f32 %v3450_v34, %v2603_v54  ;;  %v6702_v3 = vld [vmem:[#allocation42_spill] sm:$0xff] }
 0x90b   :  { %v1809_v39 = vadd.f32 %v6702_v3, %v6701_v51 }
 0x90c   :  { %3453 = vtanh.f32 %v5823_v55  ;;  %v2608_v6 = vsel %vm2607_vm12, %v3450_v34, %v2604_v63 }
 0x90d   :  { %v2613_v9 = vsel %vm2610_vm13, %v2612_v45, %v2608_v6 }
 0x912   :  { %v3454_v19 = vpop.eup %3453 }
 0x913   :  { %v5826_v31 = vmul.f32 %v3454_v19, %v2613_v9 }
 0x915   :  { %2637 = vmatmul.f32.vlgmr.msra.gmra.mxu0 %v5826_v31  ;;  %2657 = vmatmul.f32.vlgmr.msra.gmra.mxu1 %v5826_v31 }
 0x916   :  { %2677 = vmatmul.f32.vlgmr.msra.gmra.mxu2 %v5826_v31  ;;  %2697 = vmatmul.f32.vlgmr.msra.gmra.mxu3 %v5826_v31 }
 0x917   :  { %2917 = vmatpush.msra.mxu0 %v5458_v28  ;;  %2937 = vmatpush.msra.mxu1 %v5461_v23  ;;  %v6671_v28 = vld [vmem:[#allocation57_spill] sm:$0xff]  ;;  %v6672_v23 = vld [vmem:[#allocation47_spill] sm:$0xff] }
 0x918   :  { %2957 = vmatpush.msra.mxu2 %v5464_v20  ;;  %2977 = vmatpush.msra.mxu3 %v5467_v43  ;;  %v6673_v20 = vld [vmem:[#allocation27_spill] sm:$0xff]  ;;  %v6674_v43 = vld [vmem:[#allocation28_spill] sm:$0xff] }
 0x919   :  { %2918 = vmatpush.msra.mxu0 %v5470_v27  ;;  %2938 = vmatpush.msra.mxu1 %v5473_v1  ;;  %v6675_v27 = vld [vmem:[#allocation31_spill] sm:$0xff]  ;;  %v6676_v1 = vld [vmem:[#allocation21_spill] sm:$0xff] }
 0x91a   :  { %2958 = vmatpush.msra.mxu2 %v5476_v22  ;;  %2978 = vmatpush.msra.mxu3 %v5479_v41  ;;  %v6677_v22 = vld [vmem:[#allocation14_spill] sm:$0xff]  ;;  %v6678_v41 = vld [vmem:[#allocation35_spill] sm:$0xff] }
 0x91b   :  { %2919 = vmatpush.msra.mxu0 %v5482_v52  ;;  %2939 = vmatpush.msra.mxu1 %v5485_v42  ;;  %v6679_v52 = vld [vmem:[#allocation16_spill] sm:$0xff] }
 0x91c   :  { %2959 = vmatpush.msra.mxu2 %v5488_v13  ;;  %2979 = vmatpush.msra.mxu3 %v5491_v7  ;;  %v6680_v42 = vld [vmem:[#allocation20_spill] sm:$0xff]  ;;  %v6681_v13 = vld [vmem:[#allocation34_spill] sm:$0xff] }
 0x91d   :  { %2920 = vmatpush.msra.mxu0 %v5494_v11  ;;  %2940 = vmatpush.msra.mxu1 %v5497_v17  ;;  %v6682_v7 = vld [vmem:[#allocation26_spill] sm:$0xff]  ;;  %v6684_v17 = vld [vmem:[#allocation32_spill] sm:$0xff] }
 0x91e   :  { %2960 = vmatpush.msra.mxu2 %v5500_v47  ;;  %2980 = vmatpush.msra.mxu3 %v5503_v40  ;;  %v6683_v11 = vld [vmem:[#allocation18_spill] sm:$0xff]  ;;  %v6685_v47 = vld [vmem:[#allocation25_spill] sm:$0xff] }
 0x91f   :  { %2921 = vmatpush.msra.mxu0 %v5506_v8  ;;  %2941 = vmatpush.msra.mxu1 %v5509_v30  ;;  %v6686_v40 = vld [vmem:[#allocation30_spill] sm:$0xff]  ;;  %v6687_v8 = vld [vmem:[#allocation19_spill] sm:$0xff]  ;;  %v6688_v30 = vld [vmem:[#allocation29_spill] sm:$0xff] }
 0x920   :  { %2961 = vmatpush.msra.mxu2 %v5512_v5  ;;  %2981 = vmatpush.msra.mxu3 %v5515_v57  ;;  %v6689_v5 = vld [vmem:[#allocation23_spill] sm:$0xff]  ;;  %v6690_v57 = vld [vmem:[#allocation22_spill] sm:$0xff] }
 0x921   :  { %2922 = vmatpush.msra.mxu0 %v5518_v4  ;;  %2942 = vmatpush.msra.mxu1 %v5521_v61  ;;  %v6691_v4 = vld [vmem:[#allocation41_spill] sm:$0xff]  ;;  %v6692_v61 = vld [vmem:[#allocation36_spill] sm:$0xff] }
 0x922   :  { %2962 = vmatpush.msra.mxu2 %v5524_v58  ;;  %2982 = vmatpush.msra.mxu3 %v5527_v35  ;;  %v6693_v58 = vld [vmem:[#allocation15_spill] sm:$0xff]  ;;  %v6694_v35 = vld [vmem:[#allocation40_spill] sm:$0xff] }
 0x923   :  { %2923 = vmatpush.msra.mxu0 %v5530_v14  ;;  %2943 = vmatpush.msra.mxu1 %v5533_v33  ;;  %v6695_v14 = vld [vmem:[#allocation51_spill] sm:$0xff]  ;;  %v6696_v33 = vld [vmem:[#allocation48_spill] sm:$0xff] }
 0x924   :  { %2963 = vmatpush.msra.mxu2 %v5536_v60  ;;  %2983 = vmatpush.msra.mxu3 %v5539_v48  ;;  %v6697_v60 = vld [vmem:[#allocation54_spill] sm:$0xff]  ;;  %v6698_v48 = vld [vmem:[#allocation17_spill] sm:$0xff] }
 0x925   :  { %2924 = vmatpush.msra.mxu0 %v5542_v62  ;;  %2944 = vmatpush.msra.mxu1 %v5545_v38  ;;  %v1686_v62 = vadd.f32 %v6698_v48, %v6697_v60  ;;  %v6699_v38 = vld [vmem:[#allocation37_spill] sm:$0xff] }
 0x926   :  { %2964 = vmatpush.msra.mxu2 %v5548_v26  ;;  %2984 = vmatpush.msra.mxu3 %v5551_v18  ;;  %v6700_v26 = vld [vmem:[#allocation33_spill] sm:$0xff] }
 0x927   :  { %2925 = vmatpush.msra.mxu0 %v5554_v15  ;;  %2945 = vmatpush.msra.mxu1 %v5557_v16  ;;  %v1727_v18 = vadd.f32 %v6700_v26, %v6699_v38 }
 0x928   :  { %2965 = vmatpush.msra.mxu2 %v5560_v37  ;;  %2985 = vmatpush.msra.mxu3 %v5563_v46 }
 0x929   :  { %2926 = vmatpush.msra.mxu0 %v5566_v24  ;;  %2946 = vmatpush.msra.mxu1 %v5569_v56 }
 0x92a   :  { %2966 = vmatpush.msra.mxu2 %v6671_v28  ;;  %2986 = vmatpush.msra.mxu3 %v6672_v23 }
 0x92b   :  { %2927 = vmatpush.msra.mxu0 %v6673_v20  ;;  %2947 = vmatpush.msra.mxu1 %v6674_v43 }
 0x92c   :  { %2967 = vmatpush.msra.mxu2 %v6675_v27  ;;  %2987 = vmatpush.msra.mxu3 %v6676_v1 }
 0x92d   :  { %2928 = vmatpush.msra.mxu0 %v6677_v22  ;;  %2948 = vmatpush.msra.mxu1 %v6678_v41 }
 0x92e   :  { %2968 = vmatpush.msra.mxu2 %v6679_v52  ;;  %2988 = vmatpush.msra.mxu3 %v6680_v42 }
 0x92f   :  { %2929 = vmatpush.msra.mxu0 %v6681_v13  ;;  %2949 = vmatpush.msra.mxu1 %v6682_v7 }
 0x930   :  { %2969 = vmatpush.msra.mxu2 %v6683_v11  ;;  %2989 = vmatpush.msra.mxu3 %v6684_v17 }
 0x931   :  { %2930 = vmatpush.msra.mxu0 %v6685_v47  ;;  %2950 = vmatpush.msra.mxu1 %v6686_v40 }
 0x932   :  { %2970 = vmatpush.msra.mxu2 %v6687_v8  ;;  %2990 = vmatpush.msra.mxu3 %v6688_v30 }
 0x933   :  { %2931 = vmatpush.msra.mxu0 %v6689_v5  ;;  %2951 = vmatpush.msra.mxu1 %v6690_v57 }
 0x934   :  { %2971 = vmatpush.msra.mxu2 %v6691_v4  ;;  %2991 = vmatpush.msra.mxu3 %v6692_v61 }
 0x935   :  { %2932 = vmatpush.msra.mxu0 %v6693_v58  ;;  %2952 = vmatpush.msra.mxu1 %v6694_v35 }
 0x936   :  { %2972 = vmatpush.msra.mxu2 %v6695_v14  ;;  %2992 = vmatpush.msra.mxu3 %v6696_v33 }
 0x992   :  { %v2638_v15 = vpop.f32.mrf.mxu0  ;;  %v2658_v16 = vpop.f32.mrf.mxu1 }
 0x993   :  { %v2701_v37 = vadd.f32 %v2638_v15, %v1686_v62  ;;  %v2702_v46 = vadd.f32 %v2658_v16, %v1727_v18  ;;  %v3087_v18 = vld [vmem:[#allocation8 + $0x70] sm:$0xff]  ;;  %v3086_v15 = vld [vmem:[#allocation8 + $0x68] sm:$0xff]  ;;  %v3085_v16 = vld [vmem:[#allocation8 + $0x60] sm:$0xff] }
 0x995   :  { %v3224_v24 = vmul.f32 -1.442695, %v2701_v37  ;;  %v3225_v56 = vmul.f32 -1.442695, %v2702_v46  ;;  %v3084_v37 = vld [vmem:[#allocation8 + $0x58] sm:$0xff]  ;;  %v6705_v46 = vld [vmem:[#allocation58_spill] sm:$0xff] }
 0x997   :  { %3455 = vpow2.f32 %v3224_v24  ;;  %v1689_v24 = vadd.f32 %v6705_v46, %v6697_v60 }
 0x998   :  { %3457 = vpow2.f32 %v3225_v56  ;;  %v6706_v56 = vld [vmem:[#allocation63_spill] sm:$0xff] }
 0x999   :  { %v2698_v10 = vpop.f32.mrf.mxu3  ;;  %v2678_v25 = vpop.f32.mrf.mxu2  ;;  %v1730_v3 = vadd.f32 %v6706_v56, %v6699_v38 }
 0x99a   :  { %v2704_v34 = vadd.f32 %v2698_v10, %v1809_v39  ;;  %v2703_v63 = vadd.f32 %v2678_v25, %v1768_v53  ;;  %v3081_v25 = vld [vmem:[#allocation8 + $0x40] sm:$0xff]  ;;  %v1812_v53 = vadd.f32 %v6707_v0, %v6701_v51 }
 0x99c   :  { %v3226_v49 = vmul.f32 -1.442695, %v2704_v34  ;;  %v3083_v34 = vld [vmem:[#allocation8 + $0x50] sm:$0xff] }
 0x99d   :  { %v3456_v59 = vpop.eup %3455 }
 0x99e   :  { %v3458_v50 = vpop.eup %3457  ;;  %v2708_v2 = vadd.f32 1.0, %v3456_v59  ;;  %3459 = vpow2.f32 %v3226_v49 }
 0x99f   :  { %v2727_v29 = vadd.f32 1.0, %v3458_v50  ;;  %v3082_v50 = vld [vmem:[#allocation8 + $0x48] sm:$0xff] }
 0x9a0   :  { %3461 = vrcp.f32 %v2708_v2  ;;  %v2720_v9 = vand.u32 2147483648, %v2708_v2  ;;  %v2718_v20 = vand.u32 2147483647, %v2708_v2  ;;  %vm2714_vm0 = vweird.f32 %v2708_v2 }
 0x9a1   :  { %3463 = vrcp.f32 %v2727_v29  ;;  %v2739_v28 = vand.u32 2147483648, %v2727_v29  ;;  %v2737_v27 = vand.u32 2147483647, %v2727_v29  ;;  %vm2733_vm1 = vweird.f32 %v2727_v29 }
 0x9a2   :  { %v2721_v41 = vor.u32 1.1754944e-38, %v2720_v9  ;;  %vm2719_vm4 = vcmp.eq.f32.partialorder %v2718_v20, 8.507059e+37  ;;  %v3075_v20 = vld [vmem:[#allocation8 + $0x10] sm:$0xff] }
 0x9a3   :  { %v2740_v13 = vor.u32 1.1754944e-38, %v2739_v28  ;;  %vm2738_vm5 = vcmp.eq.f32.partialorder %v2737_v27, 8.507059e+37 }
 0x9a4   :  { %v3460_v21 = vpop.eup %3459 }
 0x9a5   :  { %v2747_v32 = vadd.f32 1.0, %v3460_v21  ;;  %v3080_v21 = vld [vmem:[#allocation8 + $0x38] sm:$0xff] }
 0x9a6   :  { %v3462_v54 = vpop.eup %3461 }
 0x9a7   :  { %v3464_v12 = vpop.eup %3463  ;;  %v2710_v36 = vmul.f32 %v3462_v54, %v2708_v2  ;;  %3465 = vrcp.f32 %v2747_v32  ;;  %vm2715_vm14 = vweird.f32 %v3462_v54  ;;  %v2759_v58 = vand.u32 2147483648, %v2747_v32 }
 0x9a8   :  { %v2729_v6 = vmul.f32 %v3464_v12, %v2727_v29  ;;  %3467 = vtanh.f32 %v2703_v63  ;;  %vm2734_vm15 = vweird.f32 %v3464_v12  ;;  %vm2716_vm2 = vmor %vm2714_vm0, %vm2715_vm14  ;;  %vm2753_vm7 = vweird.f32 %v2747_v32 }
 0x9a9   :  { %v2711_v45 = vsub.f32 1.0, %v2710_v36  ;;  %vm2735_vm3 = vmor %vm2733_vm1, %vm2734_vm15  ;;  %v2757_v35 = vand.u32 2147483647, %v2747_v32  ;;  %v2760_v33 = vor.u32 1.1754944e-38, %v2759_v58 }
 0x9aa   :  { %v2730_v19 = vsub.f32 1.0, %v2729_v6  ;;  %v3077_v6 = vld [vmem:[#allocation8 + $0x20] sm:$0xff] }
 0x9ab   :  { %v2712_v23 = vmul.f32 %v3462_v54, %v2711_v45  ;;  %vm2758_vm9 = vcmp.eq.f32.partialorder %v2757_v35, 8.507059e+37 }
 0x9ac   :  { %v2731_v43 = vmul.f32 %v3464_v12, %v2730_v19 }
 0x9ad   :  { %v3466_v1 = vpop.eup %3465  ;;  %v2713_v22 = vadd.f32 %v3462_v54, %v2712_v23  ;;  %v3076_v23 = vld [vmem:[#allocation8 + $0x18] sm:$0xff] }
 0x9ae   :  { %v2732_v52 = vadd.f32 %v3464_v12, %v2731_v43  ;;  %v2749_v42 = vmul.f32 %v3466_v1, %v2747_v32  ;;  %v3468_v11 = vpop.eup %3467  ;;  %vm2754_vm6 = vweird.f32 %v3466_v1  ;;  %v3079_v32 = vld [vmem:[#allocation8 + $0x30] sm:$0xff]  ;;  %v3074_v43 = vld [vmem:[#allocation8 + $0x8] sm:$0xff] }
 0x9af   :  { %v2717_v7 = vsel %vm2716_vm2, %v3462_v54, %v2713_v22  ;;  %vm2755_vm8 = vmor %vm2753_vm7, %vm2754_vm6  ;;  %v6708_v22 = vld [vmem:[#allocation49_spill] sm:$0xff] }
 0x9b0   :  { %v2722_v17 = vsel %vm2719_vm4, %v2721_v41, %v2717_v7  ;;  %v2736_v47 = vsel %vm2735_vm3, %v3464_v12, %v2732_v52  ;;  %v2750_v40 = vsub.f32 1.0, %v2749_v42  ;;  %v3078_v12 = vld [vmem:[#allocation8 + $0x28] sm:$0xff]  ;;  %v1771_v41 = vadd.f32 %v6708_v22, %v6703_v44  ;;  %v3073_v52 = vld [vmem:[#allocation8] sm:$0xff] }
 0x9b1   :  { %v2741_v8 = vsel %vm2738_vm5, %v2740_v13, %v2736_v47  ;;  %v2764_v30 = vmul.f32 %v3468_v11, %v2722_v17 }
 0x9b2   :  { %v2763_v5 = vmul.f32 %v2741_v8, %v5823_v55  ;;  %v2751_v57 = vmul.f32 %v3466_v1, %v2750_v40  ;;  %v3088_v55 = vld [vmem:[#allocation8 + $0x78] sm:$0xff] }
 0x9b4   :  { %v5905_v4 = vadd.f32 %v2764_v30, %v2763_v5  ;;  %v2752_v61 = vadd.f32 %v3466_v1, %v2751_v57 }
 0x9b6   :  { %3469 = vtanh.f32 %v5905_v4  ;;  %v2756_v14 = vsel %vm2755_vm8, %v3466_v1, %v2752_v61 }
 0x9b7   :  { %v2761_v62 = vsel %vm2758_vm9, %v2760_v33, %v2756_v14 }
 0x9bc   :  { %v3470_v48 = vpop.eup %3469 }
 0x9bd   :  { %v5908_v26 = vmul.f32 %v3470_v48, %v2761_v62 }
 0x9bf   :  { %2785 = vmatmul.f32.vlgmr.msrb.gmra.mxu0 %v5908_v26  ;;  %2805 = vmatmul.f32.vlgmr.msrb.gmra.mxu1 %v5908_v26 }
 0x9c0   :  { %2825 = vmatmul.f32.vlgmr.msrb.gmra.mxu2 %v5908_v26  ;;  %2845 = vmatmul.f32.vlgmr.msrb.gmra.mxu3 %v5908_v26 }
 0x9c1   :  { %3093 = vmatpush.msrb.mxu0 %v3088_v55 }
 0x9c3   :  { %3094 = vmatpush.msrb.mxu0 %v3087_v18 }
 0x9c5   :  { %3095 = vmatpush.msrb.mxu0 %v3086_v15 }
 0x9c7   :  { %3096 = vmatpush.msrb.mxu0 %v3085_v16 }
 0x9c9   :  { %3097 = vmatpush.msrb.mxu0 %v3084_v37 }
 0x9cb   :  { %3098 = vmatpush.msrb.mxu0 %v3083_v34 }
 0x9cd   :  { %3099 = vmatpush.msrb.mxu0 %v3082_v50 }
 0x9cf   :  { %3100 = vmatpush.msrb.mxu0 %v3081_v25 }
 0x9d1   :  { %3101 = vmatpush.msrb.mxu0 %v3080_v21 }
 0x9d3   :  { %3102 = vmatpush.msrb.mxu0 %v3079_v32  ;;  %v6711_v32 = vld [vmem:[#allocation44_spill] sm:$0xff] }
 0x9d5   :  { %3103 = vmatpush.msrb.mxu0 %v3078_v12 }
 0x9d7   :  { %3104 = vmatpush.msrb.mxu0 %v3077_v6 }
 0x9d9   :  { %3105 = vmatpush.msrb.mxu0 %v3076_v23 }
 0x9db   :  { %3106 = vmatpush.msrb.mxu0 %v3075_v20 }
 0x9dd   :  { %3107 = vmatpush.msrb.mxu0 %v3074_v43 }
 0x9df   :  { %3108 = vmatpush.msrb.mxu0 %v3073_v52 }
 0xa3c   :  { %v2786_v39 = vpop.f32.mrf.mxu0  ;;  %v2806_v10 = vpop.f32.mrf.mxu1 }
 0xa3d   :  { %v2849_v49 = vadd.f32 %v2786_v39, %v1689_v24  ;;  %v2850_v59 = vadd.f32 %v2806_v10, %v1730_v3 }
 0xa3f   :  { %v3227_v2 = vmul.f32 -1.442695, %v2849_v49  ;;  %v3228_v29 = vmul.f32 -1.442695, %v2850_v59 }
 0xa41   :  { %3471 = vpow2.f32 %v3227_v2 }
 0xa42   :  { %3473 = vpow2.f32 %v3228_v29 }
 0xa43   :  { %v2846_v54 = vpop.f32.mrf.mxu3  ;;  %v2826_v27 = vpop.f32.mrf.mxu2 }
 0xa44   :  { %v2852_v63 = vadd.f32 %v2846_v54, %v1812_v53  ;;  %v2851_v7 = vadd.f32 %v2826_v27, %v1771_v41  ;;  %v6710_v53 = vld [vmem:[#allocation24_spill] sm:$0xff]  ;;  %v6712_v54 = vld [vmem:[#allocation59_spill] sm:$0xff] }
 0xa46   :  { %v3229_v36 = vmul.f32 -1.442695, %v2852_v63  ;;  %v6713_v63 = vld [vmem:[#allocation13_spill] sm:$0xff] }
 0xa47   :  { %v3472_v45 = vpop.eup %3471  ;;  %v1692_v12 = vadd.f32 %v6713_v63, %v6697_v60 }
 0xa48   :  { %v3474_v19 = vpop.eup %3473  ;;  %v2856_v9 = vadd.f32 1.0, %v3472_v45  ;;  %3475 = vpow2.f32 %v3229_v36  ;;  %v6714_v36 = vld [vmem:[#allocation45_spill] sm:$0xff] }
 0xa49   :  { %v2875_v28 = vadd.f32 1.0, %v3474_v19  ;;  %v1733_v6 = vadd.f32 %v6714_v36, %v6699_v38 }
 0xa4a   :  { %3477 = vrcp.f32 %v2856_v9  ;;  %v2868_v30 = vand.u32 2147483648, %v2856_v9  ;;  %v2866_v61 = vand.u32 2147483647, %v2856_v9  ;;  %vm2862_vm12 = vweird.f32 %v2856_v9 }
 0xa4b   :  { %3479 = vrcp.f32 %v2875_v28  ;;  %v2887_v5 = vand.u32 2147483648, %v2875_v28  ;;  %v2885_v35 = vand.u32 2147483647, %v2875_v28  ;;  %vm2881_vm13 = vweird.f32 %v2875_v28 }
 0xa4c   :  { %v2869_v48 = vor.u32 1.1754944e-38, %v2868_v30  ;;  %vm2867_vm0 = vcmp.eq.f32.partialorder %v2866_v61, 8.507059e+37 }
 0xa4d   :  { %v2888_v18 = vor.u32 1.1754944e-38, %v2887_v5  ;;  %vm2886_vm1 = vcmp.eq.f32.partialorder %v2885_v35, 8.507059e+37 }
 0xa4e   :  { %v3476_v1 = vpop.eup %3475 }
 0xa4f   :  { %v2895_v42 = vadd.f32 1.0, %v3476_v1 }
 0xa50   :  { %v3478_v13 = vpop.eup %3477 }
 0xa51   :  { %v3480_v11 = vpop.eup %3479  ;;  %v2858_v17 = vmul.f32 %v3478_v13, %v2856_v9  ;;  %3481 = vrcp.f32 %v2895_v42  ;;  %vm2863_vm10 = vweird.f32 %v3478_v13  ;;  %v2907_v59 = vand.u32 2147483648, %v2895_v42 }
 0xa52   :  { %v2877_v47 = vmul.f32 %v3480_v11, %v2875_v28  ;;  %3483 = vtanh.f32 %v2851_v7  ;;  %vm2882_vm11 = vweird.f32 %v3480_v11  ;;  %vm2864_vm14 = vmor %vm2862_vm12, %vm2863_vm10  ;;  %vm2901_vm3 = vweird.f32 %v2895_v42 }
 0xa53   :  { %v2859_v40 = vsub.f32 1.0, %v2858_v17  ;;  %vm2883_vm15 = vmor %vm2881_vm13, %vm2882_vm11  ;;  %v2905_v50 = vand.u32 2147483647, %v2895_v42  ;;  %v2908_v29 = vor.u32 1.1754944e-38, %v2907_v59 }
 0xa54   :  { %v2878_v8 = vsub.f32 1.0, %v2877_v47  ;;  %v6716_v47 = vld [vmem:[#allocation69_spill] sm:$0xff] }
 0xa55   :  { %v2860_v57 = vmul.f32 %v3478_v13, %v2859_v40  ;;  %vm2906_vm5 = vcmp.eq.f32.partialorder %v2905_v50, 8.507059e+37  ;;  %v1774_v40 = vadd.f32 %v6716_v47, %v6703_v44 }
 0xa56   :  { %v2879_v58 = vmul.f32 %v3480_v11, %v2878_v8 }
 0xa57   :  { %v3482_v14 = vpop.eup %3481  ;;  %v2861_v33 = vadd.f32 %v3478_v13, %v2860_v57 }
 0xa58   :  { %v2880_v62 = vadd.f32 %v3480_v11, %v2879_v58  ;;  %v2897_v55 = vmul.f32 %v3482_v14, %v2895_v42  ;;  %v3484_v16 = vpop.eup %3483  ;;  %vm2902_vm2 = vweird.f32 %v3482_v14 }
 0xa59   :  { %v2865_v15 = vsel %vm2864_vm14, %v3478_v13, %v2861_v33  ;;  %vm2903_vm4 = vmor %vm2901_vm3, %vm2902_vm2 }
 0xa5a   :  { %v2870_v37 = vsel %vm2867_vm0, %v2869_v48, %v2865_v15  ;;  %v2884_v46 = vsel %vm2883_vm15, %v3480_v11, %v2880_v62  ;;  %v2898_v24 = vsub.f32 1.0, %v2897_v55 }
 0xa5b   :  { %v2889_v56 = vsel %vm2886_vm1, %v2888_v18, %v2884_v46  ;;  %v2912_v3 = vmul.f32 %v3484_v16, %v2870_v37 }
 0xa5c   :  { %v2911_v39 = vmul.f32 %v2889_v56, %v5905_v4  ;;  %v2899_v10 = vmul.f32 %v3482_v14, %v2898_v24  ;;  %v6709_v4 = vld [vmem:[#allocation71_spill] sm:$0xff] }
 0xa5e   :  { %v5923_v34 = vadd.f32 %v2912_v3, %v2911_v39  ;;  %v2900_v49 = vadd.f32 %v3482_v14, %v2899_v10 }
 0xa60   :  { %3485 = vtanh.f32 %v5923_v34  ;;  %v2904_v2 = vsel %vm2903_vm4, %v3482_v14, %v2900_v49 }
 0xa61   :  { %v2909_v21 = vsel %vm2906_vm5, %v2908_v29, %v2904_v2 }
 0xa66   :  { %v3486_v25 = vpop.eup %3485 }
 0xa67   :  { %v2915_v0 = vmul.f32 %v3486_v25, %v2909_v21 }
 0xa69   :  { %2933 = vmatmul.f32.vlgmr.msra.gmra.mxu0 %v2915_v0  ;;  %2953 = vmatmul.f32.vlgmr.msra.gmra.mxu1 %v2915_v0 }
 0xa6a   :  { %2973 = vmatmul.f32.vlgmr.msra.gmra.mxu2 %v2915_v0  ;;  %2993 = vmatmul.f32.vlgmr.msra.gmra.mxu3 %v2915_v0 }
 0xa71   :  { %3109 = vmatmul.f32.vlgmr.msrb.gmra.mxu0 %v6709_v4 }
 0xa79   :  { %3112 = vmatmul.f32.gmra.mxu0 %v6710_v53 }
 0xa81   :  { %3115 = vmatmul.f32.gmra.mxu0 %v6711_v32 }
 0xa89   :  { %3118 = vmatmul.f32.gmra.mxu0 %v6712_v54 }
 0xa91   :  { %3121 = vmatmul.f32.gmra.mxu0 %v5826_v31  ;;  %v5939_v31 = vld [vmem:[%s5986_s8] ss:$0 sm:$0xff] }
 0xa99   :  { %3124 = vmatmul.f32.gmra.mxu0 %v5908_v26  ;;  %v6715_v26 = vld [vmem:[#allocation67_spill] sm:$0xff] }
 0xa9a   :  { %v1815_v43 = vadd.f32 %v6715_v26, %v6701_v51 }
 0xaa1   :  { %3127 = vmatmul.f32.gmra.mxu0 %v2915_v0 }
 0xae6   :  { %v2934_v45 = vpop.f32.mrf.mxu0  ;;  %v2954_v19 = vpop.f32.mrf.mxu1 }
 0xae7   :  { %v2997_v9 = vadd.f32 %v2934_v45, %v1692_v12  ;;  %v2998_v28 = vadd.f32 %v2954_v19, %v1733_v6 }
 0xae9   :  { %v3230_v23 = vmul.f32 -1.442695, %v2997_v9  ;;  %v3231_v20 = vmul.f32 -1.442695, %v2998_v28 }
 0xaeb   :  { %3487 = vpow2.f32 %v3230_v23 }
 0xaec   :  { %3489 = vpow2.f32 %v3231_v20 }
 0xaed   :  { %v2994_v60 = vpop.f32.mrf.mxu3  ;;  %v2974_v51 = vpop.f32.mrf.mxu2 }
 0xaee   :  { %v3000_v27 = vadd.f32 %v2994_v60, %v1815_v43  ;;  %v3110_v1 = vpop.f32.mrf.mxu0  ;;  %v2999_v5 = vadd.f32 %v2974_v51, %v1774_v40 }
 0xaef   :  { %v3111_v38 = vadd.f32 %v5939_v31, %v3110_v1 }
 0xaf0   :  { %v3232_v22 = vmul.f32 -1.442695, %v3000_v27 }
 0xaf1   :  { %v3488_v41 = vpop.eup %3487  ;;  %3134 = vst [vmem:[%s5987_s9] sm:$0xff] %v3111_v38 }
 0xaf2   :  { %v3490_v52 = vpop.eup %3489  ;;  %v3004_v42 = vadd.f32 1.0, %v3488_v41  ;;  %3491 = vpow2.f32 %v3232_v22 }
 0xaf3   :  { %v3023_v13 = vadd.f32 1.0, %v3490_v52 }
 0xaf4   :  { %3493 = vrcp.f32 %v3004_v42  ;;  %v3014_v33 = vand.u32 2147483647, %v3004_v42  ;;  %v3016_v48 = vand.u32 2147483648, %v3004_v42  ;;  %vm3010_vm8 = vweird.f32 %v3004_v42 }
 0xaf5   :  { %3495 = vrcp.f32 %v3023_v13  ;;  %v3035_v55 = vand.u32 2147483648, %v3023_v13  ;;  %v3033_v16 = vand.u32 2147483647, %v3023_v13  ;;  %vm3029_vm9 = vweird.f32 %v3023_v13 }
 0xaf6   :  { %v3113_v7 = vpop.f32.mrf.mxu0  ;;  %v3017_v24 = vor.u32 1.1754944e-38, %v3016_v48  ;;  %vm3015_vm12 = vcmp.eq.f32.partialorder %v3014_v33, 8.507059e+37 }
 0xaf7   :  { %v3114_v11 = vadd.f32 %v5939_v31, %v3113_v7  ;;  %v3036_v39 = vor.u32 1.1754944e-38, %v3035_v55  ;;  %vm3034_vm13 = vcmp.eq.f32.partialorder %v3033_v16, 8.507059e+37 }
 0xaf8   :  { %v3492_v17 = vpop.eup %3491 }
 0xaf9   :  { %v3043_v8 = vadd.f32 1.0, %v3492_v17  ;;  %3135 = vst [vmem:[%s5987_s9 + $0x8] sm:$0xff] %v3114_v11 }
 0xafa   :  { %v3494_v30 = vpop.eup %3493 }
 0xafb   :  { %v3496_v57 = vpop.eup %3495  ;;  %v3006_v61 = vmul.f32 %v3494_v30, %v3004_v42  ;;  %3497 = vrcp.f32 %v3043_v8  ;;  %vm3011_vm6 = vweird.f32 %v3494_v30  ;;  %v3055_v63 = vand.u32 2147483648, %v3043_v8 }
 0xafc   :  { %v3025_v58 = vmul.f32 %v3496_v57, %v3023_v13  ;;  %3499 = vtanh.f32 %v2999_v5  ;;  %vm3030_vm7 = vweird.f32 %v3496_v57  ;;  %vm3012_vm10 = vmor %vm3010_vm8, %vm3011_vm6  ;;  %vm3049_vm15 = vweird.f32 %v3043_v8 }
 0xafd   :  { %v3007_v35 = vsub.f32 1.0, %v3006_v61  ;;  %vm3031_vm11 = vmor %vm3029_vm9, %vm3030_vm7  ;;  %v3053_v12 = vand.u32 2147483647, %v3043_v8  ;;  %v3056_v45 = vor.u32 1.1754944e-38, %v3055_v63 }
 0xafe   :  { %v3026_v14 = vsub.f32 1.0, %v3025_v58  ;;  %v3116_v62 = vpop.f32.mrf.mxu0 }
 0xaff   :  { %v3008_v18 = vmul.f32 %v3494_v30, %v3007_v35  ;;  %v3117_v44 = vadd.f32 %v5939_v31, %v3116_v62  ;;  %vm3054_vm1 = vcmp.eq.f32.partialorder %v3053_v12, 8.507059e+37 }
 0xb00   :  { %v3027_v15 = vmul.f32 %v3496_v57, %v3026_v14 }
 0xb01   :  { %v3498_v37 = vpop.eup %3497  ;;  %v3009_v46 = vadd.f32 %v3494_v30, %v3008_v18  ;;  %3136 = vst [vmem:[%s5987_s9 + $0x10] sm:$0xff] %v3117_v44 }
 0xb02   :  { %v3028_v56 = vadd.f32 %v3496_v57, %v3027_v15  ;;  %v3045_v3 = vmul.f32 %v3498_v37, %v3043_v8  ;;  %v3500_v49 = vpop.eup %3499  ;;  %vm3050_vm14 = vweird.f32 %v3498_v37 }
 0xb03   :  { %v3013_v10 = vsel %vm3012_vm10, %v3494_v30, %v3009_v46  ;;  %vm3051_vm0 = vmor %vm3049_vm15, %vm3050_vm14 }
 0xb04   :  { %v3018_v59 = vsel %vm3015_vm12, %v3017_v24, %v3013_v10  ;;  %v3032_v50 = vsel %vm3031_vm11, %v3496_v57, %v3028_v56  ;;  %v3046_v2 = vsub.f32 1.0, %v3045_v3 }
 0xb05   :  { %v3037_v29 = vsel %vm3034_vm13, %v3036_v39, %v3032_v50  ;;  %v3060_v25 = vmul.f32 %v3500_v49, %v3018_v59 }
 0xb06   :  { %v3059_v21 = vmul.f32 %v3037_v29, %v5923_v34  ;;  %v3119_v0 = vpop.f32.mrf.mxu0  ;;  %v3047_v4 = vmul.f32 %v3498_v37, %v3046_v2 }
 0xb07   :  { %v3120_v53 = vadd.f32 %v5939_v31, %v3119_v0 }
 0xb08   :  { %v3061_v32 = vadd.f32 %v3060_v25, %v3059_v21  ;;  %v3048_v54 = vadd.f32 %v3498_v37, %v3047_v4 }
 0xb09   :  { %3137 = vst [vmem:[%s5987_s9 + $0x18] sm:$0xff] %v3120_v53 }
 0xb0a   :  { %3501 = vtanh.f32 %v3061_v32  ;;  %v3052_v36 = vsel %vm3051_vm0, %v3498_v37, %v3048_v54 }
 0xb0b   :  { %v3057_v9 = vsel %vm3054_vm1, %v3056_v45, %v3052_v36 }
 0xb0e   :  { %v3122_v6 = vpop.f32.mrf.mxu0 }
 0xb0f   :  { %v3123_v34 = vadd.f32 %v5939_v31, %v3122_v6 }
 0xb10   :  { %v3502_v19 = vpop.eup %3501 }
 0xb11   :  { %3138 = vst [vmem:[%s5987_s9 + $0x20] sm:$0xff] %v3123_v34  ;;  %v3063_v28 = vmul.f32 %v3502_v19, %v3057_v9 }
 0xb13   :  { %3130 = vmatmul.f32.gmra.mxu0 %v3063_v28 }
 0xb16   :  { %v3125_v23 = vpop.f32.mrf.mxu0 }
 0xb17   :  { %v3126_v20 = vadd.f32 %v5939_v31, %v3125_v23 }
 0xb19   :  { %3139 = vst [vmem:[%s5987_s9 + $0x28] sm:$0xff] %v3126_v20 }
 0xb1e   :  { %v3128_v26 = vpop.f32.mrf.mxu0 }
 0xb1f   :  { %v3129_v43 = vadd.f32 %v5939_v31, %v3128_v26 }
 0xb21   :  { %3140 = vst [vmem:[%s5987_s9 + $0x30] sm:$0xff] %v3129_v43 }
 0xb90   :  { %v3131_v60 = vpop.f32.mrf.mxu0 }
 0xb91   :  { %v3132_v27 = vadd.f32 %v5939_v31, %v3131_v60 }
 0xb93   :  { %3141 = vst [vmem:[%s5987_s9 + $0x38] sm:$0xff] %v3132_v27 }
 0xb94   :  { %3146 = vsyncpa [#allocation4], 1 }
 0xb95   :  { %3147 = vsyncpa [#allocation6], 1 }
 0xb96   :  { %3148 = vsyncpa [#allocation9], 1 }

</bundles_post_ra>
